<compile_context>
chip_gen: v7x
topology: tpu7x:2x2x1
jax: 0.10.0
libtpu: 0.0.40
codegen_flags: <defaults>
</compile_context>

<pallas_src>
import functools

import jax
import jax.numpy as jnp
from jax.experimental import pallas as pl
from jax.experimental.pallas import tpu as pltpu

# ------------------------- configuration (small shapes) -------------------------
IMG_SIZE   = (32, 32)
IN_CHANS   = 3
PATCH      = (8, 8)
ENC_DIM    = 64
ENC_LAYERS = 2
ENC_HEADS  = 4
DEC_DIM    = 32
DEC_LAYERS = 1
DEC_HEADS  = 2
MASK_RATIO = 0.75
BATCH      = 2

NH = IMG_SIZE[0] // PATCH[0]
NW = IMG_SIZE[1] // PATCH[1]
N_PATCHES = NH * NW
REMAIN_T = int(N_PATCHES * (1 - MASK_RATIO))


# ------------------------------ Pallas kernels ------------------------------

def _linear_kernel(x_ref, w_ref, b_ref, o_ref, *, activation):
    """Whole-array x @ w + b; bf16 MXU operands, f32 accumulation."""
    acc = jnp.dot(x_ref[...].astype(jnp.bfloat16),
                  w_ref[...].astype(jnp.bfloat16),
                  preferred_element_type=jnp.float32)
    acc = acc + b_ref[...].astype(jnp.float32)
    if activation == "gelu":
        # TODO(synk): torch nn.GELU is exact (erf); tanh-approx GELU is used
        # in-kernel for robust Mosaic lowering (numerical diff ~1e-3).
        acc = jax.nn.gelu(acc, approximate=True)
    o_ref[...] = acc.astype(o_ref.dtype)


def pallas_linear(x, w, b, activation=None):
    """x:[M,K] @ w:[K,N] + b:[N]  (whole-array blocks, single launch)."""
    M, K = x.shape
    Kw, N = w.shape
    assert K == Kw
    return pl.pallas_call(
        functools.partial(_linear_kernel, activation=activation),
        out_shape=jax.ShapeDtypeStruct((M, N), x.dtype),
    )(x, w, b.reshape(1, N))


def _layernorm_kernel(x_ref, g_ref, b_ref, o_ref, *, eps):
    xv = x_ref[...].astype(jnp.float32)
    mu = jnp.mean(xv, axis=-1, keepdims=True)
    var = jnp.mean((xv - mu) ** 2, axis=-1, keepdims=True)
    y = (xv - mu) * jax.lax.rsqrt(var + eps)
    o_ref[...] = (y * g_ref[...] + b_ref[...]).astype(o_ref.dtype)


def pallas_layernorm(x, g, b, eps=1e-5):
    M, D = x.shape
    return pl.pallas_call(
        functools.partial(_layernorm_kernel, eps=eps),
        out_shape=jax.ShapeDtypeStruct((M, D), x.dtype),
    )(x, g.reshape(1, D), b.reshape(1, D))


def _fused_block_kernel(x_ref, n1g_ref, n1b_ref, qkvw_ref, qkvb_ref,
                        projw_ref, projb_ref, n2g_ref, n2b_ref,
                        fc1w_ref, fc1b_ref, fc2w_ref, fc2b_ref,
                        o_ref, *, num_heads, eps):
    """One full timm ViT Block (eval) for one batch element, entirely in VMEM."""
    f32, bf16 = jnp.float32, jnp.bfloat16

    x = x_ref[0].astype(f32)                              # [T, C]
    T, C = x.shape
    d = C // num_heads
    scale = float(d) ** -0.5

    def ln(v, g_ref, b_ref):
        mu = jnp.mean(v, axis=-1, keepdims=True)
        var = jnp.mean((v - mu) ** 2, axis=-1, keepdims=True)
        return (v - mu) * jax.lax.rsqrt(var + eps) * g_ref[...].astype(f32) \
               + b_ref[...].astype(f32)

    # ---------------- attention branch (all heads in this kernel) ----------------
    h = ln(x, n1g_ref, n1b_ref)
    qkv = jnp.dot(h.astype(bf16), qkvw_ref[...].astype(bf16),
                  preferred_element_type=f32) + qkvb_ref[...].astype(f32)   # [T, 3C]

    projw = projw_ref[...].astype(bf16)                   # [C, C]
    attn_proj = jnp.zeros((T, C), f32)
    for hd in range(num_heads):                           # static unroll, H <= 4
        lo, hi = hd * d, (hd + 1) * d
        qh = qkv[:, lo:hi]
        kh = qkv[:, C + lo:C + hi]
        vh = qkv[:, 2 * C + lo:2 * C + hi]
        # scores: contract the head dim of both operands directly (no k.T copy)
        s = jax.lax.dot_general(
            qh.astype(bf16), kh.astype(bf16),
            dimension_numbers=(((1,), (1,)), ((), ())),
            preferred_element_type=f32) * scale           # [T, T]
        s = s - jnp.max(s, axis=-1, keepdims=True)
        p = jnp.exp(s)
        p = p * pl.reciprocal(jnp.sum(p, axis=-1, keepdims=True), approx=True)
        oh = jnp.dot(p.astype(bf16), vh.astype(bf16),
                     preferred_element_type=f32)          # [T, d]
        # fold head output straight into the output projection:
        #   concat_h(oh) @ Wp == sum_h oh @ Wp[h*d:(h+1)*d, :]
        attn_proj = attn_proj + jnp.dot(oh.astype(bf16), projw[lo:hi, :],
                                        preferred_element_type=f32)
    x = x + attn_proj + projb_ref[...].astype(f32)

    # -------------------------------- MLP branch --------------------------------
    h2 = ln(x, n2g_ref, n2b_ref)
    h2 = jnp.dot(h2.astype(bf16), fc1w_ref[...].astype(bf16),
                 preferred_element_type=f32) + fc1b_ref[...].astype(f32)
    # TODO(synk): tanh-approx GELU vs torch's exact erf GELU (~1e-3 diff).
    h2 = jax.nn.gelu(h2, approximate=True)
    h2 = jnp.dot(h2.astype(bf16), fc2w_ref[...].astype(bf16),
                 preferred_element_type=f32) + fc2b_ref[...].astype(f32)
    x = x + h2

    o_ref[0] = x.astype(o_ref.dtype)


def pallas_block(x, p, num_heads):
    """Fused timm ViT Block (eval): one pallas_call per block.  x: (B, T, C)."""
    B, T, C = x.shape
    C3, C4 = 3 * C, 4 * C
    vec = lambda a: a.reshape(1, -1)

    x_spec = pl.BlockSpec((1, T, C), lambda b: (b, 0, 0))

    def full2d(shape):
        return pl.BlockSpec(shape, lambda b: (0, 0))

    in_specs = [
        x_spec,
        full2d((1, C)), full2d((1, C)),       # norm1 gamma / beta
        full2d((C, C3)), full2d((1, C3)),     # qkv weight / bias
        full2d((C, C)), full2d((1, C)),       # proj weight / bias
        full2d((1, C)), full2d((1, C)),       # norm2 gamma / beta
        full2d((C, C4)), full2d((1, C4)),     # fc1 weight / bias
        full2d((C4, C)), full2d((1, C)),      # fc2 weight / bias
    ]
    return pl.pallas_call(
        functools.partial(_fused_block_kernel, num_heads=num_heads, eps=1e-5),
        grid=(B,),
        in_specs=in_specs,
        out_specs=x_spec,
        out_shape=jax.ShapeDtypeStruct((B, T, C), x.dtype),
        compiler_params=pltpu.CompilerParams(dimension_semantics=("parallel",)),
    )(x,
      vec(p["norm1_g"]), vec(p["norm1_b"]),
      p["qkv_w"], vec(p["qkv_b"]),
      p["proj_w"], vec(p["proj_b"]),
      vec(p["norm2_g"]), vec(p["norm2_b"]),
      p["fc1_w"], vec(p["fc1_b"]),
      p["fc2_w"], vec(p["fc2_b"]))


# ------------------------------ model glue (plain JAX) ------------------------------

def take_indexes(sequences, indexes):
    # sequences: (T, B, C), indexes: (T', B) -> (T', B, C)  (gather along dim 0)
    idx = jnp.broadcast_to(indexes[:, :, None],
                           indexes.shape + (sequences.shape[-1],))
    return jnp.take_along_axis(sequences, idx, axis=0)


def patch2img(patches, nh, nw, p1, p2):
    # '(h w) b (c p1 p2) -> b c (h p1) (w p2)'
    T, B, pp = patches.shape
    c = pp // (p1 * p2)
    x = patches.reshape(nh, nw, B, c, p1, p2)
    x = jnp.transpose(x, (2, 3, 0, 4, 1, 5))
    return x.reshape(B, c, nh * p1, nw * p2)


def encoder_forward(img, p, shuffle_key):
    # img: (B, C, H, W)  NCHW, same as the PyTorch module.
    B, C, H, W = img.shape
    p1, p2 = PATCH
    # Conv2d(stride=kernel) == patch-extract + matmul (Pallas kernel).
    x = img.reshape(B, C, NH, p1, NW, p2).transpose(0, 2, 4, 1, 3, 5)
    x = x.reshape(B * N_PATCHES, C * p1 * p2)
    emb = pallas_linear(x, p["patch_w"], p["patch_b"])               # (B*T, E)
    patches = emb.reshape(B, N_PATCHES, ENC_DIM).transpose(1, 0, 2)   # (T, B, E)
    patches = patches + p["pos_embedding"]                            # (T, 1, E)

    # PatchShuffle: per-batch random permutation (deterministic JAX PRNG
    # stands in for np.random.shuffle); vmapped over batch.
    keys = jax.random.split(shuffle_key, B)
    fwd = jax.vmap(lambda k: jax.random.permutation(k, N_PATCHES))(keys)
    fwd = jnp.transpose(fwd, (1, 0)).astype(jnp.int32)                # (T, B)
    bwd = jnp.argsort(fwd, axis=0).astype(jnp.int32)                  # (T, B)
    patches = take_indexes(patches, fwd)[:REMAIN_T]

    cls = jnp.broadcast_to(p["cls_token"], (1, B, ENC_DIM))
    patches = jnp.concatenate([cls, patches], axis=0)                 # (remain+1, B, E)
    xb = jnp.transpose(patches, (1, 0, 2))                            # (B, T', E)
    for blk in p["blocks"]:
        xb = pallas_block(xb, blk, ENC_HEADS)
    Bt, Tt, Ct = xb.shape
    xb = pallas_layernorm(xb.reshape(Bt * Tt, Ct), p["ln_g"], p["ln_b"]).reshape(Bt, Tt, Ct)
    features = jnp.transpose(xb, (1, 0, 2))                           # (T', B, E)
    return features, bwd


def decoder_forward(features, backward_indexes, p):
    # features: (T_vis, B, D)
    T_vis, B, D = features.shape
    bi = jnp.concatenate(
        [jnp.zeros((1, B), dtype=backward_indexes.dtype), backward_indexes + 1], axis=0)
    mask_tok = jnp.broadcast_to(p["mask_token"], (bi.shape[0] - T_vis, B, D))
    feats = jnp.concatenate([features, mask_tok], axis=0)
    feats = take_indexes(feats, bi)
    feats = feats + p["pos_embedding"]                                # (T_full+1, 1, D)

    xb = jnp.transpose(feats, (1, 0, 2))
    for blk in p["blocks"]:
        xb = pallas_block(xb, blk, DEC_HEADS)
    feats = jnp.transpose(xb, (1, 0, 2))[1:]                          # drop cls

    Tt, Bt, Ct = feats.shape
    patches = pallas_linear(feats.reshape(Tt * Bt, Ct),
                            p["head_w"], p["head_b"]).reshape(Tt, Bt, -1)
    mask = jnp.zeros_like(patches)
    mask = mask.at[T_vis:].set(1.0)   # same off-by-one convention as the PyTorch code
    mask = take_indexes(mask, bi[1:] - 1)

    img = patch2img(patches, NH, NW, PATCH[0], PATCH[1])
    mask_img = patch2img(mask, NH, NW, PATCH[0], PATCH[1])
    return img, mask_img


def mae_vit_forward(img, params, shuffle_key):
    features, backward_indexes = encoder_forward(img, params["encoder"], shuffle_key)
    T, B, E = features.shape
    features = pallas_linear(features.reshape(T * B, E),
                             params["proj_w"], params["proj_b"]).reshape(T, B, DEC_DIM)
    predicted_img, mask = decoder_forward(features, backward_indexes, params["decoder"])
    return {"predicted_img": predicted_img, "mask_matrix": mask}


# ------------------------------ deterministic init ------------------------------

def _init_linear(key, fan_in, fan_out, std=0.02):
    w = (jax.random.normal(key, (fan_in, fan_out), jnp.float32) * std)
    b = jnp.zeros((fan_out,), jnp.float32)
    return w, b


def _init_block(key, dim):
    ks = jax.random.split(key, 4)
    qkv_w, _ = _init_linear(ks[0], dim, 3 * dim)
    proj_w, proj_b = _init_linear(ks[1], dim, dim)
    fc1_w, fc1_b = _init_linear(ks[2], dim, 4 * dim)
    fc2_w, fc2_b = _init_linear(ks[3], 4 * dim, dim)
    return dict(
        norm1_g=jnp.ones((dim,), jnp.float32), norm1_b=jnp.zeros((dim,), jnp.float32),
        qkv_w=qkv_w, qkv_b=jnp.zeros((3 * dim,), jnp.float32),  # timm qkv_bias=False
        proj_w=proj_w, proj_b=proj_b,
        norm2_g=jnp.ones((dim,), jnp.float32), norm2_b=jnp.zeros((dim,), jnp.float32),
        fc1_w=fc1_w, fc1_b=fc1_b, fc2_w=fc2_w, fc2_b=fc2_b,
    )


def init_params(key):
    ke, kd, kp = jax.random.split(key, 3)

    # encoder
    eks = jax.random.split(ke, 4 + ENC_LAYERS)
    patch_w, patch_b = _init_linear(eks[0], IN_CHANS * PATCH[0] * PATCH[1], ENC_DIM)
    encoder = dict(
        cls_token=jax.random.normal(eks[1], (1, 1, ENC_DIM), jnp.float32) * 0.02,
        pos_embedding=jax.random.normal(eks[2], (N_PATCHES, 1, ENC_DIM), jnp.float32) * 0.02,
        patch_w=patch_w, patch_b=patch_b,
        blocks=[_init_block(eks[4 + i], ENC_DIM) for i in range(ENC_LAYERS)],
        ln_g=jnp.ones((ENC_DIM,), jnp.float32), ln_b=jnp.zeros((ENC_DIM,), jnp.float32),
    )

    # decoder
    dks = jax.random.split(kd, 4 + DEC_LAYERS)
    head_w, head_b = _init_linear(dks[0], DEC_DIM, PATCH[0] * PATCH[1])
    decoder = dict(
        mask_token=jax.random.normal(dks[1], (1, 1, DEC_DIM), jnp.float32) * 0.02,
        pos_embedding=jax.random.normal(dks[2], (N_PATCHES + 1, 1, DEC_DIM), jnp.float32) * 0.02,
        blocks=[_init_block(dks[4 + i], DEC_DIM) for i in range(DEC_LAYERS)],
        head_w=head_w, head_b=head_b,
    )

    proj_w, proj_b = _init_linear(kp, ENC_DIM, DEC_DIM)
    return dict(encoder=encoder, decoder=decoder, proj_w=proj_w, proj_b=proj_b)


# ------------------------------------ main ------------------------------------

if __name__ == "__main__":
    root = jax.random.PRNGKey(0)
    pkey, ikey, skey = jax.random.split(root, 3)

    params = init_params(pkey)
    img = jax.random.normal(ikey, (BATCH, IN_CHANS, IMG_SIZE[0], IMG_SIZE[1]), jnp.float32)

    forward = jax.jit(mae_vit_forward)
    out = forward(img, params, skey)
    out = jax.block_until_ready(out)

    assert out["predicted_img"].shape == (BATCH, 1, IMG_SIZE[0], IMG_SIZE[1])
    assert out["mask_matrix"].shape == (BATCH, 1, IMG_SIZE[0], IMG_SIZE[1])
    assert bool(jnp.all(jnp.isfinite(out["predicted_img"])))
    print("KERNEL_OK")
</pallas_src>

<mosaic_0001>
module attributes {stable_mosaic.version = 11 : i64} {
  func.func private @main(%arg0: i32) attributes {dimension_semantics = [#tpu.dimension_semantics<core_parallel>], iteration_bounds = array<i64: 2>, tpu.core_type = #tpu.core_type<sc_scalar_subcore>, window_params = []} {
    return
  }
}

module attributes {stable_mosaic.version = 11 : i64} {
  func.func private @main(%arg0: i32) attributes {dimension_semantics = [#tpu.dimension_semantics<core_parallel>], iteration_bounds = array<i64: 2>, tpu.core_type = #tpu.core_type<sc_scalar_subcore>, window_params = []} {
    return
  }
}

module attributes {stable_mosaic.version = 11 : i64} {
  func.func @_linear_kernel(%arg0: memref<32x192xf32, #tpu.memory_space<vmem>>, %arg1: memref<192x64xf32, #tpu.memory_space<vmem>>, %arg2: memref<1x64xf32, #tpu.memory_space<vmem>>, %arg3: memref<32x64xf32, #tpu.memory_space<vmem>>) attributes {dimension_semantics = [], scalar_prefetch = 0 : i64, scratch_operands = 0 : i64, tpu.core_type = #tpu.core_type<tc>} {
    %c0 = arith.constant 0 : index
    %c0_0 = arith.constant 0 : index
    %0 = vector.load %arg0[%c0, %c0_0] : memref<32x192xf32, #tpu.memory_space<vmem>>, vector<32x192xf32>
    %1 = arith.truncf %0 : vector<32x192xf32> to vector<32x192xbf16>
    %c0_1 = arith.constant 0 : index
    %c0_2 = arith.constant 0 : index
    %2 = vector.load %arg1[%c0_1, %c0_2] : memref<192x64xf32, #tpu.memory_space<vmem>>, vector<192x64xf32>
    %3 = arith.truncf %2 : vector<192x64xf32> to vector<192x64xbf16>
    %cst = arith.constant dense<0.000000e+00> : vector<32x64xf32>
    %4 = tpu.matmul %1, %3, %cst {dimension_numbers = #tpu.dot_dimension_numbers<[1], [0], [0], [1], [0, 0, 1, 1], [], []>} : vector<32x192xbf16>, vector<192x64xbf16>, vector<32x64xf32> -> vector<32x64xf32>
    %c0_3 = arith.constant 0 : index
    %c0_4 = arith.constant 0 : index
    %5 = vector.load %arg2[%c0_3, %c0_4] : memref<1x64xf32, #tpu.memory_space<vmem>>, vector<1x64xf32>
    %6 = vector.broadcast %5 : vector<1x64xf32> to vector<32x64xf32>
    %7 = arith.addf %4, %6 : vector<32x64xf32>
    %c0_5 = arith.constant 0 : index
    %c0_6 = arith.constant 0 : index
    %8 = vector.load %arg3[%c0_5, %c0_6] : memref<32x64xf32, #tpu.memory_space<vmem>>, vector<32x64xf32>
    tpu.vector_store %arg3[%c0_5, %c0_6], %7 {strides = array<i32>} : memref<32x64xf32, #tpu.memory_space<vmem>>, vector<32x64xf32>,
    return
  }
}

module attributes {stable_mosaic.version = 11 : i64} {
  func.func @_fused_block_kernel(%arg0: i32, %arg1: memref<1x5x64xf32, #tpu.memory_space<vmem>>, %arg2: memref<1x64xf32, #tpu.memory_space<vmem>>, %arg3: memref<1x64xf32, #tpu.memory_space<vmem>>, %arg4: memref<64x192xf32, #tpu.memory_space<vmem>>, %arg5: memref<1x192xf32, #tpu.memory_space<vmem>>, %arg6: memref<64x64xf32, #tpu.memory_space<vmem>>, %arg7: memref<1x64xf32, #tpu.memory_space<vmem>>, %arg8: memref<1x64xf32, #tpu.memory_space<vmem>>, %arg9: memref<1x64xf32, #tpu.memory_space<vmem>>, %arg10: memref<64x256xf32, #tpu.memory_space<vmem>>, %arg11: memref<1x256xf32, #tpu.memory_space<vmem>>, %arg12: memref<256x64xf32, #tpu.memory_space<vmem>>, %arg13: memref<1x64xf32, #tpu.memory_space<vmem>>, %arg14: memref<1x5x64xf32, #tpu.memory_space<vmem>>) attributes {dimension_semantics = [#tpu.dimension_semantics<parallel>], iteration_bounds = array<i64: 2>, scalar_prefetch = 0 : i64, scratch_operands = 0 : i64, tpu.core_type = #tpu.core_type<tc>, window_params = [{transform_indices = @transform_0, window_bounds = array<i64: 1, 5, 64>}, {pipeline_mode = #tpu.pipeline_mode<synchronous>, transform_indices = @transform_1, window_bounds = array<i64: 1, 64>}, {pipeline_mode = #tpu.pipeline_mode<synchronous>, transform_indices = @transform_2, window_bounds = array<i64: 1, 64>}, {pipeline_mode = #tpu.pipeline_mode<synchronous>, transform_indices = @transform_3, window_bounds = array<i64: 64, 192>}, {pipeline_mode = #tpu.pipeline_mode<synchronous>, transform_indices = @transform_4, window_bounds = array<i64: 1, 192>}, {pipeline_mode = #tpu.pipeline_mode<synchronous>, transform_indices = @transform_5, window_bounds = array<i64: 64, 64>}, {pipeline_mode = #tpu.pipeline_mode<synchronous>, transform_indices = @transform_6, window_bounds = array<i64: 1, 64>}, {pipeline_mode = #tpu.pipeline_mode<synchronous>, transform_indices = @transform_7, window_bounds = array<i64: 1, 64>}, {pipeline_mode = #tpu.pipeline_mode<synchronous>, transform_indices = @transform_8, window_bounds = array<i64: 1, 64>}, {pipeline_mode = #tpu.pipeline_mode<synchronous>, transform_indices = @transform_9, window_bounds = array<i64: 64, 256>}, {pipeline_mode = #tpu.pipeline_mode<synchronous>, transform_indices = @transform_10, window_bounds = array<i64: 1, 256>}, {pipeline_mode = #tpu.pipeline_mode<synchronous>, transform_indices = @transform_11, window_bounds = array<i64: 256, 64>}, {pipeline_mode = #tpu.pipeline_mode<synchronous>, transform_indices = @transform_12, window_bounds = array<i64: 1, 64>}, {transform_indices = @transform_13, window_bounds = array<i64: 1, 5, 64>}]} {
    %c0 = arith.constant 0 : index
    %c0_0 = arith.constant 0 : index
    %c0_1 = arith.constant 0 : index
    %0 = vector.load %arg1[%c0, %c0_0, %c0_1] : memref<1x5x64xf32, #tpu.memory_space<vmem>>, vector<1x5x64xf32>
    %1 = vector.shape_cast %0 : vector<1x5x64xf32> to vector<5x64xf32>
    %cst = arith.constant dense<0.000000e+00> : vector<5xf32>
    %2 = vector.multi_reduction <add>, %1, %cst [1] : vector<5x64xf32> to vector<5xf32>
    %3 = vector.shape_cast %2 : vector<5xf32> to vector<5x1xf32>
    %cst_2 = arith.constant 6.400000e+01 : f32
    %4 = vector.broadcast %cst_2 : f32 to vector<5x1xf32>
    %5 = arith.divf %3, %4 : vector<5x1xf32>
    %6 = vector.broadcast %5 : vector<5x1xf32> to vector<5x64xf32>
    %7 = arith.subf %1, %6 : vector<5x64xf32>
    %8 = arith.mulf %7, %7 : vector<5x64xf32>
    %cst_3 = arith.constant dense<0.000000e+00> : vector<5xf32>
    %9 = vector.multi_reduction <add>, %8, %cst_3 [1] : vector<5x64xf32> to vector<5xf32>
    %10 = vector.shape_cast %9 : vector<5xf32> to vector<5x1xf32>
    %cst_4 = arith.constant 6.400000e+01 : f32
    %11 = vector.broadcast %cst_4 : f32 to vector<5x1xf32>
    %12 = arith.divf %10, %11 : vector<5x1xf32>
    %13 = vector.broadcast %5 : vector<5x1xf32> to vector<5x64xf32>
    %14 = arith.subf %1, %13 : vector<5x64xf32>
    %cst_5 = arith.constant 9.99999974E-6 : f32
    %15 = vector.broadcast %cst_5 : f32 to vector<5x1xf32>
    %16 = arith.addf %12, %15 : vector<5x1xf32>
    %17 = math.rsqrt %16 : vector<5x1xf32>
    %18 = vector.broadcast %17 : vector<5x1xf32> to vector<5x64xf32>
    %19 = arith.mulf %14, %18 : vector<5x64xf32>
    %c0_6 = arith.constant 0 : index
    %c0_7 = arith.constant 0 : index
    %20 = vector.load %arg2[%c0_6, %c0_7] : memref<1x64xf32, #tpu.memory_space<vmem>>, vector<1x64xf32>
    %21 = vector.broadcast %20 : vector<1x64xf32> to vector<5x64xf32>
    %22 = arith.mulf %19, %21 : vector<5x64xf32>
    %c0_8 = arith.constant 0 : index
    %c0_9 = arith.constant 0 : index
    %23 = vector.load %arg3[%c0_8, %c0_9] : memref<1x64xf32, #tpu.memory_space<vmem>>, vector<1x64xf32>
    %24 = vector.broadcast %23 : vector<1x64xf32> to vector<5x64xf32>
    %25 = arith.addf %22, %24 : vector<5x64xf32>
    %26 = arith.truncf %25 : vector<5x64xf32> to vector<5x64xbf16>
    %c0_10 = arith.constant 0 : index
    %c0_11 = arith.constant 0 : index
    %27 = vector.load %arg4[%c0_10, %c0_11] : memref<64x192xf32, #tpu.memory_space<vmem>>, vector<64x192xf32>
    %28 = arith.truncf %27 : vector<64x192xf32> to vector<64x192xbf16>
    %cst_12 = arith.constant dense<0.000000e+00> : vector<5x192xf32>
    %29 = tpu.matmul %26, %28, %cst_12 {dimension_numbers = #tpu.dot_dimension_numbers<[1], [0], [0], [1], [0, 0, 1, 1], [], []>} : vector<5x64xbf16>, vector<64x192xbf16>, vector<5x192xf32> -> vector<5x192xf32>
    %c0_13 = arith.constant 0 : index
    %c0_14 = arith.constant 0 : index
    %30 = vector.load %arg5[%c0_13, %c0_14] : memref<1x192xf32, #tpu.memory_space<vmem>>, vector<1x192xf32>
    %31 = vector.broadcast %30 : vector<1x192xf32> to vector<5x192xf32>
    %32 = arith.addf %29, %31 : vector<5x192xf32>
    %c0_15 = arith.constant 0 : index
    %c0_16 = arith.constant 0 : index
    %33 = vector.load %arg6[%c0_15, %c0_16] : memref<64x64xf32, #tpu.memory_space<vmem>>, vector<64x64xf32>
    %34 = arith.truncf %33 : vector<64x64xf32> to vector<64x64xbf16>
    %cst_17 = arith.constant 0.000000e+00 : f32
    %35 = vector.broadcast %cst_17 : f32 to vector<5x64xf32>
    %36 = vector.extract_strided_slice %32 {offsets = [0, 0], sizes = [5, 16], strides = [1, 1]} : vector<5x192xf32> to vector<5x16xf32>
    %37 = vector.extract_strided_slice %32 {offsets = [0, 64], sizes = [5, 16], strides = [1, 1]} : vector<5x192xf32> to vector<5x16xf32>
    %38 = vector.extract_strided_slice %32 {offsets = [0, 128], sizes = [5, 16], strides = [1, 1]} : vector<5x192xf32> to vector<5x16xf32>
    %39 = arith.truncf %36 : vector<5x16xf32> to vector<5x16xbf16>
    %40 = arith.truncf %37 : vector<5x16xf32> to vector<5x16xbf16>
    %cst_18 = arith.constant dense<0.000000e+00> : vector<5x5xf32>
    %41 = tpu.matmul %39, %40, %cst_18 {dimension_numbers = #tpu.dot_dimension_numbers<[1], [1], [0], [0], [0, 0, 1, 0], [], []>} : vector<5x16xbf16>, vector<5x16xbf16>, vector<5x5xf32> -> vector<5x5xf32>
    %cst_19 = arith.constant 2.500000e-01 : f32
    %42 = vector.broadcast %cst_19 : f32 to vector<5x5xf32>
    %43 = arith.mulf %41, %42 : vector<5x5xf32>
    %cst_20 = arith.constant dense<0xFF800000> : vector<5xf32>
    %44 = vector.multi_reduction <maximumf>, %43, %cst_20 [1] : vector<5x5xf32> to vector<5xf32>
    %45 = vector.shape_cast %44 : vector<5xf32> to vector<5x1xf32>
    %46 = vector.broadcast %45 : vector<5x1xf32> to vector<5x5xf32>
    %47 = arith.subf %43, %46 : vector<5x5xf32>
    %48 = math.exp %47 : vector<5x5xf32>
    %cst_21 = arith.constant dense<0.000000e+00> : vector<5xf32>
    %49 = vector.multi_reduction <add>, %48, %cst_21 [1] : vector<5x5xf32> to vector<5xf32>
    %50 = vector.shape_cast %49 : vector<5xf32> to vector<5x1xf32>
    %51 = tpu.reciprocal %50 {approx = true} : vector<5x1xf32> -> vector<5x1xf32>
    %52 = vector.broadcast %51 : vector<5x1xf32> to vector<5x5xf32>
    %53 = arith.mulf %48, %52 : vector<5x5xf32>
    %54 = arith.truncf %53 : vector<5x5xf32> to vector<5x5xbf16>
    %55 = arith.truncf %38 : vector<5x16xf32> to vector<5x16xbf16>
    %cst_22 = arith.constant dense<0.000000e+00> : vector<5x16xf32>
    %56 = tpu.matmul %54, %55, %cst_22 {dimension_numbers = #tpu.dot_dimension_numbers<[1], [0], [0], [1], [0, 0, 1, 1], [], []>} : vector<5x5xbf16>, vector<5x16xbf16>, vector<5x16xf32> -> vector<5x16xf32>
    %57 = arith.truncf %56 : vector<5x16xf32> to vector<5x16xbf16>
    %58 = vector.extract_strided_slice %34 {offsets = [0, 0], sizes = [16, 64], strides = [1, 1]} : vector<64x64xbf16> to vector<16x64xbf16>
    %cst_23 = arith.constant dense<0.000000e+00> : vector<5x64xf32>
    %59 = tpu.matmul %57, %58, %cst_23 {dimension_numbers = #tpu.dot_dimension_numbers<[1], [0], [0], [1], [0, 0, 1, 1], [], []>} : vector<5x16xbf16>, vector<16x64xbf16>, vector<5x64xf32> -> vector<5x64xf32>
    %60 = arith.addf %35, %59 : vector<5x64xf32>
    %61 = vector.extract_strided_slice %32 {offsets = [0, 16], sizes = [5, 16], strides = [1, 1]} : vector<5x192xf32> to vector<5x16xf32>
    %62 = vector.extract_strided_slice %32 {offsets = [0, 80], sizes = [5, 16], strides = [1, 1]} : vector<5x192xf32> to vector<5x16xf32>
    %63 = vector.extract_strided_slice %32 {offsets = [0, 144], sizes = [5, 16], strides = [1, 1]} : vector<5x192xf32> to vector<5x16xf32>
    %64 = arith.truncf %61 : vector<5x16xf32> to vector<5x16xbf16>
    %65 = arith.truncf %62 : vector<5x16xf32> to vector<5x16xbf16>
    %cst_24 = arith.constant dense<0.000000e+00> : vector<5x5xf32>
    %66 = tpu.matmul %64, %65, %cst_24 {dimension_numbers = #tpu.dot_dimension_numbers<[1], [1], [0], [0], [0, 0, 1, 0], [], []>} : vector<5x16xbf16>, vector<5x16xbf16>, vector<5x5xf32> -> vector<5x5xf32>
    %cst_25 = arith.constant 2.500000e-01 : f32
    %67 = vector.broadcast %cst_25 : f32 to vector<5x5xf32>
    %68 = arith.mulf %66, %67 : vector<5x5xf32>
    %cst_26 = arith.constant dense<0xFF800000> : vector<5xf32>
    %69 = vector.multi_reduction <maximumf>, %68, %cst_26 [1] : vector<5x5xf32> to vector<5xf32>
    %70 = vector.shape_cast %69 : vector<5xf32> to vector<5x1xf32>
    %71 = vector.broadcast %70 : vector<5x1xf32> to vector<5x5xf32>
    %72 = arith.subf %68, %71 : vector<5x5xf32>
    %73 = math.exp %72 : vector<5x5xf32>
    %cst_27 = arith.constant dense<0.000000e+00> : vector<5xf32>
    %74 = vector.multi_reduction <add>, %73, %cst_27 [1] : vector<5x5xf32> to vector<5xf32>
    %75 = vector.shape_cast %74 : vector<5xf32> to vector<5x1xf32>
    %76 = tpu.reciprocal %75 {approx = true} : vector<5x1xf32> -> vector<5x1xf32>
    %77 = vector.broadcast %76 : vector<5x1xf32> to vector<5x5xf32>
    %78 = arith.mulf %73, %77 : vector<5x5xf32>
    %79 = arith.truncf %78 : vector<5x5xf32> to vector<5x5xbf16>
    %80 = arith.truncf %63 : vector<5x16xf32> to vector<5x16xbf16>
    %cst_28 = arith.constant dense<0.000000e+00> : vector<5x16xf32>
    %81 = tpu.matmul %79, %80, %cst_28 {dimension_numbers = #tpu.dot_dimension_numbers<[1], [0], [0], [1], [0, 0, 1, 1], [], []>} : vector<5x5xbf16>, vector<5x16xbf16>, vector<5x16xf32> -> vector<5x16xf32>
    %82 = arith.truncf %81 : vector<5x16xf32> to vector<5x16xbf16>
    %83 = vector.extract_strided_slice %34 {offsets = [16, 0], sizes = [16, 64], strides = [1, 1]} : vector<64x64xbf16> to vector<16x64xbf16>
    %cst_29 = arith.constant dense<0.000000e+00> : vector<5x64xf32>
    %84 = tpu.matmul %82, %83, %cst_29 {dimension_numbers = #tpu.dot_dimension_numbers<[1], [0], [0], [1], [0, 0, 1, 1], [], []>} : vector<5x16xbf16>, vector<16x64xbf16>, vector<5x64xf32> -> vector<5x64xf32>
    %85 = arith.addf %60, %84 : vector<5x64xf32>
    %86 = vector.extract_strided_slice %32 {offsets = [0, 32], sizes = [5, 16], strides = [1, 1]} : vector<5x192xf32> to vector<5x16xf32>
    %87 = vector.extract_strided_slice %32 {offsets = [0, 96], sizes = [5, 16], strides = [1, 1]} : vector<5x192xf32> to vector<5x16xf32>
    %88 = vector.extract_strided_slice %32 {offsets = [0, 160], sizes = [5, 16], strides = [1, 1]} : vector<5x192xf32> to vector<5x16xf32>
    %89 = arith.truncf %86 : vector<5x16xf32> to vector<5x16xbf16>
    %90 = arith.truncf %87 : vector<5x16xf32> to vector<5x16xbf16>
    %cst_30 = arith.constant dense<0.000000e+00> : vector<5x5xf32>
    %91 = tpu.matmul %89, %90, %cst_30 {dimension_numbers = #tpu.dot_dimension_numbers<[1], [1], [0], [0], [0, 0, 1, 0], [], []>} : vector<5x16xbf16>, vector<5x16xbf16>, vector<5x5xf32> -> vector<5x5xf32>
    %cst_31 = arith.constant 2.500000e-01 : f32
    %92 = vector.broadcast %cst_31 : f32 to vector<5x5xf32>
    %93 = arith.mulf %91, %92 : vector<5x5xf32>
    %cst_32 = arith.constant dense<0xFF800000> : vector<5xf32>
    %94 = vector.multi_reduction <maximumf>, %93, %cst_32 [1] : vector<5x5xf32> to vector<5xf32>
    %95 = vector.shape_cast %94 : vector<5xf32> to vector<5x1xf32>
    %96 = vector.broadcast %95 : vector<5x1xf32> to vector<5x5xf32>
    %97 = arith.subf %93, %96 : vector<5x5xf32>
    %98 = math.exp %97 : vector<5x5xf32>
    %cst_33 = arith.constant dense<0.000000e+00> : vector<5xf32>
    %99 = vector.multi_reduction <add>, %98, %cst_33 [1] : vector<5x5xf32> to vector<5xf32>
    %100 = vector.shape_cast %99 : vector<5xf32> to vector<5x1xf32>
    %101 = tpu.reciprocal %100 {approx = true} : vector<5x1xf32> -> vector<5x1xf32>
    %102 = vector.broadcast %101 : vector<5x1xf32> to vector<5x5xf32>
    %103 = arith.mulf %98, %102 : vector<5x5xf32>
    %104 = arith.truncf %103 : vector<5x5xf32> to vector<5x5xbf16>
    %105 = arith.truncf %88 : vector<5x16xf32> to vector<5x16xbf16>
    %cst_34 = arith.constant dense<0.000000e+00> : vector<5x16xf32>
    %106 = tpu.matmul %104, %105, %cst_34 {dimension_numbers = #tpu.dot_dimension_numbers<[1], [0], [0], [1], [0, 0, 1, 1], [], []>} : vector<5x5xbf16>, vector<5x16xbf16>, vector<5x16xf32> -> vector<5x16xf32>
    %107 = arith.truncf %106 : vector<5x16xf32> to vector<5x16xbf16>
    %108 = vector.extract_strided_slice %34 {offsets = [32, 0], sizes = [16, 64], strides = [1, 1]} : vector<64x64xbf16> to vector<16x64xbf16>
    %cst_35 = arith.constant dense<0.000000e+00> : vector<5x64xf32>
    %109 = tpu.matmul %107, %108, %cst_35 {dimension_numbers = #tpu.dot_dimension_numbers<[1], [0], [0], [1], [0, 0, 1, 1], [], []>} : vector<5x16xbf16>, vector<16x64xbf16>, vector<5x64xf32> -> vector<5x64xf32>
    %110 = arith.addf %85, %109 : vector<5x64xf32>
    %111 = vector.extract_strided_slice %32 {offsets = [0, 48], sizes = [5, 16], strides = [1, 1]} : vector<5x192xf32> to vector<5x16xf32>
    %112 = vector.extract_strided_slice %32 {offsets = [0, 112], sizes = [5, 16], strides = [1, 1]} : vector<5x192xf32> to vector<5x16xf32>
    %113 = vector.extract_strided_slice %32 {offsets = [0, 176], sizes = [5, 16], strides = [1, 1]} : vector<5x192xf32> to vector<5x16xf32>
    %114 = arith.truncf %111 : vector<5x16xf32> to vector<5x16xbf16>
    %115 = arith.truncf %112 : vector<5x16xf32> to vector<5x16xbf16>
    %cst_36 = arith.constant dense<0.000000e+00> : vector<5x5xf32>
    %116 = tpu.matmul %114, %115, %cst_36 {dimension_numbers = #tpu.dot_dimension_numbers<[1], [1], [0], [0], [0, 0, 1, 0], [], []>} : vector<5x16xbf16>, vector<5x16xbf16>, vector<5x5xf32> -> vector<5x5xf32>
    %cst_37 = arith.constant 2.500000e-01 : f32
    %117 = vector.broadcast %cst_37 : f32 to vector<5x5xf32>
    %118 = arith.mulf %116, %117 : vector<5x5xf32>
    %cst_38 = arith.constant dense<0xFF800000> : vector<5xf32>
    %119 = vector.multi_reduction <maximumf>, %118, %cst_38 [1] : vector<5x5xf32> to vector<5xf32>
    %120 = vector.shape_cast %119 : vector<5xf32> to vector<5x1xf32>
    %121 = vector.broadcast %120 : vector<5x1xf32> to vector<5x5xf32>
    %122 = arith.subf %118, %121 : vector<5x5xf32>
    %123 = math.exp %122 : vector<5x5xf32>
    %cst_39 = arith.constant dense<0.000000e+00> : vector<5xf32>
    %124 = vector.multi_reduction <add>, %123, %cst_39 [1] : vector<5x5xf32> to vector<5xf32>
    %125 = vector.shape_cast %124 : vector<5xf32> to vector<5x1xf32>
    %126 = tpu.reciprocal %125 {approx = true} : vector<5x1xf32> -> vector<5x1xf32>
    %127 = vector.broadcast %126 : vector<5x1xf32> to vector<5x5xf32>
    %128 = arith.mulf %123, %127 : vector<5x5xf32>
    %129 = arith.truncf %128 : vector<5x5xf32> to vector<5x5xbf16>
    %130 = arith.truncf %113 : vector<5x16xf32> to vector<5x16xbf16>
    %cst_40 = arith.constant dense<0.000000e+00> : vector<5x16xf32>
    %131 = tpu.matmul %129, %130, %cst_40 {dimension_numbers = #tpu.dot_dimension_numbers<[1], [0], [0], [1], [0, 0, 1, 1], [], []>} : vector<5x5xbf16>, vector<5x16xbf16>, vector<5x16xf32> -> vector<5x16xf32>
    %132 = arith.truncf %131 : vector<5x16xf32> to vector<5x16xbf16>
    %133 = vector.extract_strided_slice %34 {offsets = [48, 0], sizes = [16, 64], strides = [1, 1]} : vector<64x64xbf16> to vector<16x64xbf16>
    %cst_41 = arith.constant dense<0.000000e+00> : vector<5x64xf32>
    %134 = tpu.matmul %132, %133, %cst_41 {dimension_numbers = #tpu.dot_dimension_numbers<[1], [0], [0], [1], [0, 0, 1, 1], [], []>} : vector<5x16xbf16>, vector<16x64xbf16>, vector<5x64xf32> -> vector<5x64xf32>
    %135 = arith.addf %110, %134 : vector<5x64xf32>
    %136 = arith.addf %1, %135 : vector<5x64xf32>
    %c0_42 = arith.constant 0 : index
    %c0_43 = arith.constant 0 : index
    %137 = vector.load %arg7[%c0_42, %c0_43] : memref<1x64xf32, #tpu.memory_space<vmem>>, vector<1x64xf32>
    %138 = vector.broadcast %137 : vector<1x64xf32> to vector<5x64xf32>
    %139 = arith.addf %136, %138 : vector<5x64xf32>
    %cst_44 = arith.constant dense<0.000000e+00> : vector<5xf32>
    %140 = vector.multi_reduction <add>, %139, %cst_44 [1] : vector<5x64xf32> to vector<5xf32>
    %141 = vector.shape_cast %140 : vector<5xf32> to vector<5x1xf32>
    %cst_45 = arith.constant 6.400000e+01 : f32
    %142 = vector.broadcast %cst_45 : f32 to vector<5x1xf32>
    %143 = arith.divf %141, %142 : vector<5x1xf32>
    %144 = vector.broadcast %143 : vector<5x1xf32> to vector<5x64xf32>
    %145 = arith.subf %139, %144 : vector<5x64xf32>
    %146 = arith.mulf %145, %145 : vector<5x64xf32>
    %cst_46 = arith.constant dense<0.000000e+00> : vector<5xf32>
    %147 = vector.multi_reduction <add>, %146, %cst_46 [1] : vector<5x64xf32> to vector<5xf32>
    %148 = vector.shape_cast %147 : vector<5xf32> to vector<5x1xf32>
    %cst_47 = arith.constant 6.400000e+01 : f32
    %149 = vector.broadcast %cst_47 : f32 to vector<5x1xf32>
    %150 = arith.divf %148, %149 : vector<5x1xf32>
    %151 = vector.broadcast %143 : vector<5x1xf32> to vector<5x64xf32>
    %152 = arith.subf %139, %151 : vector<5x64xf32>
    %cst_48 = arith.constant 9.99999974E-6 : f32
    %153 = vector.broadcast %cst_48 : f32 to vector<5x1xf32>
    %154 = arith.addf %150, %153 : vector<5x1xf32>
    %155 = math.rsqrt %154 : vector<5x1xf32>
    %156 = vector.broadcast %155 : vector<5x1xf32> to vector<5x64xf32>
    %157 = arith.mulf %152, %156 : vector<5x64xf32>
    %c0_49 = arith.constant 0 : index
    %c0_50 = arith.constant 0 : index
    %158 = vector.load %arg8[%c0_49, %c0_50] : memref<1x64xf32, #tpu.memory_space<vmem>>, vector<1x64xf32>
    %159 = vector.broadcast %158 : vector<1x64xf32> to vector<5x64xf32>
    %160 = arith.mulf %157, %159 : vector<5x64xf32>
    %c0_51 = arith.constant 0 : index
    %c0_52 = arith.constant 0 : index
    %161 = vector.load %arg9[%c0_51, %c0_52] : memref<1x64xf32, #tpu.memory_space<vmem>>, vector<1x64xf32>
    %162 = vector.broadcast %161 : vector<1x64xf32> to vector<5x64xf32>
    %163 = arith.addf %160, %162 : vector<5x64xf32>
    %164 = arith.truncf %163 : vector<5x64xf32> to vector<5x64xbf16>
    %c0_53 = arith.constant 0 : index
    %c0_54 = arith.constant 0 : index
    %165 = vector.load %arg10[%c0_53, %c0_54] : memref<64x256xf32, #tpu.memory_space<vmem>>, vector<64x256xf32>
    %166 = arith.truncf %165 : vector<64x256xf32> to vector<64x256xbf16>
    %cst_55 = arith.constant dense<0.000000e+00> : vector<5x256xf32>
    %167 = tpu.matmul %164, %166, %cst_55 {dimension_numbers = #tpu.dot_dimension_numbers<[1], [0], [0], [1], [0, 0, 1, 1], [], []>} : vector<5x64xbf16>, vector<64x256xbf16>, vector<5x256xf32> -> vector<5x256xf32>
    %c0_56 = arith.constant 0 : index
    %c0_57 = arith.constant 0 : index
    %168 = vector.load %arg11[%c0_56, %c0_57] : memref<1x256xf32, #tpu.memory_space<vmem>>, vector<1x256xf32>
    %169 = vector.broadcast %168 : vector<1x256xf32> to vector<5x256xf32>
    %170 = arith.addf %167, %169 : vector<5x256xf32>
    %171 = arith.mulf %170, %170 : vector<5x256xf32>
    %172 = arith.mulf %170, %171 : vector<5x256xf32>
    %cst_58 = arith.constant 4.471500e-02 : f32
    %173 = vector.broadcast %cst_58 : f32 to vector<5x256xf32>
    %174 = arith.mulf %173, %172 : vector<5x256xf32>
    %175 = arith.addf %170, %174 : vector<5x256xf32>
    %cst_59 = arith.constant 0.797884583 : f32
    %176 = vector.broadcast %cst_59 : f32 to vector<5x256xf32>
    %177 = arith.mulf %176, %175 : vector<5x256xf32>
    %178 = math.tanh %177 : vector<5x256xf32>
    %cst_60 = arith.constant 1.000000e+00 : f32
    %179 = vector.broadcast %cst_60 : f32 to vector<5x256xf32>
    %180 = arith.addf %179, %178 : vector<5x256xf32>
    %cst_61 = arith.constant 5.000000e-01 : f32
    %181 = vector.broadcast %cst_61 : f32 to vector<5x256xf32>
    %182 = arith.mulf %181, %180 : vector<5x256xf32>
    %183 = arith.mulf %170, %182 : vector<5x256xf32>
    %184 = arith.truncf %183 : vector<5x256xf32> to vector<5x256xbf16>
    %c0_62 = arith.constant 0 : index
    %c0_63 = arith.constant 0 : index
    %185 = vector.load %arg12[%c0_62, %c0_63] : memref<256x64xf32, #tpu.memory_space<vmem>>, vector<256x64xf32>
    %186 = arith.truncf %185 : vector<256x64xf32> to vector<256x64xbf16>
    %cst_64 = arith.constant dense<0.000000e+00> : vector<5x64xf32>
    %187 = tpu.matmul %184, %186, %cst_64 {dimension_numbers = #tpu.dot_dimension_numbers<[1], [0], [0], [1], [0, 0, 1, 1], [], []>} : vector<5x256xbf16>, vector<256x64xbf16>, vector<5x64xf32> -> vector<5x64xf32>
    %c0_65 = arith.constant 0 : index
    %c0_66 = arith.constant 0 : index
    %188 = vector.load %arg13[%c0_65, %c0_66] : memref<1x64xf32, #tpu.memory_space<vmem>>, vector<1x64xf32>
    %189 = vector.broadcast %188 : vector<1x64xf32> to vector<5x64xf32>
    %190 = arith.addf %187, %189 : vector<5x64xf32>
    %191 = arith.addf %139, %190 : vector<5x64xf32>
    %c0_67 = arith.constant 0 : index
    %c0_68 = arith.constant 0 : index
    %c0_69 = arith.constant 0 : index
    %192 = vector.load %arg14[%c0_67, %c0_68, %c0_69] : memref<1x5x64xf32, #tpu.memory_space<vmem>>, vector<1x5x64xf32>
    %193 = vector.shape_cast %192 : vector<1x5x64xf32> to vector<5x64xf32>
    %194 = vector.shape_cast %191 : vector<5x64xf32> to vector<1x5x64xf32>
    tpu.vector_store %arg14[%c0_67, %c0_68, %c0_69], %194 {strides = array<i32>} : memref<1x5x64xf32, #tpu.memory_space<vmem>>, vector<1x5x64xf32>,
    return
  }
  func.func @transform_0(%arg0: i32) -> (i32, i32, i32) {
    %c0_i32 = arith.constant 0 : i32
    %c0_i32_0 = arith.constant 0 : i32
    %c0_i32_1 = arith.constant 0 : i32
    return %arg0, %c0_i32, %c0_i32_0 : i32, i32, i32
  }
  func.func @transform_1(%arg0: i32) -> (i32, i32) {
    %c0_i32 = arith.constant 0 : i32
    %c0_i32_0 = arith.constant 0 : i32
    %c0_i32_1 = arith.constant 0 : i32
    return %c0_i32, %c0_i32_0 : i32, i32
  }
  func.func @transform_2(%arg0: i32) -> (i32, i32) {
    %c0_i32 = arith.constant 0 : i32
    %c0_i32_0 = arith.constant 0 : i32
    %c0_i32_1 = arith.constant 0 : i32
    return %c0_i32, %c0_i32_0 : i32, i32
  }
  func.func @transform_3(%arg0: i32) -> (i32, i32) {
    %c0_i32 = arith.constant 0 : i32
    %c0_i32_0 = arith.constant 0 : i32
    %c0_i32_1 = arith.constant 0 : i32
    return %c0_i32, %c0_i32_0 : i32, i32
  }
  func.func @transform_4(%arg0: i32) -> (i32, i32) {
    %c0_i32 = arith.constant 0 : i32
    %c0_i32_0 = arith.constant 0 : i32
    %c0_i32_1 = arith.constant 0 : i32
    return %c0_i32, %c0_i32_0 : i32, i32
  }
  func.func @transform_5(%arg0: i32) -> (i32, i32) {
    %c0_i32 = arith.constant 0 : i32
    %c0_i32_0 = arith.constant 0 : i32
    %c0_i32_1 = arith.constant 0 : i32
    return %c0_i32, %c0_i32_0 : i32, i32
  }
  func.func @transform_6(%arg0: i32) -> (i32, i32) {
    %c0_i32 = arith.constant 0 : i32
    %c0_i32_0 = arith.constant 0 : i32
    %c0_i32_1 = arith.constant 0 : i32
    return %c0_i32, %c0_i32_0 : i32, i32
  }
  func.func @transform_7(%arg0: i32) -> (i32, i32) {
    %c0_i32 = arith.constant 0 : i32
    %c0_i32_0 = arith.constant 0 : i32
    %c0_i32_1 = arith.constant 0 : i32
    return %c0_i32, %c0_i32_0 : i32, i32
  }
  func.func @transform_8(%arg0: i32) -> (i32, i32) {
    %c0_i32 = arith.constant 0 : i32
    %c0_i32_0 = arith.constant 0 : i32
    %c0_i32_1 = arith.constant 0 : i32
    return %c0_i32, %c0_i32_0 : i32, i32
  }
  func.func @transform_9(%arg0: i32) -> (i32, i32) {
    %c0_i32 = arith.constant 0 : i32
    %c0_i32_0 = arith.constant 0 : i32
    %c0_i32_1 = arith.constant 0 : i32
    return %c0_i32, %c0_i32_0 : i32, i32
  }
  func.func @transform_10(%arg0: i32) -> (i32, i32) {
    %c0_i32 = arith.constant 0 : i32
    %c0_i32_0 = arith.constant 0 : i32
    %c0_i32_1 = arith.constant 0 : i32
    return %c0_i32, %c0_i32_0 : i32, i32
  }
  func.func @transform_11(%arg0: i32) -> (i32, i32) {
    %c0_i32 = arith.constant 0 : i32
    %c0_i32_0 = arith.constant 0 : i32
    %c0_i32_1 = arith.constant 0 : i32
    return %c0_i32, %c0_i32_0 : i32, i32
  }
  func.func @transform_12(%arg0: i32) -> (i32, i32) {
    %c0_i32 = arith.constant 0 : i32
    %c0_i32_0 = arith.constant 0 : i32
    %c0_i32_1 = arith.constant 0 : i32
    return %c0_i32, %c0_i32_0 : i32, i32
  }
  func.func @transform_13(%arg0: i32) -> (i32, i32, i32) {
    %c0_i32 = arith.constant 0 : i32
    %c0_i32_0 = arith.constant 0 : i32
    %c0_i32_1 = arith.constant 0 : i32
    return %arg0, %c0_i32, %c0_i32_0 : i32, i32, i32
  }
}

module attributes {stable_mosaic.version = 11 : i64} {
  func.func @_linear_kernel(%arg0: memref<10x64xf32, #tpu.memory_space<vmem>>, %arg1: memref<64x32xf32, #tpu.memory_space<vmem>>, %arg2: memref<1x32xf32, #tpu.memory_space<vmem>>, %arg3: memref<10x32xf32, #tpu.memory_space<vmem>>) attributes {dimension_semantics = [], scalar_prefetch = 0 : i64, scratch_operands = 0 : i64, tpu.core_type = #tpu.core_type<tc>} {
    %c0 = arith.constant 0 : index
    %c0_0 = arith.constant 0 : index
    %0 = vector.load %arg0[%c0, %c0_0] : memref<10x64xf32, #tpu.memory_space<vmem>>, vector<10x64xf32>
    %1 = arith.truncf %0 : vector<10x64xf32> to vector<10x64xbf16>
    %c0_1 = arith.constant 0 : index
    %c0_2 = arith.constant 0 : index
    %2 = vector.load %arg1[%c0_1, %c0_2] : memref<64x32xf32, #tpu.memory_space<vmem>>, vector<64x32xf32>
    %3 = arith.truncf %2 : vector<64x32xf32> to vector<64x32xbf16>
    %cst = arith.constant dense<0.000000e+00> : vector<10x32xf32>
    %4 = tpu.matmul %1, %3, %cst {dimension_numbers = #tpu.dot_dimension_numbers<[1], [0], [0], [1], [0, 0, 1, 1], [], []>} : vector<10x64xbf16>, vector<64x32xbf16>, vector<10x32xf32> -> vector<10x32xf32>
    %c0_3 = arith.constant 0 : index
    %c0_4 = arith.constant 0 : index
    %5 = vector.load %arg2[%c0_3, %c0_4] : memref<1x32xf32, #tpu.memory_space<vmem>>, vector<1x32xf32>
    %6 = vector.broadcast %5 : vector<1x32xf32> to vector<10x32xf32>
    %7 = arith.addf %4, %6 : vector<10x32xf32>
    %c0_5 = arith.constant 0 : index
    %c0_6 = arith.constant 0 : index
    %8 = vector.load %arg3[%c0_5, %c0_6] : memref<10x32xf32, #tpu.memory_space<vmem>>, vector<10x32xf32>
    tpu.vector_store %arg3[%c0_5, %c0_6], %7 {strides = array<i32>} : memref<10x32xf32, #tpu.memory_space<vmem>>, vector<10x32xf32>,
    return
  }
}

module attributes {stable_mosaic.version = 11 : i64} {
  func.func @_layernorm_kernel(%arg0: memref<10x64xf32, #tpu.memory_space<vmem>>, %arg1: memref<1x64xf32, #tpu.memory_space<vmem>>, %arg2: memref<1x64xf32, #tpu.memory_space<vmem>>, %arg3: memref<10x64xf32, #tpu.memory_space<vmem>>) attributes {dimension_semantics = [], scalar_prefetch = 0 : i64, scratch_operands = 0 : i64, tpu.core_type = #tpu.core_type<tc>} {
    %c0 = arith.constant 0 : index
    %c0_0 = arith.constant 0 : index
    %0 = vector.load %arg0[%c0, %c0_0] : memref<10x64xf32, #tpu.memory_space<vmem>>, vector<10x64xf32>
    %cst = arith.constant dense<0.000000e+00> : vector<10xf32>
    %1 = vector.multi_reduction <add>, %0, %cst [1] : vector<10x64xf32> to vector<10xf32>
    %2 = vector.shape_cast %1 : vector<10xf32> to vector<10x1xf32>
    %cst_1 = arith.constant 6.400000e+01 : f32
    %3 = vector.broadcast %cst_1 : f32 to vector<10x1xf32>
    %4 = arith.divf %2, %3 : vector<10x1xf32>
    %5 = vector.broadcast %4 : vector<10x1xf32> to vector<10x64xf32>
    %6 = arith.subf %0, %5 : vector<10x64xf32>
    %7 = arith.mulf %6, %6 : vector<10x64xf32>
    %cst_2 = arith.constant dense<0.000000e+00> : vector<10xf32>
    %8 = vector.multi_reduction <add>, %7, %cst_2 [1] : vector<10x64xf32> to vector<10xf32>
    %9 = vector.shape_cast %8 : vector<10xf32> to vector<10x1xf32>
    %cst_3 = arith.constant 6.400000e+01 : f32
    %10 = vector.broadcast %cst_3 : f32 to vector<10x1xf32>
    %11 = arith.divf %9, %10 : vector<10x1xf32>
    %12 = vector.broadcast %4 : vector<10x1xf32> to vector<10x64xf32>
    %13 = arith.subf %0, %12 : vector<10x64xf32>
    %cst_4 = arith.constant 9.99999974E-6 : f32
    %14 = vector.broadcast %cst_4 : f32 to vector<10x1xf32>
    %15 = arith.addf %11, %14 : vector<10x1xf32>
    %16 = math.rsqrt %15 : vector<10x1xf32>
    %17 = vector.broadcast %16 : vector<10x1xf32> to vector<10x64xf32>
    %18 = arith.mulf %13, %17 : vector<10x64xf32>
    %c0_5 = arith.constant 0 : index
    %c0_6 = arith.constant 0 : index
    %19 = vector.load %arg1[%c0_5, %c0_6] : memref<1x64xf32, #tpu.memory_space<vmem>>, vector<1x64xf32>
    %20 = vector.broadcast %19 : vector<1x64xf32> to vector<10x64xf32>
    %21 = arith.mulf %18, %20 : vector<10x64xf32>
    %c0_7 = arith.constant 0 : index
    %c0_8 = arith.constant 0 : index
    %22 = vector.load %arg2[%c0_7, %c0_8] : memref<1x64xf32, #tpu.memory_space<vmem>>, vector<1x64xf32>
    %23 = vector.broadcast %22 : vector<1x64xf32> to vector<10x64xf32>
    %24 = arith.addf %21, %23 : vector<10x64xf32>
    %c0_9 = arith.constant 0 : index
    %c0_10 = arith.constant 0 : index
    %25 = vector.load %arg3[%c0_9, %c0_10] : memref<10x64xf32, #tpu.memory_space<vmem>>, vector<10x64xf32>
    tpu.vector_store %arg3[%c0_9, %c0_10], %24 {strides = array<i32>} : memref<10x64xf32, #tpu.memory_space<vmem>>, vector<10x64xf32>,
    return
  }
}

module attributes {stable_mosaic.version = 11 : i64} {
  func.func @_linear_kernel(%arg0: memref<32x32xf32, #tpu.memory_space<vmem>>, %arg1: memref<32x64xf32, #tpu.memory_space<vmem>>, %arg2: memref<1x64xf32, #tpu.memory_space<vmem>>, %arg3: memref<32x64xf32, #tpu.memory_space<vmem>>) attributes {dimension_semantics = [], scalar_prefetch = 0 : i64, scratch_operands = 0 : i64, tpu.core_type = #tpu.core_type<tc>} {
    %c0 = arith.constant 0 : index
    %c0_0 = arith.constant 0 : index
    %0 = vector.load %arg0[%c0, %c0_0] : memref<32x32xf32, #tpu.memory_space<vmem>>, vector<32x32xf32>
    %1 = arith.truncf %0 : vector<32x32xf32> to vector<32x32xbf16>
    %c0_1 = arith.constant 0 : index
    %c0_2 = arith.constant 0 : index
    %2 = vector.load %arg1[%c0_1, %c0_2] : memref<32x64xf32, #tpu.memory_space<vmem>>, vector<32x64xf32>
    %3 = arith.truncf %2 : vector<32x64xf32> to vector<32x64xbf16>
    %cst = arith.constant dense<0.000000e+00> : vector<32x64xf32>
    %4 = tpu.matmul %1, %3, %cst {dimension_numbers = #tpu.dot_dimension_numbers<[1], [0], [0], [1], [0, 0, 1, 1], [], []>} : vector<32x32xbf16>, vector<32x64xbf16>, vector<32x64xf32> -> vector<32x64xf32>
    %c0_3 = arith.constant 0 : index
    %c0_4 = arith.constant 0 : index
    %5 = vector.load %arg2[%c0_3, %c0_4] : memref<1x64xf32, #tpu.memory_space<vmem>>, vector<1x64xf32>
    %6 = vector.broadcast %5 : vector<1x64xf32> to vector<32x64xf32>
    %7 = arith.addf %4, %6 : vector<32x64xf32>
    %c0_5 = arith.constant 0 : index
    %c0_6 = arith.constant 0 : index
    %8 = vector.load %arg3[%c0_5, %c0_6] : memref<32x64xf32, #tpu.memory_space<vmem>>, vector<32x64xf32>
    tpu.vector_store %arg3[%c0_5, %c0_6], %7 {strides = array<i32>} : memref<32x64xf32, #tpu.memory_space<vmem>>, vector<32x64xf32>,
    return
  }
}

module attributes {stable_mosaic.version = 11 : i64} {
  func.func @_fused_block_kernel(%arg0: i32, %arg1: memref<1x17x32xf32, #tpu.memory_space<vmem>>, %arg2: memref<1x32xf32, #tpu.memory_space<vmem>>, %arg3: memref<1x32xf32, #tpu.memory_space<vmem>>, %arg4: memref<32x96xf32, #tpu.memory_space<vmem>>, %arg5: memref<1x96xf32, #tpu.memory_space<vmem>>, %arg6: memref<32x32xf32, #tpu.memory_space<vmem>>, %arg7: memref<1x32xf32, #tpu.memory_space<vmem>>, %arg8: memref<1x32xf32, #tpu.memory_space<vmem>>, %arg9: memref<1x32xf32, #tpu.memory_space<vmem>>, %arg10: memref<32x128xf32, #tpu.memory_space<vmem>>, %arg11: memref<1x128xf32, #tpu.memory_space<vmem>>, %arg12: memref<128x32xf32, #tpu.memory_space<vmem>>, %arg13: memref<1x32xf32, #tpu.memory_space<vmem>>, %arg14: memref<1x17x32xf32, #tpu.memory_space<vmem>>) attributes {dimension_semantics = [#tpu.dimension_semantics<parallel>], iteration_bounds = array<i64: 2>, scalar_prefetch = 0 : i64, scratch_operands = 0 : i64, tpu.core_type = #tpu.core_type<tc>, window_params = [{transform_indices = @transform_0, window_bounds = array<i64: 1, 17, 32>}, {pipeline_mode = #tpu.pipeline_mode<synchronous>, transform_indices = @transform_1, window_bounds = array<i64: 1, 32>}, {pipeline_mode = #tpu.pipeline_mode<synchronous>, transform_indices = @transform_2, window_bounds = array<i64: 1, 32>}, {pipeline_mode = #tpu.pipeline_mode<synchronous>, transform_indices = @transform_3, window_bounds = array<i64: 32, 96>}, {pipeline_mode = #tpu.pipeline_mode<synchronous>, transform_indices = @transform_4, window_bounds = array<i64: 1, 96>}, {pipeline_mode = #tpu.pipeline_mode<synchronous>, transform_indices = @transform_5, window_bounds = array<i64: 32, 32>}, {pipeline_mode = #tpu.pipeline_mode<synchronous>, transform_indices = @transform_6, window_bounds = array<i64: 1, 32>}, {pipeline_mode = #tpu.pipeline_mode<synchronous>, transform_indices = @transform_7, window_bounds = array<i64: 1, 32>}, {pipeline_mode = #tpu.pipeline_mode<synchronous>, transform_indices = @transform_8, window_bounds = array<i64: 1, 32>}, {pipeline_mode = #tpu.pipeline_mode<synchronous>, transform_indices = @transform_9, window_bounds = array<i64: 32, 128>}, {pipeline_mode = #tpu.pipeline_mode<synchronous>, transform_indices = @transform_10, window_bounds = array<i64: 1, 128>}, {pipeline_mode = #tpu.pipeline_mode<synchronous>, transform_indices = @transform_11, window_bounds = array<i64: 128, 32>}, {pipeline_mode = #tpu.pipeline_mode<synchronous>, transform_indices = @transform_12, window_bounds = array<i64: 1, 32>}, {transform_indices = @transform_13, window_bounds = array<i64: 1, 17, 32>}]} {
    %c0 = arith.constant 0 : index
    %c0_0 = arith.constant 0 : index
    %c0_1 = arith.constant 0 : index
    %0 = vector.load %arg1[%c0, %c0_0, %c0_1] : memref<1x17x32xf32, #tpu.memory_space<vmem>>, vector<1x17x32xf32>
    %1 = vector.shape_cast %0 : vector<1x17x32xf32> to vector<17x32xf32>
    %cst = arith.constant dense<0.000000e+00> : vector<17xf32>
    %2 = vector.multi_reduction <add>, %1, %cst [1] : vector<17x32xf32> to vector<17xf32>
    %3 = vector.shape_cast %2 : vector<17xf32> to vector<17x1xf32>
    %cst_2 = arith.constant 3.200000e+01 : f32
    %4 = vector.broadcast %cst_2 : f32 to vector<17x1xf32>
    %5 = arith.divf %3, %4 : vector<17x1xf32>
    %6 = vector.broadcast %5 : vector<17x1xf32> to vector<17x32xf32>
    %7 = arith.subf %1, %6 : vector<17x32xf32>
    %8 = arith.mulf %7, %7 : vector<17x32xf32>
    %cst_3 = arith.constant dense<0.000000e+00> : vector<17xf32>
    %9 = vector.multi_reduction <add>, %8, %cst_3 [1] : vector<17x32xf32> to vector<17xf32>
    %10 = vector.shape_cast %9 : vector<17xf32> to vector<17x1xf32>
    %cst_4 = arith.constant 3.200000e+01 : f32
    %11 = vector.broadcast %cst_4 : f32 to vector<17x1xf32>
    %12 = arith.divf %10, %11 : vector<17x1xf32>
    %13 = vector.broadcast %5 : vector<17x1xf32> to vector<17x32xf32>
    %14 = arith.subf %1, %13 : vector<17x32xf32>
    %cst_5 = arith.constant 9.99999974E-6 : f32
    %15 = vector.broadcast %cst_5 : f32 to vector<17x1xf32>
    %16 = arith.addf %12, %15 : vector<17x1xf32>
    %17 = math.rsqrt %16 : vector<17x1xf32>
    %18 = vector.broadcast %17 : vector<17x1xf32> to vector<17x32xf32>
    %19 = arith.mulf %14, %18 : vector<17x32xf32>
    %c0_6 = arith.constant 0 : index
    %c0_7 = arith.constant 0 : index
    %20 = vector.load %arg2[%c0_6, %c0_7] : memref<1x32xf32, #tpu.memory_space<vmem>>, vector<1x32xf32>
    %21 = vector.broadcast %20 : vector<1x32xf32> to vector<17x32xf32>
    %22 = arith.mulf %19, %21 : vector<17x32xf32>
    %c0_8 = arith.constant 0 : index
    %c0_9 = arith.constant 0 : index
    %23 = vector.load %arg3[%c0_8, %c0_9] : memref<1x32xf32, #tpu.memory_space<vmem>>, vector<1x32xf32>
    %24 = vector.broadcast %23 : vector<1x32xf32> to vector<17x32xf32>
    %25 = arith.addf %22, %24 : vector<17x32xf32>
    %26 = arith.truncf %25 : vector<17x32xf32> to vector<17x32xbf16>
    %c0_10 = arith.constant 0 : index
    %c0_11 = arith.constant 0 : index
    %27 = vector.load %arg4[%c0_10, %c0_11] : memref<32x96xf32, #tpu.memory_space<vmem>>, vector<32x96xf32>
    %28 = arith.truncf %27 : vector<32x96xf32> to vector<32x96xbf16>
    %cst_12 = arith.constant dense<0.000000e+00> : vector<17x96xf32>
    %29 = tpu.matmul %26, %28, %cst_12 {dimension_numbers = #tpu.dot_dimension_numbers<[1], [0], [0], [1], [0, 0, 1, 1], [], []>} : vector<17x32xbf16>, vector<32x96xbf16>, vector<17x96xf32> -> vector<17x96xf32>
    %c0_13 = arith.constant 0 : index
    %c0_14 = arith.constant 0 : index
    %30 = vector.load %arg5[%c0_13, %c0_14] : memref<1x96xf32, #tpu.memory_space<vmem>>, vector<1x96xf32>
    %31 = vector.broadcast %30 : vector<1x96xf32> to vector<17x96xf32>
    %32 = arith.addf %29, %31 : vector<17x96xf32>
    %c0_15 = arith.constant 0 : index
    %c0_16 = arith.constant 0 : index
    %33 = vector.load %arg6[%c0_15, %c0_16] : memref<32x32xf32, #tpu.memory_space<vmem>>, vector<32x32xf32>
    %34 = arith.truncf %33 : vector<32x32xf32> to vector<32x32xbf16>
    %cst_17 = arith.constant 0.000000e+00 : f32
    %35 = vector.broadcast %cst_17 : f32 to vector<17x32xf32>
    %36 = vector.extract_strided_slice %32 {offsets = [0, 0], sizes = [17, 16], strides = [1, 1]} : vector<17x96xf32> to vector<17x16xf32>
    %37 = vector.extract_strided_slice %32 {offsets = [0, 32], sizes = [17, 16], strides = [1, 1]} : vector<17x96xf32> to vector<17x16xf32>
    %38 = vector.extract_strided_slice %32 {offsets = [0, 64], sizes = [17, 16], strides = [1, 1]} : vector<17x96xf32> to vector<17x16xf32>
    %39 = arith.truncf %36 : vector<17x16xf32> to vector<17x16xbf16>
    %40 = arith.truncf %37 : vector<17x16xf32> to vector<17x16xbf16>
    %cst_18 = arith.constant dense<0.000000e+00> : vector<17x17xf32>
    %41 = tpu.matmul %39, %40, %cst_18 {dimension_numbers = #tpu.dot_dimension_numbers<[1], [1], [0], [0], [0, 0, 1, 0], [], []>} : vector<17x16xbf16>, vector<17x16xbf16>, vector<17x17xf32> -> vector<17x17xf32>
    %cst_19 = arith.constant 2.500000e-01 : f32
    %42 = vector.broadcast %cst_19 : f32 to vector<17x17xf32>
    %43 = arith.mulf %41, %42 : vector<17x17xf32>
    %cst_20 = arith.constant dense<0xFF800000> : vector<17xf32>
    %44 = vector.multi_reduction <maximumf>, %43, %cst_20 [1] : vector<17x17xf32> to vector<17xf32>
    %45 = vector.shape_cast %44 : vector<17xf32> to vector<17x1xf32>
    %46 = vector.broadcast %45 : vector<17x1xf32> to vector<17x17xf32>
    %47 = arith.subf %43, %46 : vector<17x17xf32>
    %48 = math.exp %47 : vector<17x17xf32>
    %cst_21 = arith.constant dense<0.000000e+00> : vector<17xf32>
    %49 = vector.multi_reduction <add>, %48, %cst_21 [1] : vector<17x17xf32> to vector<17xf32>
    %50 = vector.shape_cast %49 : vector<17xf32> to vector<17x1xf32>
    %51 = tpu.reciprocal %50 {approx = true} : vector<17x1xf32> -> vector<17x1xf32>
    %52 = vector.broadcast %51 : vector<17x1xf32> to vector<17x17xf32>
    %53 = arith.mulf %48, %52 : vector<17x17xf32>
    %54 = arith.truncf %53 : vector<17x17xf32> to vector<17x17xbf16>
    %55 = arith.truncf %38 : vector<17x16xf32> to vector<17x16xbf16>
    %cst_22 = arith.constant dense<0.000000e+00> : vector<17x16xf32>
    %56 = tpu.matmul %54, %55, %cst_22 {dimension_numbers = #tpu.dot_dimension_numbers<[1], [0], [0], [1], [0, 0, 1, 1], [], []>} : vector<17x17xbf16>, vector<17x16xbf16>, vector<17x16xf32> -> vector<17x16xf32>
    %57 = arith.truncf %56 : vector<17x16xf32> to vector<17x16xbf16>
    %58 = vector.extract_strided_slice %34 {offsets = [0, 0], sizes = [16, 32], strides = [1, 1]} : vector<32x32xbf16> to vector<16x32xbf16>
    %cst_23 = arith.constant dense<0.000000e+00> : vector<17x32xf32>
    %59 = tpu.matmul %57, %58, %cst_23 {dimension_numbers = #tpu.dot_dimension_numbers<[1], [0], [0], [1], [0, 0, 1, 1], [], []>} : vector<17x16xbf16>, vector<16x32xbf16>, vector<17x32xf32> -> vector<17x32xf32>
    %60 = arith.addf %35, %59 : vector<17x32xf32>
    %61 = vector.extract_strided_slice %32 {offsets = [0, 16], sizes = [17, 16], strides = [1, 1]} : vector<17x96xf32> to vector<17x16xf32>
    %62 = vector.extract_strided_slice %32 {offsets = [0, 48], sizes = [17, 16], strides = [1, 1]} : vector<17x96xf32> to vector<17x16xf32>
    %63 = vector.extract_strided_slice %32 {offsets = [0, 80], sizes = [17, 16], strides = [1, 1]} : vector<17x96xf32> to vector<17x16xf32>
    %64 = arith.truncf %61 : vector<17x16xf32> to vector<17x16xbf16>
    %65 = arith.truncf %62 : vector<17x16xf32> to vector<17x16xbf16>
    %cst_24 = arith.constant dense<0.000000e+00> : vector<17x17xf32>
    %66 = tpu.matmul %64, %65, %cst_24 {dimension_numbers = #tpu.dot_dimension_numbers<[1], [1], [0], [0], [0, 0, 1, 0], [], []>} : vector<17x16xbf16>, vector<17x16xbf16>, vector<17x17xf32> -> vector<17x17xf32>
    %cst_25 = arith.constant 2.500000e-01 : f32
    %67 = vector.broadcast %cst_25 : f32 to vector<17x17xf32>
    %68 = arith.mulf %66, %67 : vector<17x17xf32>
    %cst_26 = arith.constant dense<0xFF800000> : vector<17xf32>
    %69 = vector.multi_reduction <maximumf>, %68, %cst_26 [1] : vector<17x17xf32> to vector<17xf32>
    %70 = vector.shape_cast %69 : vector<17xf32> to vector<17x1xf32>
    %71 = vector.broadcast %70 : vector<17x1xf32> to vector<17x17xf32>
    %72 = arith.subf %68, %71 : vector<17x17xf32>
    %73 = math.exp %72 : vector<17x17xf32>
    %cst_27 = arith.constant dense<0.000000e+00> : vector<17xf32>
    %74 = vector.multi_reduction <add>, %73, %cst_27 [1] : vector<17x17xf32> to vector<17xf32>
    %75 = vector.shape_cast %74 : vector<17xf32> to vector<17x1xf32>
    %76 = tpu.reciprocal %75 {approx = true} : vector<17x1xf32> -> vector<17x1xf32>
    %77 = vector.broadcast %76 : vector<17x1xf32> to vector<17x17xf32>
    %78 = arith.mulf %73, %77 : vector<17x17xf32>
    %79 = arith.truncf %78 : vector<17x17xf32> to vector<17x17xbf16>
    %80 = arith.truncf %63 : vector<17x16xf32> to vector<17x16xbf16>
    %cst_28 = arith.constant dense<0.000000e+00> : vector<17x16xf32>
    %81 = tpu.matmul %79, %80, %cst_28 {dimension_numbers = #tpu.dot_dimension_numbers<[1], [0], [0], [1], [0, 0, 1, 1], [], []>} : vector<17x17xbf16>, vector<17x16xbf16>, vector<17x16xf32> -> vector<17x16xf32>
    %82 = arith.truncf %81 : vector<17x16xf32> to vector<17x16xbf16>
    %83 = vector.extract_strided_slice %34 {offsets = [16, 0], sizes = [16, 32], strides = [1, 1]} : vector<32x32xbf16> to vector<16x32xbf16>
    %cst_29 = arith.constant dense<0.000000e+00> : vector<17x32xf32>
    %84 = tpu.matmul %82, %83, %cst_29 {dimension_numbers = #tpu.dot_dimension_numbers<[1], [0], [0], [1], [0, 0, 1, 1], [], []>} : vector<17x16xbf16>, vector<16x32xbf16>, vector<17x32xf32> -> vector<17x32xf32>
    %85 = arith.addf %60, %84 : vector<17x32xf32>
    %86 = arith.addf %1, %85 : vector<17x32xf32>
    %c0_30 = arith.constant 0 : index
    %c0_31 = arith.constant 0 : index
    %87 = vector.load %arg7[%c0_30, %c0_31] : memref<1x32xf32, #tpu.memory_space<vmem>>, vector<1x32xf32>
    %88 = vector.broadcast %87 : vector<1x32xf32> to vector<17x32xf32>
    %89 = arith.addf %86, %88 : vector<17x32xf32>
    %cst_32 = arith.constant dense<0.000000e+00> : vector<17xf32>
    %90 = vector.multi_reduction <add>, %89, %cst_32 [1] : vector<17x32xf32> to vector<17xf32>
    %91 = vector.shape_cast %90 : vector<17xf32> to vector<17x1xf32>
    %cst_33 = arith.constant 3.200000e+01 : f32
    %92 = vector.broadcast %cst_33 : f32 to vector<17x1xf32>
    %93 = arith.divf %91, %92 : vector<17x1xf32>
    %94 = vector.broadcast %93 : vector<17x1xf32> to vector<17x32xf32>
    %95 = arith.subf %89, %94 : vector<17x32xf32>
    %96 = arith.mulf %95, %95 : vector<17x32xf32>
    %cst_34 = arith.constant dense<0.000000e+00> : vector<17xf32>
    %97 = vector.multi_reduction <add>, %96, %cst_34 [1] : vector<17x32xf32> to vector<17xf32>
    %98 = vector.shape_cast %97 : vector<17xf32> to vector<17x1xf32>
    %cst_35 = arith.constant 3.200000e+01 : f32
    %99 = vector.broadcast %cst_35 : f32 to vector<17x1xf32>
    %100 = arith.divf %98, %99 : vector<17x1xf32>
    %101 = vector.broadcast %93 : vector<17x1xf32> to vector<17x32xf32>
    %102 = arith.subf %89, %101 : vector<17x32xf32>
    %cst_36 = arith.constant 9.99999974E-6 : f32
    %103 = vector.broadcast %cst_36 : f32 to vector<17x1xf32>
    %104 = arith.addf %100, %103 : vector<17x1xf32>
    %105 = math.rsqrt %104 : vector<17x1xf32>
    %106 = vector.broadcast %105 : vector<17x1xf32> to vector<17x32xf32>
    %107 = arith.mulf %102, %106 : vector<17x32xf32>
    %c0_37 = arith.constant 0 : index
    %c0_38 = arith.constant 0 : index
    %108 = vector.load %arg8[%c0_37, %c0_38] : memref<1x32xf32, #tpu.memory_space<vmem>>, vector<1x32xf32>
    %109 = vector.broadcast %108 : vector<1x32xf32> to vector<17x32xf32>
    %110 = arith.mulf %107, %109 : vector<17x32xf32>
    %c0_39 = arith.constant 0 : index
    %c0_40 = arith.constant 0 : index
    %111 = vector.load %arg9[%c0_39, %c0_40] : memref<1x32xf32, #tpu.memory_space<vmem>>, vector<1x32xf32>
    %112 = vector.broadcast %111 : vector<1x32xf32> to vector<17x32xf32>
    %113 = arith.addf %110, %112 : vector<17x32xf32>
    %114 = arith.truncf %113 : vector<17x32xf32> to vector<17x32xbf16>
    %c0_41 = arith.constant 0 : index
    %c0_42 = arith.constant 0 : index
    %115 = vector.load %arg10[%c0_41, %c0_42] : memref<32x128xf32, #tpu.memory_space<vmem>>, vector<32x128xf32>
    %116 = arith.truncf %115 : vector<32x128xf32> to vector<32x128xbf16>
    %cst_43 = arith.constant dense<0.000000e+00> : vector<17x128xf32>
    %117 = tpu.matmul %114, %116, %cst_43 {dimension_numbers = #tpu.dot_dimension_numbers<[1], [0], [0], [1], [0, 0, 1, 1], [], []>} : vector<17x32xbf16>, vector<32x128xbf16>, vector<17x128xf32> -> vector<17x128xf32>
    %c0_44 = arith.constant 0 : index
    %c0_45 = arith.constant 0 : index
    %118 = vector.load %arg11[%c0_44, %c0_45] : memref<1x128xf32, #tpu.memory_space<vmem>>, vector<1x128xf32>
    %119 = vector.broadcast %118 : vector<1x128xf32> to vector<17x128xf32>
    %120 = arith.addf %117, %119 : vector<17x128xf32>
    %121 = arith.mulf %120, %120 : vector<17x128xf32>
    %122 = arith.mulf %120, %121 : vector<17x128xf32>
    %cst_46 = arith.constant 4.471500e-02 : f32
    %123 = vector.broadcast %cst_46 : f32 to vector<17x128xf32>
    %124 = arith.mulf %123, %122 : vector<17x128xf32>
    %125 = arith.addf %120, %124 : vector<17x128xf32>
    %cst_47 = arith.constant 0.797884583 : f32
    %126 = vector.broadcast %cst_47 : f32 to vector<17x128xf32>
    %127 = arith.mulf %126, %125 : vector<17x128xf32>
    %128 = math.tanh %127 : vector<17x128xf32>
    %cst_48 = arith.constant 1.000000e+00 : f32
    %129 = vector.broadcast %cst_48 : f32 to vector<17x128xf32>
    %130 = arith.addf %129, %128 : vector<17x128xf32>
    %cst_49 = arith.constant 5.000000e-01 : f32
    %131 = vector.broadcast %cst_49 : f32 to vector<17x128xf32>
    %132 = arith.mulf %131, %130 : vector<17x128xf32>
    %133 = arith.mulf %120, %132 : vector<17x128xf32>
    %134 = arith.truncf %133 : vector<17x128xf32> to vector<17x128xbf16>
    %c0_50 = arith.constant 0 : index
    %c0_51 = arith.constant 0 : index
    %135 = vector.load %arg12[%c0_50, %c0_51] : memref<128x32xf32, #tpu.memory_space<vmem>>, vector<128x32xf32>
    %136 = arith.truncf %135 : vector<128x32xf32> to vector<128x32xbf16>
    %cst_52 = arith.constant dense<0.000000e+00> : vector<17x32xf32>
    %137 = tpu.matmul %134, %136, %cst_52 {dimension_numbers = #tpu.dot_dimension_numbers<[1], [0], [0], [1], [0, 0, 1, 1], [], []>} : vector<17x128xbf16>, vector<128x32xbf16>, vector<17x32xf32> -> vector<17x32xf32>
    %c0_53 = arith.constant 0 : index
    %c0_54 = arith.constant 0 : index
    %138 = vector.load %arg13[%c0_53, %c0_54] : memref<1x32xf32, #tpu.memory_space<vmem>>, vector<1x32xf32>
    %139 = vector.broadcast %138 : vector<1x32xf32> to vector<17x32xf32>
    %140 = arith.addf %137, %139 : vector<17x32xf32>
    %141 = arith.addf %89, %140 : vector<17x32xf32>
    %c0_55 = arith.constant 0 : index
    %c0_56 = arith.constant 0 : index
    %c0_57 = arith.constant 0 : index
    %142 = vector.load %arg14[%c0_55, %c0_56, %c0_57] : memref<1x17x32xf32, #tpu.memory_space<vmem>>, vector<1x17x32xf32>
    %143 = vector.shape_cast %142 : vector<1x17x32xf32> to vector<17x32xf32>
    %144 = vector.shape_cast %141 : vector<17x32xf32> to vector<1x17x32xf32>
    tpu.vector_store %arg14[%c0_55, %c0_56, %c0_57], %144 {strides = array<i32>} : memref<1x17x32xf32, #tpu.memory_space<vmem>>, vector<1x17x32xf32>,
    return
  }
  func.func @transform_0(%arg0: i32) -> (i32, i32, i32) {
    %c0_i32 = arith.constant 0 : i32
    %c0_i32_0 = arith.constant 0 : i32
    %c0_i32_1 = arith.constant 0 : i32
    return %arg0, %c0_i32, %c0_i32_0 : i32, i32, i32
  }
  func.func @transform_1(%arg0: i32) -> (i32, i32) {
    %c0_i32 = arith.constant 0 : i32
    %c0_i32_0 = arith.constant 0 : i32
    %c0_i32_1 = arith.constant 0 : i32
    return %c0_i32, %c0_i32_0 : i32, i32
  }
  func.func @transform_2(%arg0: i32) -> (i32, i32) {
    %c0_i32 = arith.constant 0 : i32
    %c0_i32_0 = arith.constant 0 : i32
    %c0_i32_1 = arith.constant 0 : i32
    return %c0_i32, %c0_i32_0 : i32, i32
  }
  func.func @transform_3(%arg0: i32) -> (i32, i32) {
    %c0_i32 = arith.constant 0 : i32
    %c0_i32_0 = arith.constant 0 : i32
    %c0_i32_1 = arith.constant 0 : i32
    return %c0_i32, %c0_i32_0 : i32, i32
  }
  func.func @transform_4(%arg0: i32) -> (i32, i32) {
    %c0_i32 = arith.constant 0 : i32
    %c0_i32_0 = arith.constant 0 : i32
    %c0_i32_1 = arith.constant 0 : i32
    return %c0_i32, %c0_i32_0 : i32, i32
  }
  func.func @transform_5(%arg0: i32) -> (i32, i32) {
    %c0_i32 = arith.constant 0 : i32
    %c0_i32_0 = arith.constant 0 : i32
    %c0_i32_1 = arith.constant 0 : i32
    return %c0_i32, %c0_i32_0 : i32, i32
  }
  func.func @transform_6(%arg0: i32) -> (i32, i32) {
    %c0_i32 = arith.constant 0 : i32
    %c0_i32_0 = arith.constant 0 : i32
    %c0_i32_1 = arith.constant 0 : i32
    return %c0_i32, %c0_i32_0 : i32, i32
  }
  func.func @transform_7(%arg0: i32) -> (i32, i32) {
    %c0_i32 = arith.constant 0 : i32
    %c0_i32_0 = arith.constant 0 : i32
    %c0_i32_1 = arith.constant 0 : i32
    return %c0_i32, %c0_i32_0 : i32, i32
  }
  func.func @transform_8(%arg0: i32) -> (i32, i32) {
    %c0_i32 = arith.constant 0 : i32
    %c0_i32_0 = arith.constant 0 : i32
    %c0_i32_1 = arith.constant 0 : i32
    return %c0_i32, %c0_i32_0 : i32, i32
  }
  func.func @transform_9(%arg0: i32) -> (i32, i32) {
    %c0_i32 = arith.constant 0 : i32
    %c0_i32_0 = arith.constant 0 : i32
    %c0_i32_1 = arith.constant 0 : i32
    return %c0_i32, %c0_i32_0 : i32, i32
  }
  func.func @transform_10(%arg0: i32) -> (i32, i32) {
    %c0_i32 = arith.constant 0 : i32
    %c0_i32_0 = arith.constant 0 : i32
    %c0_i32_1 = arith.constant 0 : i32
    return %c0_i32, %c0_i32_0 : i32, i32
  }
  func.func @transform_11(%arg0: i32) -> (i32, i32) {
    %c0_i32 = arith.constant 0 : i32
    %c0_i32_0 = arith.constant 0 : i32
    %c0_i32_1 = arith.constant 0 : i32
    return %c0_i32, %c0_i32_0 : i32, i32
  }
  func.func @transform_12(%arg0: i32) -> (i32, i32) {
    %c0_i32 = arith.constant 0 : i32
    %c0_i32_0 = arith.constant 0 : i32
    %c0_i32_1 = arith.constant 0 : i32
    return %c0_i32, %c0_i32_0 : i32, i32
  }
  func.func @transform_13(%arg0: i32) -> (i32, i32, i32) {
    %c0_i32 = arith.constant 0 : i32
    %c0_i32_0 = arith.constant 0 : i32
    %c0_i32_1 = arith.constant 0 : i32
    return %arg0, %c0_i32, %c0_i32_0 : i32, i32, i32
  }
}

</mosaic_0001>

<bundles_post_ra>
// kernel: mae_vit_forward.7
= control target key start
LH: loop header
LB: loop body
LE: loop exit
PB: predicated region body
PF: predicated region fallthrough
CT: control target
= control target key end

     0   :  { %v162_v0 = vmov 0   ;;  %vm70_vm0 = vcmask 523264   ;;  %s324_s1 = inlined_call_operand.vmem [shape: f32[192,64], index: 1, kind: input, shape index: {}]   ;;  %s325_s0 = inlined_call_operand.vmem [shape: f32[32,192], index: 0, kind: input, shape index: {}]   ;;  %s326_s2 = inlined_call_operand.vmem [shape: f32[1,64], index: 2, kind: input, shape index: {}]   ;;  %s327_s3 = inlined_call_operand.vmem [shape: f32[32,64], index: 3, kind: output, shape index: {}]  }
   0x1   :  { %77 = vmatprep.subr.bf16.mxu0 %v162_v0  ;;  %137 = vmatprep.subr.bf16.mxu1 %v162_v0  ;;  %v27_v1 = vld [vmem:[%s324_s1] sm:$0xff]  ;;  %v28_v2 = vld [vmem:[%s324_s1 + $0x8] sm:$0xff]  ;;  %v29_v3 = vld [vmem:[%s324_s1 + $0x10] sm:$0xff] }
   0x2   :  { %v51_v4 = vpack.c.bf16 %v28_v2, %v27_v1  ;;  %v30_v5 = vld [vmem:[%s324_s1 + $0x18] sm:$0xff]  ;;  %v31_v7 = vld [vmem:[%s324_s1 + $0x20] sm:$0xff]  ;;  %v32_v8 = vld [vmem:[%s324_s1 + $0x28] sm:$0xff] }
   0x3   :  { %v52_v6 = vpack.c.bf16 %v30_v5, %v29_v3  ;;  %v53_v9 = vpack.c.bf16 %v32_v8, %v31_v7  ;;  %v33_v10 = vld [vmem:[%s324_s1 + $0x30] sm:$0xff]  ;;  %v34_v11 = vld [vmem:[%s324_s1 + $0x38] sm:$0xff]  ;;  %v16_v12 = vld [vmem:[%s325_s0 + $0x8] sm:$0xff] }
   0x4   :  { %78 = vmatpush1.bf16.msra.mxu0 %v51_v4  ;;  %149 = vmatpush1.bf16.msra.mxu1 %v51_v4  ;;  %v18_v13 = vld [vmem:[%s325_s0 + $0x18] sm:$0xff]  ;;  %v20_v14 = vld [vmem:[%s325_s0 + $0x28] sm:$0xff]  ;;  %v54_v18 = vpack.c.bf16 %v34_v11, %v33_v10  ;;  %v35_v19 = vld [vmem:[%s324_s1 + $0x40] sm:$0xff] }
   0x5   :  { %79 = vmatprep.subr.bf16.mxu0 %v162_v0  ;;  %138 = vmatprep.subr.bf16.mxu1 %v162_v0  ;;  %v24_v15 = vpack.c.bf16 %v18_v13, %v16_v12  ;;  %v22_v16 = vld [vmem:[%s325_s0 + $0x38] sm:$0xff]  ;;  %v36_v20 = vld [vmem:[%s324_s1 + $0x48] sm:$0xff]  ;;  %v37_v22 = vld [vmem:[%s324_s1 + $0x50] sm:$0xff] }
   0x6   :  { %v26_v17 = vpack.c.bf16 %v22_v16, %v20_v14  ;;  %v55_v21 = vpack.c.bf16 %v36_v20, %v35_v19  ;;  %v38_v23 = vld [vmem:[%s324_s1 + $0x58] sm:$0xff]  ;;  %v39_v25 = vld [vmem:[%s324_s1 + $0x60] sm:$0xff]  ;;  %v40_v26 = vld [vmem:[%s324_s1 + $0x68] sm:$0xff] }
   0x7   :  { %135 = vmatprep.mubr.msk.bf16.mxu0 %vm70_vm0, %v24_v15  ;;  %v56_v24 = vpack.c.bf16 %v38_v23, %v37_v22  ;;  %v57_v27 = vpack.c.bf16 %v40_v26, %v39_v25  ;;  %v41_v28 = vld [vmem:[%s324_s1 + $0x70] sm:$0xff]  ;;  %v42_v29 = vld [vmem:[%s324_s1 + $0x78] sm:$0xff]  ;;  %v43_v31 = vld [vmem:[%s324_s1 + $0x80] sm:$0xff] }
   0x8   :  { %80 = vmatpush1.bf16.msra.mxu0 %v52_v6  ;;  %150 = vmatpush1.bf16.msra.mxu1 %v52_v6  ;;  %v58_v30 = vpack.c.bf16 %v42_v29, %v41_v28  ;;  %v44_v32 = vld [vmem:[%s324_s1 + $0x88] sm:$0xff]  ;;  %v45_v34 = vld [vmem:[%s324_s1 + $0x90] sm:$0xff]  ;;  %v46_v35 = vld [vmem:[%s324_s1 + $0x98] sm:$0xff] }
   0x9   :  { %81 = vmatprep.subr.bf16.mxu0 %v162_v0  ;;  %139 = vmatprep.subr.bf16.mxu1 %v162_v0  ;;  %v59_v33 = vpack.c.bf16 %v44_v32, %v43_v31  ;;  %v60_v36 = vpack.c.bf16 %v46_v35, %v45_v34  ;;  %v47_v37 = vld [vmem:[%s324_s1 + $0xa0] sm:$0xff]  ;;  %v48_v38 = vld [vmem:[%s324_s1 + $0xa8] sm:$0xff]  ;;  %v49_v40 = vld [vmem:[%s324_s1 + $0xb0] sm:$0xff] }
   0xa   :  { %136 = vmatprep.mubr.msk.bf16.mxu1 %vm70_vm0, %v26_v17  ;;  %v61_v39 = vpack.c.bf16 %v48_v38, %v47_v37  ;;  %v50_v41 = vld [vmem:[%s324_s1 + $0xb8] sm:$0xff]  ;;  %v15_v42 = vld [vmem:[%s325_s0] sm:$0xff]  ;;  %v17_v44 = vld [vmem:[%s325_s0 + $0x10] sm:$0xff] }
   0xb   :  { %v62_v43 = vpack.c.bf16 %v50_v41, %v49_v40  ;;  %v19_v45 = vld [vmem:[%s325_s0 + $0x20] sm:$0xff]  ;;  %v21_v46 = vld [vmem:[%s325_s0 + $0x30] sm:$0xff]  ;;  %v23_v47 = vpack.c.bf16 %v17_v44, %v15_v42 }
   0xc   :  { %82 = vmatpush1.bf16.msra.mxu0 %v53_v9  ;;  %151 = vmatpush1.bf16.msra.mxu1 %v53_v9  ;;  %v25_v48 = vpack.c.bf16 %v21_v46, %v19_v45  ;;  %v134_v49 = vld [vmem:[%s326_s2] ss:$0 sm:$0xff] }
   0xd   :  { %83 = vmatprep.subr.bf16.mxu0 %v162_v0  ;;  %140 = vmatprep.subr.bf16.mxu1 %v162_v0 }
  0x10   :  { %84 = vmatpush1.bf16.msra.mxu0 %v54_v18  ;;  %152 = vmatpush1.bf16.msra.mxu1 %v54_v18 }
  0x11   :  { %85 = vmatprep.subr.bf16.mxu0 %v162_v0  ;;  %141 = vmatprep.subr.bf16.mxu1 %v162_v0 }
  0x14   :  { %86 = vmatpush1.bf16.msra.mxu0 %v55_v21  ;;  %153 = vmatpush1.bf16.msra.mxu1 %v55_v21 }
  0x15   :  { %87 = vmatprep.subr.bf16.mxu0 %v162_v0  ;;  %142 = vmatprep.subr.bf16.mxu1 %v162_v0 }
  0x18   :  { %88 = vmatpush1.bf16.msra.mxu0 %v56_v24  ;;  %154 = vmatpush1.bf16.msra.mxu1 %v56_v24 }
  0x19   :  { %89 = vmatprep.subr.bf16.mxu0 %v162_v0  ;;  %143 = vmatprep.subr.bf16.mxu1 %v162_v0 }
  0x1c   :  { %90 = vmatpush1.bf16.msra.mxu0 %v57_v27  ;;  %155 = vmatpush1.bf16.msra.mxu1 %v57_v27 }
  0x1d   :  { %91 = vmatprep.subr.bf16.mxu0 %v162_v0  ;;  %144 = vmatprep.subr.bf16.mxu1 %v162_v0 }
  0x20   :  { %92 = vmatpush1.bf16.msra.mxu0 %v58_v30  ;;  %156 = vmatpush1.bf16.msra.mxu1 %v58_v30 }
  0x21   :  { %93 = vmatprep.subr.bf16.mxu0 %v162_v0  ;;  %145 = vmatprep.subr.bf16.mxu1 %v162_v0 }
  0x24   :  { %94 = vmatpush1.bf16.msra.mxu0 %v59_v33  ;;  %157 = vmatpush1.bf16.msra.mxu1 %v59_v33 }
  0x25   :  { %95 = vmatprep.subr.bf16.mxu0 %v162_v0  ;;  %146 = vmatprep.subr.bf16.mxu1 %v162_v0 }
  0x28   :  { %96 = vmatpush1.bf16.msra.mxu0 %v60_v36  ;;  %158 = vmatpush1.bf16.msra.mxu1 %v60_v36 }
  0x29   :  { %97 = vmatprep.subr.bf16.mxu0 %v162_v0  ;;  %147 = vmatprep.subr.bf16.mxu1 %v162_v0 }
  0x2c   :  { %98 = vmatpush1.bf16.msra.mxu0 %v61_v39  ;;  %159 = vmatpush1.bf16.msra.mxu1 %v61_v39 }
  0x2d   :  { %99 = vmatprep.subr.bf16.mxu0 %v162_v0  ;;  %148 = vmatprep.subr.bf16.mxu1 %v162_v0 }
  0x30   :  { %100 = vmatpush1.bf16.msra.mxu0 %v62_v43  ;;  %160 = vmatpush1.bf16.msra.mxu1 %v62_v43 }
  0x33   :  { %110 = vmatmul.mubr.bf16.vlgmr.msra.gmra.mrb[0].mxu0 %v23_v47  ;;  %118 = vmatmul.mubr.bf16.vlgmr.msra.gmra.mrb[0].mxu1 %v25_v48 }
 0x106   :  { %v111_v50 = vpop.f32.mrb[0].mxu0  ;;  %v119_v51 = vpop.f32.mrb[0].mxu1 }
 0x107   :  { %v112_v52 = vadd.f32 %v134_v49, %v111_v50  ;;  %v120_v53 = vadd.f32 %v134_v49, %v119_v51  ;;  %v113_v54 = vpop.f32.mrb[1].mxu0  ;;  %v121_v55 = vpop.f32.mrb[1].mxu1 }
 0x108   :  { %v114_v56 = vpop.f32.mrb[2].mxu0  ;;  %v122_v57 = vpop.f32.mrb[2].mxu1 }
 0x109   :  { %126 = vst.msk [vmem:[%s327_s3] sm:$0xff] %vm70_vm0, %v112_v52  ;;  %128 = vst.msk [vmem:[%s327_s3 + $0x10] sm:$0xff] %vm70_vm0, %v120_v53  ;;  %v115_v58 = vadd.f32 %v134_v49, %v114_v56  ;;  %v123_v59 = vadd.f32 %v134_v49, %v122_v57  ;;  %v116_v60 = vpop.f32.mrb[3].mxu0  ;;  %v124_v61 = vpop.f32.mrb[3].mxu1 }
 0x10b   :  { %127 = vst.msk [vmem:[%s327_s3 + $0x8] sm:$0xff] %vm70_vm0, %v115_v58  ;;  %129 = vst.msk [vmem:[%s327_s3 + $0x18] sm:$0xff] %vm70_vm0, %v123_v59 }

// kernel: mae_vit_forward.11
= control target key start
LH: loop header
LB: loop body
LE: loop exit
PB: predicated region body
PF: predicated region fallthrough
CT: control target
= control target key end

     0   :  { %v111_v0 = vmov 0.0   ;;  %vm112_vm0 = vmmov 0   ;;  %vm37_vm1 = vcmask 523264   ;;  %vm82_vm2 = vcmask 261120   ;;  %s172_s1 = inlined_call_operand.vmem [shape: f32[64,32], index: 1, kind: input, shape index: {}]   ;;  %s173_s0 = inlined_call_operand.vmem [shape: f32[10,64], index: 0, kind: input, shape index: {}]   ;;  %s174_s2 = inlined_call_operand.vmem [shape: f32[1,32], index: 2, kind: input, shape index: {}]   ;;  %s175_s3 = inlined_call_operand.vmem [shape: f32[10,32], index: 3, kind: output, shape index: {}]  }
   0x1   :  { %97 = vmatprep.subr.bf16.mxu0 %v111_v0  ;;  %v18_v1 = vld [vmem:[%s172_s1] sm:$0xff]  ;;  %v19_v2 = vld [vmem:[%s172_s1 + $0x8] sm:$0xff]  ;;  %v20_v3 = vld [vmem:[%s172_s1 + $0x10] sm:$0xff]  ;;  %105 = vmatprep.mubr.msk.bf16.mxu0 %vm112_vm0, %v111_v0  ;;  %vm84_vm3 = vcmask 254976  }
   0x2   :  { %v26_v4 = vpack.c.bf16 %v19_v2, %v18_v1  ;;  %v21_v5 = vld [vmem:[%s172_s1 + $0x18] sm:$0xff]  ;;  %v22_v7 = vld [vmem:[%s172_s1 + $0x20] sm:$0xff]  ;;  %v23_v8 = vld [vmem:[%s172_s1 + $0x28] sm:$0xff] }
   0x3   :  { %v27_v6 = vpack.c.bf16 %v21_v5, %v20_v3  ;;  %v28_v9 = vpack.c.bf16 %v23_v8, %v22_v7  ;;  %v24_v10 = vld [vmem:[%s172_s1 + $0x30] sm:$0xff]  ;;  %v25_v11 = vld [vmem:[%s172_s1 + $0x38] sm:$0xff]  ;;  %v15_v13 = vld [vmem:[%s173_s0] sm:$0xff] }
   0x4   :  { %98 = vmatpush3.bf16.msra.mxu0 %v26_v4  ;;  %v29_v12 = vpack.c.bf16 %v25_v11, %v24_v10  ;;  %v16_v14 = vld [vmem:[%s173_s0 + $0x8] sm:$0x3]  ;;  %v90_v16 = vld [vmem:[%s174_s2] ss:$0 sm:$0xff] }
   0x5   :  { %99 = vmatprep.subr.bf16.mxu0 %v111_v0  ;;  %v17_v15 = vpack.c.bf16 %v16_v14, %v15_v13 }
   0x8   :  { %100 = vmatpush3.bf16.msra.mxu0 %v27_v6 }
   0x9   :  { %101 = vmatprep.subr.bf16.mxu0 %v111_v0 }
   0xc   :  { %102 = vmatpush3.bf16.msra.mxu0 %v28_v9 }
   0xd   :  { %103 = vmatprep.subr.bf16.mxu0 %v111_v0 }
  0x10   :  { %104 = vmatpush3.bf16.msra.mxu0 %v29_v12 }
  0x13   :  { %106 = vmatmul.mubr.msk.bf16.vlgmr.msra.gmra.mrb[0].mxu0 %vm37_vm1, %v17_v15 }
  0xe6   :  { %v75_v17 = vpop.f32.mrb[0].mxu0 }
  0xe7   :  { %v76_v18 = vadd.f32 %v90_v16, %v75_v17  ;;  %v107_v19 = vpop.f32.mrb[1].mxu0 }
  0xe8   :  { %v78_v20 = vpop.f32.mrb[2].mxu0 }
  0xe9   :  { %83 = vst.msk [vmem:[%s175_s3] sm:$0xff] %vm82_vm2, %v76_v18  ;;  %v79_v21 = vadd.f32 %v90_v16, %v78_v20  ;;  %v108_v22 = vpop.f32.mrb[3].mxu0 }
  0xeb   :  { %85 = vst.msk [vmem:[%s175_s3 + $0x8] sm:$0x3] %vm84_vm3, %v79_v21 }

// kernel: mae_vit_forward.10
= control target key start
LH: loop header
LB: loop body
LE: loop exit
PB: predicated region body
PF: predicated region fallthrough
CT: control target
= control target key end

     0   :  { %vm16_vm0 = vcmask 523264   ;;  %vm20_vm1 = vcmask 517120   ;;  %s119_s0 = inlined_call_operand.vmem [shape: f32[10,64], index: 0, kind: input, shape index: {}]   ;;  %s120_s1 = inlined_call_operand.vmem [shape: f32[1,64], index: 1, kind: input, shape index: {}]   ;;  %s121_s2 = inlined_call_operand.vmem [shape: f32[1,64], index: 2, kind: input, shape index: {}]   ;;  %s122_s3 = inlined_call_operand.vmem [shape: f32[10,64], index: 3, kind: output, shape index: {}]  }
   0x1   :  { %v14_v0 = vld [vmem:[%s119_s0] sm:$0xff]  ;;  %v15_v1 = vld [vmem:[%s119_s0 + $0x8] sm:$0x3] }
   0x2   :  { %v17_v2 = vsel %vm16_vm0, %v14_v0, 0.0  ;;  %v21_v3 = vsel %vm20_vm1, %v15_v1, 0.0  ;;  %v69_v21 = vld [vmem:[%s120_s1] ss:$0 sm:$0xff] }
   0x3   :  { %18 = vadd.xlane.f32.xlu0 %v17_v2  ;;  %v70_v23 = vld [vmem:[%s121_s2] ss:$0 sm:$0xff] }
   0x7   :  { %22 = vadd.xlane.f32.xlu0 %v21_v3 }
  0x90   :  { %v19_v4 = vpop.xlane.xlu0 %18 }
  0x91   :  { %v25_v5 = vmul.f32 0.015625, %v19_v4 }
  0x93   :  { %v27_v6 = vsub.f32 %v14_v0, %v25_v5 }
  0x94   :  { %v23_v7 = vpop.xlane.xlu0 %22 }
  0x95   :  { %v26_v8 = vmul.f32 0.015625, %v23_v7  ;;  %v29_v9 = vmul.f32 %v27_v6, %v27_v6 }
  0x97   :  { %v28_v10 = vsub.f32 %v15_v1, %v26_v8  ;;  %v31_v11 = vsel %vm16_vm0, %v29_v9, 0.0 }
  0x98   :  { %32 = vadd.xlane.f32.xlu1 %v31_v11 }
  0x99   :  { %v30_v12 = vmul.f32 %v28_v10, %v28_v10 }
  0x9b   :  { %v34_v13 = vsel %vm20_vm1, %v30_v12, 0.0 }
  0x9c   :  { %35 = vadd.xlane.f32.xlu1 %v34_v13 }
 0x125   :  { %v33_v14 = vpop.xlane.xlu1 %32 }
 0x126   :  { %v37_v15 = vmul.f32 0.015625, %v33_v14 }
 0x128   :  { %v39_v16 = vadd.f32 1e-05, %v37_v15 }
 0x129   :  { %v36_v17 = vpop.xlane.xlu1 %35 }
 0x12a   :  { %71 = vrsqrt.f32 %v39_v16  ;;  %v38_v18 = vmul.f32 0.015625, %v36_v17 }
 0x12c   :  { %v40_v19 = vadd.f32 1e-05, %v38_v18 }
 0x12e   :  { %73 = vrsqrt.f32 %v40_v19 }
 0x134   :  { %v72_v20 = vpop.eup %71 }
 0x135   :  { %v43_v22 = vmul.f32 %v72_v20, %v27_v6 }
 0x137   :  { %v52_v24 = vmul.f32 %v69_v21, %v43_v22 }
 0x138   :  { %v74_v25 = vpop.eup %73 }
 0x139   :  { %v61_v26 = vadd.f32 %v70_v23, %v52_v24  ;;  %v44_v27 = vmul.f32 %v74_v25, %v28_v10 }
 0x13b   :  { %63 = vst.msk [vmem:[%s122_s3] sm:$0xff] %vm16_vm0, %v61_v26  ;;  %v53_v28 = vmul.f32 %v69_v21, %v44_v27 }
 0x13d   :  { %v62_v29 = vadd.f32 %v70_v23, %v53_v28 }
 0x13f   :  { %64 = vst.msk [vmem:[%s122_s3 + $0x8] sm:$0x3] %vm20_vm1, %v62_v29 }

// kernel: mae_vit_forward.8
= control target key start
LH: loop header
LB: loop body
LE: loop exit
PB: predicated region body
PF: predicated region fallthrough
CT: control target
= control target key end

     0   :  { %s1760_s25 = smov 0   ;;  %s2146_s0 = inlined_call_operand.vmem [shape: f32[2,5,64], index: 0, kind: input, shape index: {}]   ;;  %s2147_s1 = inlined_call_operand.vmem [shape: f32[1,64], index: 1, kind: input, shape index: {}]   ;;  %s2148_s2 = inlined_call_operand.vmem [shape: f32[1,64], index: 2, kind: input, shape index: {}]   ;;  %s2149_s3 = inlined_call_operand.vmem [shape: f32[64,192], index: 3, kind: input, shape index: {}]   ;;  %s2150_s4 = inlined_call_operand.vmem [shape: f32[1,192], index: 4, kind: input, shape index: {}]   ;;  %s2151_s5 = inlined_call_operand.vmem [shape: f32[64,64], index: 5, kind: input, shape index: {}]   ;;  %s2152_s6 = inlined_call_operand.vmem [shape: f32[1,64], index: 6, kind: input, shape index: {}]   ;;  %s2153_s7 = inlined_call_operand.vmem [shape: f32[1,64], index: 7, kind: input, shape index: {}]   ;;  %s2154_s8 = inlined_call_operand.vmem [shape: f32[1,64], index: 8, kind: input, shape index: {}]   ;;  %s2155_s9 = inlined_call_operand.vmem [shape: f32[64,256], index: 9, kind: input, shape index: {}]   ;;  %s2156_s10 = inlined_call_operand.vmem [shape: f32[1,256], index: 10, kind: input, shape index: {}]   ;;  %s2157_s11 = inlined_call_operand.vmem [shape: f32[256,64], index: 11, kind: input, shape index: {}]   ;;  %s2158_s12 = inlined_call_operand.vmem [shape: f32[1,64], index: 12, kind: input, shape index: {}]   ;;  %s2159_s13 = inlined_call_operand.vmem [shape: f32[2,5,64], index: 13, kind: output, shape index: {}]  }
   0x1 LB: > { %s1481_s26 = sadd.s32 4294967295, %s1677_s25   ;;  %p1485_p0 = scmp.ge.s32.totalorder %s1677_s25, 1  ;;  %s1677_s25 = sphi %s1760_s25, %s23_s25  }
   0x2   : > { %p386_p1 = scmp.lt.s32.totalorder %s1677_s25, 3 }
   0x4   : > { %p387_p2 = pnand %p1485_p0, %p386_p1 }
   0x5   : > { %p428_p3 = scmp.lt.s32.totalorder (!%p387_p2), %s1481_s26, 1  ;;  %vm438_vm0 = vcmask (!%p387_p2), 520192   ;;  %v471_v7 = vld [vmem:[%s2149_s3 + $0x8] sm:$0xff] (!%p387_p2)  ;;  %v473_v8 = vld [vmem:[%s2149_s3 + $0x18] sm:$0xff] (!%p387_p2)  ;;  %v470_v9 = vld [vmem:[%s2149_s3] sm:$0xff] (!%p387_p2)  ;;  %v1679_v14 = vmov (!%p387_p2), 0   ;;  %v496_v43 = vlaneseq (!%p387_p2) }
   0x6   : > { %390 = sbr.rel (%p387_p2) target bundleno = 3711 (0xe7f), region = 72  ;;  %v487_v10 = vpack.c.bf16 (!%p387_p2), %v473_v8, %v471_v7  ;;  %v472_v11 = vld [vmem:[%s2149_s3 + $0x10] sm:$0xff] (!%p387_p2)  ;;  %v475_v12 = vld [vmem:[%s2149_s3 + $0x28] sm:$0xff] (!%p387_p2)  ;;  %v477_v13 = vld [vmem:[%s2149_s3 + $0x38] sm:$0xff] (!%p387_p2)  ;;  %542 = vmatprep.mubr.bf16.mxu0 (!%p387_p2), %v1679_v14  ;;  %vm506_vm1 = vcmask (!%p387_p2), 523264   ;;  %v1680_v42 = vmov (!%p387_p2), 0.0  }
   0x7   : > { %v486_v15 = vpack.c.bf16 (!%p387_p2), %v472_v11, %v470_v9  ;;  %v489_v16 = vpack.c.bf16 (!%p387_p2), %v477_v13, %v475_v12  ;;  %v474_v17 = vld [vmem:[%s2149_s3 + $0x20] sm:$0xff] (!%p387_p2)  ;;  %v476_v18 = vld [vmem:[%s2149_s3 + $0x30] sm:$0xff] (!%p387_p2)  ;;  %v479_v19 = vld [vmem:[%s2149_s3 + $0x48] sm:$0xff] (!%p387_p2)  ;;  %1562 = vmatprep.subr.bf16.mxu1 (!%p387_p2), %v1680_v42  ;;  %v1840_v44 = vshrl.u32 (!%p387_p2), %v496_v43, 7  ;;  %vm633_vm2 = vcmask (!%p387_p2), 1041408   ;;  %s1683_s24 = smov (!%p387_p2), 112  }
   0x8   : > { %510 = vmatprep.subr.bf16.mxu0 (!%p387_p2), %v487_v10  ;;  %v481_v20 = vld [vmem:[%s2149_s3 + $0x58] sm:$0xff] (!%p387_p2)  ;;  %v488_v21 = vpack.c.bf16 (!%p387_p2), %v476_v18, %v474_v17  ;;  %v478_v23 = vld [vmem:[%s2149_s3 + $0x40] sm:$0xff] (!%p387_p2)  ;;  %v480_v24 = vld [vmem:[%s2149_s3 + $0x50] sm:$0xff] (!%p387_p2)  ;;  %vm1681_vm3 = vmmov (!%p387_p2), 0   ;;  %vm634_vm4 = vcmask (!%p387_p2), 1042432   ;;  %v1682_v51 = vmov (!%p387_p2), 65535  }
   0x9   : > { %511 = vmatpush1.bf16.msra.mxu0 (!%p387_p2), %v486_v15  ;;  %v491_v22 = vpack.c.bf16 (!%p387_p2), %v481_v20, %v479_v19  ;;  %v483_v25 = vld [vmem:[%s2149_s3 + $0x68] sm:$0xff] (!%p387_p2)  ;;  %v485_v26 = vld [vmem:[%s2149_s3 + $0x78] sm:$0xff] (!%p387_p2)  ;;  %v490_v27 = vpack.c.bf16 (!%p387_p2), %v480_v24, %v478_v23  ;;  %v482_v29 = vld [vmem:[%s2149_s3 + $0x60] sm:$0xff] (!%p387_p2)  ;;  %v498_v45 = vsub.s32 (!%p387_p2), 0, %v1840_v44  ;;  %v502_v47 = vsub.s32 (!%p387_p2), 1, %v1840_v44  ;;  %1564 = vmatprep.mubr.msk.bf16.mxu1 (!%p387_p2), %vm1681_vm3, %v1680_v42  ;;  %s1684_s28 = smov (!%p387_p2), 64  }
   0xa   : > { %512 = vmatprep.subr.bf16.mxu0 (!%p387_p2), %v489_v16  ;;  %v493_v28 = vpack.c.bf16 (!%p387_p2), %v485_v26, %v483_v25  ;;  %v484_v30 = vld [vmem:[%s2149_s3 + $0x70] sm:$0xff] (!%p387_p2)  ;;  %v1488_v36 = vld [vmem:[%s2147_s1] ss:$0 sm:$0xff] (!%p387_p2)  ;;  %v635_v52 = vsel (!%p387_p2), %vm633_vm2, 4294967295, %v1682_v51  ;;  %s1685_s29 = smov (!%p387_p2), 48   ;;  %vm567_vm5 = vcmask (!%p387_p2), 130048  }
   0xb   : > { %v492_v31 = vpack.c.bf16 (!%p387_p2), %v484_v30, %v482_v29  ;;  %v1489_v38 = vld [vmem:[%s2148_s2] ss:$0 sm:$0xff] (!%p387_p2)  ;;  %v1857_v59 = vsel (!%p387_p2), %vm634_vm4, %v635_v52, 0  ;;  %vm615_vm6 = vcmask (!%p387_p2), 36864   ;;  %s1687_s14 = smov (!%p387_p2), 96   ;;  %vm629_vm7 = vcmask (!%p387_p2), 39936  }
   0xc   : > { %v494_v46 = vld [vmem:[%s2150_s4] sm:$0x3] (!%p387_p2)  ;;  %s1688_s23 = smov (!%p387_p2), 80  }
   0xd   : > { %s2161_s26 = smov (!%p428_p3, %s1481_s26), 1  ;;  %513 = vmatpush1.bf16.msra.mxu0 %v488_v21  ;;  %v499_v48 = vrot.slane %v494_v46, %v498_v45  ;;  %v503_v49 = vrot.slane %v494_v46, %v502_v47 }
   0xe   : > { %s1486_s27 = sshll.u32 %s2161_s26, 3  ;;  %514 = vmatprep.subr.bf16.mxu0 %v491_v22 }
   0xf   : > { %s431_s30 = scalar_lea.vmem %s2146_s0, %s1486_s27  ;;  %s435_s15 = scalar_lea.vmem %s2159_s13, %s1486_s27 }
  0x10   : > { %v1776_v0 = vld [vmem:[%s431_s30] sm:$0x1f]  ;;  %s1686_s30 = smov 32  }
  0x11   : > { %v439_v1 = vsel %vm438_vm0, %v1776_v0, 0.0  ;;  %515 = vmatpush1.bf16.msra.mxu0 %v490_v27 }
  0x12   : > { %440 = vadd.xlane.f32.xlu0 %v439_v1  ;;  %516 = vmatprep.subr.bf16.mxu0 %v493_v28 }
  0x15   : > { %517 = vmatpush1.bf16.msra.mxu0 %v492_v31 }
  0x16   : > { %1556 = vmatprep.subr.bf16.mxu0 %v1680_v42 }
  0x9f   : > { %v441_v2 = vpop.xlane.xlu0 %440 }
  0xa0   : > { %v443_v3 = vmul.f32 0.015625, %v441_v2 }
  0xa2   : > { %v444_v4 = vsub.f32 %v1776_v0, %v443_v3 }
  0xa4   : > { %v445_v5 = vmul.f32 %v444_v4, %v444_v4 }
  0xa6   : > { %v446_v6 = vsel %vm438_vm0, %v445_v5, 0.0 }
  0xa7   : > { %447 = vadd.xlane.f32.xlu0 %v446_v6 }
 0x134   : > { %v448_v32 = vpop.xlane.xlu0 %447 }
 0x135   : > { %v449_v33 = vmul.f32 0.015625, %v448_v32 }
 0x137   : > { %v450_v34 = vadd.f32 1e-05, %v449_v33 }
 0x139   : > { %1647 = vrsqrt.f32 %v450_v34 }
 0x143   : > { %v1648_v35 = vpop.eup %1647 }
 0x144   : > { %v452_v37 = vmul.f32 %v1648_v35, %v444_v4 }
 0x146   : > { %v460_v39 = vmul.f32 %v1488_v36, %v452_v37  ;;  %v551_v37 = vld [vmem:[%s2151_s5] sm:$0xff] }
 0x148   : > { %v468_v40 = vadd.f32 %v1489_v38, %v460_v39  ;;  %v552_v38 = vld [vmem:[%s2151_s5 + $0x8] sm:$0xff] }
 0x149   : > { %v559_v39 = vpack.c.bf16 %v552_v38, %v551_v37 }
 0x14a   : > { %v469_v41 = vpack.c.bf16 %v468_v40, %v468_v40  ;;  %v553_v40 = vld [vmem:[%s2151_s5 + $0x10] sm:$0xff] }
 0x14c   : > { %1490 = vmatmul.mubr.msk.bf16.vlgmr.msra.gmra.mrb[0].mxu0 %vm506_vm1, %v469_v41  ;;  %v554_v41 = vld [vmem:[%s2151_s5 + $0x18] sm:$0xff] }
 0x14d   : > { %1558 = vmatprep.mubr.msk.bf16.mxu0 %vm1681_vm3, %v1680_v42  ;;  %v560_v43 = vpack.c.bf16 %v554_v41, %v553_v40 }
 0x21f   : > { %v544_v50 = vpop.f32.mrb[0].mxu0 }
 0x220   : > { %v545_v53 = vadd.f32 %v544_v50, %v499_v48  ;;  %v546_v54 = vpop.f32.mrb[1].mxu0 }
 0x221   : > { %v547_v55 = vadd.f32 %v546_v54, %v503_v49  ;;  %v548_v56 = vpop.f32.mrb[2].mxu0 }
 0x222   : > { %v1855_v57 = vpack.c.bf16 %v545_v53, %v545_v53  ;;  %v549_v58 = vpop.f32.mrb[3].mxu0 }
 0x223   : > { %v1859_v60 = vpack.c.bf16 %v547_v55, %v547_v55 }
 0x224   : > { %681 = vrot.lane.b32.xlu0 %v1855_v57, %s1683_s24  ;;  %565 = vrot.lane.b32.xlu1 %v1855_v57, %s1684_s28 }
 0x225   : > { %v638_v61 = vand.u32 %v1857_v59, %v1859_v60 }
 0x227   : > { %1563 = vmatpush3.bf16.msra.mxu1 %v638_v61 }
 0x228   : > { %683 = vrot.lane.b32.xlu1 %v1855_v57, %s1685_s29  ;;  %1574 = vmatprep.subr.bf16.mxu1 %v1680_v42 }
 0x296   : > { %v566_v62 = vpop.permute.xlu1 %565  ;;  %v682_v3 = vpop.permute.xlu0 %681 }
 0x297   : > { %v572_v63 = vsel %vm567_vm5, %v566_v62, 0 }
 0x298   : > { %1557 = vmatpush3.bf16.xpose.msra.mxu0 %v572_v63 }
 0x299   : > { %1568 = vmatprep.subr.bf16.mxu0 %v1680_v42 }
 0x29a   : > { %v684_v1 = vpop.permute.xlu1 %683 }
 0x29b   : > { %v689_v2 = vsel %vm567_vm5, %v684_v1, 0 }
 0x29f   : > { %1559 = vmatmul.mubr.msk.bf16.vlgmr.msra.gmra.mrb[4].mxu0 %vm567_vm5, %v1855_v57 }
 0x2a0   : > { %1569 = vmatpush3.bf16.xpose.msra.mxu0 %v689_v2  ;;  %1570 = vmatprep.mubr.msk.bf16.mxu0 %vm1681_vm3, %v1680_v42 }
 0x2a1   : > { %1580 = vmatprep.subr.bf16.mxu0 %v1680_v42 }
 0x2a7   : > { %1571 = vmatmul.mubr.msk.bf16.vlgmr.msra.gmra.mrb[8].mxu0 %vm567_vm5, %v682_v3 }
 0x2a8   : > { %1582 = vmatprep.mubr.msk.bf16.mxu0 %vm1681_vm3, %v1680_v42  ;;  %1581 = vmatpush3.bf16.msra.mxu0 %v560_v43 }
 0x2a9   : > { %1592 = vmatprep.subr.bf16.mxu0 %v1680_v42 }
 0x372   : > { %v608_v4 = vpop.f32.mrb[4].mxu0 }
 0x373   : > { %v614_v5 = vmul.f32 0.25, %v608_v4  ;;  %v1560_v6 = vpop.f32.mrb[5].mxu0 }
 0x374   : > { %v611_v7 = vpop.f32.mrb[6].mxu0 }
 0x375   : > { %v1561_v8 = vpop.f32.mrb[7].mxu0  ;;  %v616_v9 = vsel %vm615_vm6, %v614_v5, -inf }
 0x376   : > { %617 = vmax.xlane.f32.xlu1 %v616_v9 }
 0x37a   : > { %v725_v10 = vpop.f32.mrb[8].mxu0 }
 0x37b   : > { %v731_v11 = vmul.f32 0.25, %v725_v10  ;;  %v1572_v12 = vpop.f32.mrb[9].mxu0 }
 0x37c   : > { %v728_v13 = vpop.f32.mrb[10].mxu0 }
 0x37d   : > { %v1573_v15 = vpop.f32.mrb[11].mxu0  ;;  %v732_v16 = vsel %vm615_vm6, %v731_v11, -inf }
 0x37e   : > { %733 = vmax.xlane.f32.xlu0 %v732_v16 }
 0x394   : > { %882 = vrot.lane.b32.xlu0 %v1855_v57, %s1686_s30 }
 0x403   : > { %v618_v17 = vpop.xlane.xlu1 %617 }
 0x404   : > { %v619_v18 = vsub.f32 %v614_v5, %v618_v17 }
 0x406   : > { %v620_v19 = vmul.f32 1.442695, %v619_v18 }
 0x408   : > { %1649 = vpow2.f32 %v620_v19 }
 0x40b   : > { %v734_v20 = vpop.xlane.xlu0 %733 }
 0x40c   : > { %v735_v21 = vsub.f32 %v731_v11, %v734_v20 }
 0x40e   : > { %v736_v22 = vmul.f32 1.442695, %v735_v21 }
 0x40f   : > { %v883_v52 = vpop.permute.xlu0 %882 }
 0x410   : > { %1651 = vpow2.f32 %v736_v22  ;;  %v888_v58 = vsel %vm567_vm5, %v883_v52, 0 }
 0x412   : > { %v1650_v23 = vpop.eup %1649 }
 0x413   : > { %v622_v24 = vsel %vm615_vm6, %v1650_v23, 0.0 }
 0x414   : > { %623 = vadd.xlane.f32.xlu1 %v622_v24 }
 0x41a   : > { %v1652_v25 = vpop.eup %1651 }
 0x41b   : > { %v738_v26 = vsel %vm615_vm6, %v1652_v25, 0.0 }
 0x41c   : > { %739 = vadd.xlane.f32.xlu1 %v738_v26 }
 0x42d   : > { %745 = vrot.lane.b32.xlu1 %v1859_v60, %s1683_s24  ;;  %s1689_s24 = smov 16  }
 0x431   : > { %880 = vrot.lane.b32.xlu1 %v1855_v57, %s1687_s14 }
 0x4a1   : > { %v624_v27 = vpop.xlane.xlu1 %623 }
 0x4a2   : > { %1653 = vrcp.f32 %v624_v27 }
 0x4a9   : > { %v740_v28 = vpop.xlane.xlu1 %739 }
 0x4aa   : > { %1655 = vrcp.f32 %v740_v28 }
 0x4ac   : > { %v1654_v29 = vpop.eup %1653 }
 0x4ad   : > { %v746_v30 = vpop.permute.xlu1 %745  ;;  %v626_v31 = vmul.f32 %v1654_v29, %v1650_v23 }
 0x4ae   : > { %v751_v32 = vand.u32 %v746_v30, %v1857_v59  ;;  %v556_v30 = vld [vmem:[%s2151_s5 + $0x28] sm:$0xff] }
 0x4af   : > { %v627_v33 = vpack.c.bf16 %v626_v31, %v626_v31 }
 0x4b1   : > { %1565 = vmatmul.mubr.msk.bf16.vlgmr.msra.gmra.mrb[0].mxu1 %vm629_vm7, %v627_v33  ;;  %v881_v62 = vpop.permute.xlu1 %880 }
 0x4b2   : > { %1575 = vmatpush3.bf16.msra.mxu1 %v751_v32  ;;  %1576 = vmatprep.mubr.msk.bf16.mxu1 %vm1681_vm3, %v1680_v42 }
 0x4b3   : > { %1586 = vmatprep.subr.bf16.mxu1 %v1680_v42 }
 0x4b4   : > { %v1656_v34 = vpop.eup %1655 }
 0x4b5   : > { %v742_v35 = vmul.f32 %v1656_v34, %v1652_v25 }
 0x4b7   : > { %v743_v36 = vpack.c.bf16 %v742_v35, %v742_v35 }
 0x4b9   : > { %1577 = vmatmul.mubr.msk.bf16.vlgmr.msra.gmra.mrb[4].mxu1 %vm629_vm7, %v743_v36 }
 0x4ba   : > { %1588 = vmatprep.mubr.msk.bf16.mxu1 %vm1681_vm3, %v1680_v42  ;;  %1587 = vmatpush3.bf16.msra.mxu1 %v559_v39 }
 0x4bb   : > { %1598 = vmatprep.subr.bf16.mxu1 %v1680_v42 }
 0x584   : > { %v674_v46 = vpop.f32.mrb[0].mxu1 }
 0x585   : > { %v680_v48 = vpack.c.bf16 %v674_v46, %v674_v46  ;;  %v1566_v49 = vpop.f32.mrb[1].mxu1 }
 0x586   : > { %v677_v50 = vpop.f32.mrb[2].mxu1 }
 0x587   : > { %v1567_v51 = vpop.f32.mrb[3].mxu1  ;;  %1589 = vmatmul.mubr.msk.bf16.vlgmr.msra.gmra.mrb[8].mxu1 %vm567_vm5, %v680_v48 }
 0x588   : > { %1600 = vmatprep.mubr.msk.bf16.mxu1 %vm1681_vm3, %v1680_v42 }
 0x58c   : > { %v787_v53 = vpop.f32.mrb[4].mxu1 }
 0x58d   : > { %v793_v54 = vpack.c.bf16 %v787_v53, %v787_v53  ;;  %v1578_v55 = vpop.f32.mrb[5].mxu1  ;;  %v557_v53 = vld [vmem:[%s2151_s5 + $0x30] sm:$0xff] }
 0x58e   : > { %v790_v56 = vpop.f32.mrb[6].mxu1 }
 0x58f   : > { %v1579_v61 = vpop.f32.mrb[7].mxu1  ;;  %1583 = vmatmul.mubr.msk.bf16.vlgmr.msra.gmra.mrb[12].mxu0 %vm567_vm5, %v793_v54 }
 0x590   : > { %1593 = vmatpush3.bf16.xpose.msra.mxu0 %v888_v58  ;;  %1594 = vmatprep.mubr.msk.bf16.mxu0 %vm1681_vm3, %v1680_v42 }
 0x591   : > { %1604 = vmatprep.subr.bf16.mxu0 %v1680_v42 }
 0x597   : > { %1595 = vmatmul.mubr.msk.bf16.vlgmr.msra.gmra.mrb[16].mxu0 %vm567_vm5, %v881_v62 }
 0x598   : > { %1606 = vmatprep.mubr.msk.bf16.mxu0 %vm1681_vm3, %v1680_v42 }
 0x65a   : > { %v874_v63 = vpop.f32.mrb[8].mxu1 }
 0x65b   : > { %v1590_v1 = vpop.f32.mrb[9].mxu1 }
 0x65c   : > { %v877_v2 = vpop.f32.mrb[10].mxu1 }
 0x65d   : > { %v1591_v3 = vpop.f32.mrb[11].mxu1 }
 0x662   : > { %v831_v4 = vpop.f32.mrb[12].mxu0 }
 0x663   : > { %v1921_v5 = vadd.f32 %v874_v63, %v831_v4  ;;  %v1584_v6 = vpop.f32.mrb[13].mxu0 }
 0x664   : > { %v834_v7 = vpop.f32.mrb[14].mxu0 }
 0x665   : > { %v1585_v8 = vpop.f32.mrb[15].mxu0 }
 0x66a   : > { %v924_v9 = vpop.f32.mrb[16].mxu0 }
 0x66b   : > { %v930_v10 = vmul.f32 0.25, %v924_v9  ;;  %v1596_v11 = vpop.f32.mrb[17].mxu0 }
 0x66c   : > { %v927_v12 = vpop.f32.mrb[18].mxu0  ;;  %v1503_v11 = vld [vmem:[%s2152_s6] ss:$0 sm:$0xff] }
 0x66d   : > { %v1597_v13 = vpop.f32.mrb[19].mxu0  ;;  %v931_v15 = vsel %vm615_vm6, %v930_v10, -inf }
 0x66e   : > { %932 = vmax.xlane.f32.xlu1 %v931_v15 }
 0x67f   : > { %943 = vrot.lane.b32.xlu1 %v1859_v60, %s1687_s14 }
 0x683   : > { %1036 = vrot.lane.b32.xlu1 %v1855_v57, %s1688_s23 }
 0x6fb   : > { %v933_v16 = vpop.xlane.xlu1 %932 }
 0x6fc   : > { %v934_v17 = vsub.f32 %v930_v10, %v933_v16 }
 0x6fe   : > { %v935_v18 = vmul.f32 1.442695, %v934_v17 }
 0x6ff   : > { %v944_v19 = vpop.permute.xlu1 %943 }
 0x700   : > { %1657 = vpow2.f32 %v935_v18  ;;  %v949_v20 = vand.u32 %v944_v19, %v1857_v59 }
 0x702   : > { %1599 = vmatpush3.bf16.msra.mxu1 %v949_v20 }
 0x703   : > { %1610 = vmatprep.subr.bf16.mxu1 %v1680_v42  ;;  %v1037_v29 = vpop.permute.xlu1 %1036 }
 0x70a   : > { %v1658_v21 = vpop.eup %1657 }
 0x70b   : > { %v937_v22 = vsel %vm615_vm6, %v1658_v21, 0.0 }
 0x70c   : > { %938 = vadd.xlane.f32.xlu0 %v937_v22  ;;  %v1232_v22 = vld [vmem:[%s2155_s9 + $0x8] sm:$0xff] }
 0x722   : > { %1038 = vrot.lane.b32.xlu0 %v1855_v57, %s1689_s24  ;;  %v555_v57 = vld [vmem:[%s2151_s5 + $0x20] sm:$0xff] }
 0x723   : > { %v561_v31 = vpack.c.bf16 %v556_v30, %v555_v57  ;;  %v1235_v57 = vld [vmem:[%s2155_s9 + $0x20] sm:$0xff]  ;;  %v1237_v30 = vld [vmem:[%s2155_s9 + $0x30] sm:$0xff] }
 0x725   : > { %1605 = vmatpush3.bf16.msra.mxu0 %v561_v31  ;;  %v1249_v31 = vpack.c.bf16 %v1237_v30, %v1235_v57  ;;  %v1359_v57 = vld [vmem:[%s2157_s11 + $0xe0] sm:$0xff]  ;;  %v1360_v30 = vld [vmem:[%s2157_s11 + $0xe8] sm:$0xff] }
 0x726   : > { %1616 = vmatprep.subr.bf16.mxu0 %v1680_v42 }
 0x799   : > { %v939_v23 = vpop.xlane.xlu0 %938 }
 0x79a   : > { %1659 = vrcp.f32 %v939_v23 }
 0x79d   : > { %v1039_v26 = vpop.permute.xlu0 %1038 }
 0x79e   : > { %v1044_v28 = vsel %vm567_vm5, %v1039_v26, 0 }
 0x7a4   : > { %v1660_v24 = vpop.eup %1659 }
 0x7a5   : > { %v941_v25 = vmul.f32 %v1660_v24, %v1658_v21  ;;  %v1231_v24 = vld [vmem:[%s2155_s9] sm:$0xff] }
 0x7a7   : > { %v942_v27 = vpack.c.bf16 %v941_v25, %v941_v25  ;;  %v1233_v25 = vld [vmem:[%s2155_s9 + $0x10] sm:$0xff] }
 0x7a8   : > { %v1247_v26 = vpack.c.bf16 %v1233_v25, %v1231_v24  ;;  %v1357_v24 = vld [vmem:[%s2157_s11 + $0xd0] sm:$0xff]  ;;  %v1358_v25 = vld [vmem:[%s2157_s11 + $0xd8] sm:$0xff] }
 0x7a9   : > { %1601 = vmatmul.mubr.msk.bf16.vlgmr.msra.gmra.mrb[12].mxu1 %vm629_vm7, %v942_v27  ;;  %v1236_v27 = vld [vmem:[%s2155_s9 + $0x28] sm:$0xff] }
 0x7aa   : > { %1611 = vmatpush3.bf16.xpose.msra.mxu1 %v1044_v28  ;;  %1612 = vmatprep.mubr.msk.bf16.mxu1 %vm1681_vm3, %v1680_v42  ;;  %v1238_v28 = vld [vmem:[%s2155_s9 + $0x38] sm:$0xff] }
 0x7ab   : > { %1622 = vmatprep.subr.bf16.mxu1 %v1680_v42 }
 0x7b1   : > { %1613 = vmatmul.mubr.msk.bf16.vlgmr.msra.gmra.mrb[16].mxu1 %vm567_vm5, %v1037_v29  ;;  %v1250_v29 = vpack.c.bf16 %v1238_v28, %v1236_v27  ;;  %v1376_v27 = vpack.c.bf16 %v1358_v25, %v1357_v24  ;;  %v1341_v28 = vld [vmem:[%s2157_s11 + $0x50] sm:$0xff] }
 0x7b2   : > { %1624 = vmatprep.mubr.msk.bf16.mxu1 %vm1681_vm3, %v1680_v42 }
 0x87c   : > { %v985_v32 = vpop.f32.mrb[12].mxu1 }
 0x87d   : > { %v991_v33 = vpack.c.bf16 %v985_v32, %v985_v32  ;;  %v1602_v34 = vpop.f32.mrb[13].mxu1  ;;  %v1240_v32 = vld [vmem:[%s2155_s9 + $0x48] sm:$0xff] }
 0x87e   : > { %v988_v35 = vpop.f32.mrb[14].mxu1 }
 0x87f   : > { %v1603_v36 = vpop.f32.mrb[15].mxu1  ;;  %1607 = vmatmul.mubr.msk.bf16.vlgmr.msra.gmra.mrb[20].mxu0 %vm567_vm5, %v991_v33  ;;  %v1242_v33 = vld [vmem:[%s2155_s9 + $0x58] sm:$0xff]  ;;  %v1239_v35 = vld [vmem:[%s2155_s9 + $0x40] sm:$0xff] }
 0x880   : > { %1618 = vmatprep.mubr.msk.bf16.mxu0 %vm1681_vm3, %v1680_v42  ;;  %v1252_v34 = vpack.c.bf16 %v1242_v33, %v1240_v32  ;;  %v1241_v36 = vld [vmem:[%s2155_s9 + $0x50] sm:$0xff]  ;;  %v1377_v32 = vpack.c.bf16 %v1360_v30, %v1359_v57  ;;  %v1343_v33 = vld [vmem:[%s2157_s11 + $0x60] sm:$0xff] }
 0x884   : > { %v1080_v37 = vpop.f32.mrb[16].mxu1 }
 0x885   : > { %v1086_v38 = vmul.f32 0.25, %v1080_v37  ;;  %v1614_v39 = vpop.f32.mrb[17].mxu1  ;;  %v1251_v37 = vpack.c.bf16 %v1241_v36, %v1239_v35  ;;  %v1361_v35 = vld [vmem:[%s2157_s11 + $0xf0] sm:$0xff]  ;;  %v1362_v36 = vld [vmem:[%s2157_s11 + $0xf8] sm:$0xff] }
 0x886   : > { %v1083_v40 = vpop.f32.mrb[18].mxu1  ;;  %v1246_v39 = vld [vmem:[%s2155_s9 + $0x78] sm:$0xff] }
 0x887   : > { %v1615_v41 = vpop.f32.mrb[19].mxu1  ;;  %v1087_v43 = vsel %vm615_vm6, %v1086_v38, -inf  ;;  %v1243_v40 = vld [vmem:[%s2155_s9 + $0x60] sm:$0xff] }
 0x888   : > { %1088 = vmax.xlane.f32.xlu1 %v1087_v43  ;;  %v1245_v43 = vld [vmem:[%s2155_s9 + $0x70] sm:$0xff] }
 0x899   : > { %1099 = vrot.lane.b32.xlu1 %v1859_v60, %s1688_s23  ;;  %v558_v60 = vld [vmem:[%s2151_s5 + $0x38] sm:$0xff] }
 0x89a   : > { %v562_v54 = vpack.c.bf16 %v558_v60, %v557_v53  ;;  %v1505_v53 = vld [vmem:[%s2154_s8] ss:$0 sm:$0xff] }
 0x89c   : > { %1623 = vmatpush3.bf16.msra.mxu1 %v562_v54 }
 0x915   : > { %v1089_v46 = vpop.xlane.xlu1 %1088 }
 0x916   : > { %v1090_v48 = vsub.f32 %v1086_v38, %v1089_v46  ;;  %v1244_v38 = vld [vmem:[%s2155_s9 + $0x68] sm:$0xff]  ;;  %v1253_v46 = vpack.c.bf16 %v1245_v43, %v1243_v40  ;;  %v1346_v40 = vld [vmem:[%s2157_s11 + $0x78] sm:$0xff]  ;;  %v1255_v43 = vld [vmem:[%s2156_s10] sm:$0x3] }
 0x917   : > { %v1254_v41 = vpack.c.bf16 %v1246_v39, %v1244_v38  ;;  %v1378_v38 = vpack.c.bf16 %v1362_v36, %v1361_v35  ;;  %v1345_v39 = vld [vmem:[%s2157_s11 + $0x70] sm:$0xff] }
 0x918   : > { %v1091_v49 = vmul.f32 1.442695, %v1090_v48 }
 0x919   : > { %v1100_v50 = vpop.permute.xlu1 %1099 }
 0x91a   : > { %1661 = vpow2.f32 %v1091_v49  ;;  %v1105_v51 = vand.u32 %v1100_v50, %v1857_v59 }
 0x91c   : > { %1617 = vmatpush3.bf16.msra.mxu0 %v1105_v51 }
 0x924   : > { %v1662_v42 = vpop.eup %1661 }
 0x925   : > { %v1093_v52 = vsel %vm615_vm6, %v1662_v42, 0.0 }
 0x926   : > { %1094 = vadd.xlane.f32.xlu0 %v1093_v52 }
 0x952   : > { %v1029_v55 = vpop.f32.mrb[20].mxu0 }
 0x953   : > { %v1035_v56 = vadd.f32 %v1029_v55, %v1921_v5  ;;  %v1608_v58 = vpop.f32.mrb[21].mxu0 }
 0x954   : > { %v1032_v59 = vpop.f32.mrb[22].mxu0  ;;  %v1348_v58 = vld [vmem:[%s2157_s11 + $0x88] sm:$0xff] }
 0x955   : > { %v1609_v61 = vpop.f32.mrb[23].mxu0 }
 0x956   : > { %v1331_v61 = vld [vmem:[%s2157_s11] sm:$0xff] }
 0x9b3   : > { %v1095_v62 = vpop.xlane.xlu0 %1094 }
 0x9b4   : > { %1663 = vrcp.f32 %v1095_v62  ;;  %v1332_v62 = vld [vmem:[%s2157_s11 + $0x8] sm:$0xff] }
 0x9be   : > { %v1664_v63 = vpop.eup %1663 }
 0x9bf   : > { %v1097_v1 = vmul.f32 %v1664_v63, %v1662_v42  ;;  %v1504_v42 = vld [vmem:[%s2153_s7] ss:$0 sm:$0xff]  ;;  %v1363_v63 = vpack.c.bf16 %v1332_v62, %v1331_v61 }
 0x9c1   : > { %v1098_v2 = vpack.c.bf16 %v1097_v1, %v1097_v1  ;;  %v1349_v1 = vld [vmem:[%s2157_s11 + $0x90] sm:$0xff] }
 0x9c3   : > { %1619 = vmatmul.mubr.msk.bf16.vlgmr.msra.gmra.mrb[24].mxu0 %vm629_vm7, %v1098_v2  ;;  %v1350_v2 = vld [vmem:[%s2157_s11 + $0x98] sm:$0xff] }
 0x9c4   : > { %1302 = vmatprep.mubr.bf16.mxu0 %v1679_v14 }
 0xa96   : > { %v1141_v3 = vpop.f32.mrb[24].mxu0 }
 0xa97   : > { %v1147_v4 = vpack.c.bf16 %v1141_v3, %v1141_v3  ;;  %v1620_v6 = vpop.f32.mrb[25].mxu0  ;;  %v1372_v3 = vpack.c.bf16 %v1350_v2, %v1349_v1 }
 0xa98   : > { %v1144_v7 = vpop.f32.mrb[26].mxu0  ;;  %v1334_v6 = vld [vmem:[%s2157_s11 + $0x18] sm:$0xff] }
 0xa99   : > { %v1621_v8 = vpop.f32.mrb[27].mxu0  ;;  %1625 = vmatmul.mubr.msk.bf16.vlgmr.msra.gmra.mrb[20].mxu1 %vm567_vm5, %v1147_v4  ;;  %v1333_v4 = vld [vmem:[%s2157_s11 + $0x10] sm:$0xff] }
 0xa9a   : > { %v1364_v7 = vpack.c.bf16 %v1334_v6, %v1333_v4  ;;  %v1351_v8 = vld [vmem:[%s2157_s11 + $0xa0] sm:$0xff] }
 0xb6c   : > { %v1185_v5 = vpop.f32.mrb[20].mxu1 }
 0xb6d   : > { %v1191_v9 = vadd.f32 %v1185_v5, %v1035_v56  ;;  %v1626_v10 = vpop.f32.mrb[21].mxu1  ;;  %v1347_v56 = vld [vmem:[%s2157_s11 + $0x80] sm:$0xff]  ;;  %v1352_v5 = vld [vmem:[%s2157_s11 + $0xa8] sm:$0xff] }
 0xb6e   : > { %v1188_v12 = vpop.f32.mrb[22].mxu1  ;;  %v1371_v59 = vpack.c.bf16 %v1348_v58, %v1347_v56  ;;  %v1335_v10 = vld [vmem:[%s2157_s11 + $0x20] sm:$0xff] }
 0xb6f   : > { %v1192_v13 = vadd.f32 %v1191_v9, %v1776_v0  ;;  %v1627_v15 = vpop.f32.mrb[23].mxu1  ;;  %v1234_v0 = vld [vmem:[%s2155_s9 + $0x18] sm:$0xff]  ;;  %v1373_v9 = vpack.c.bf16 %v1352_v5, %v1351_v8 }
 0xb70   : > { %v1248_v23 = vpack.c.bf16 %v1234_v0, %v1232_v22  ;;  %1534 = vmatprep.subr.bf16.mxu1 %v1371_v59  ;;  %v1354_v15 = vld [vmem:[%s2157_s11 + $0xb8] sm:$0xff]  ;;  %v1339_v22 = vld [vmem:[%s2157_s11 + $0x40] sm:$0xff] }
 0xb71   : > { %v1969_v16 = vadd.f32 %v1503_v11, %v1192_v13  ;;  %1535 = vmatpush3.bf16.msra.mxu1 %v1363_v63  ;;  %v1336_v11 = vld [vmem:[%s2157_s11 + $0x28] sm:$0xff]  ;;  %v1353_v13 = vld [vmem:[%s2157_s11 + $0xb0] sm:$0xff] }
 0xb72   : > { %1270 = vmatprep.subr.bf16.mxu0 %v1248_v23  ;;  %1536 = vmatprep.subr.bf16.mxu1 %v1372_v3  ;;  %v1365_v12 = vpack.c.bf16 %v1336_v11, %v1335_v10  ;;  %v1340_v23 = vld [vmem:[%s2157_s11 + $0x48] sm:$0xff]  ;;  %v1507_v10 = vld [vmem:[%s2158_s12] ss:$0 sm:$0xff] }
 0xb73   : > { %v1201_v14 = vsel %vm438_vm0, %v1969_v16, 0.0  ;;  %1271 = vmatpush1.bf16.msra.mxu0 %v1247_v26  ;;  %v1367_v26 = vpack.c.bf16 %v1340_v23, %v1339_v22 }
 0xb74   : > { %1202 = vadd.xlane.f32.xlu0 %v1201_v14  ;;  %1272 = vmatprep.subr.bf16.mxu0 %v1250_v29  ;;  %v1374_v14 = vpack.c.bf16 %v1354_v15, %v1353_v13  ;;  %v1342_v29 = vld [vmem:[%s2157_s11 + $0x58] sm:$0xff] }
 0xb75   : > { %1537 = vmatpush3.bf16.msra.mxu1 %v1364_v7 }
 0xb76   : > { %1538 = vmatprep.subr.bf16.mxu1 %v1373_v9 }
 0xb77   : > { %1273 = vmatpush1.bf16.msra.mxu0 %v1249_v31  ;;  %v1368_v31 = vpack.c.bf16 %v1342_v29, %v1341_v28 }
 0xb78   : > { %1274 = vmatprep.subr.bf16.mxu0 %v1252_v34  ;;  %v1344_v34 = vld [vmem:[%s2157_s11 + $0x68] sm:$0xff] }
 0xb79   : > { %1539 = vmatpush3.bf16.msra.mxu1 %v1365_v12 }
 0xb7a   : > { %1540 = vmatprep.subr.bf16.mxu1 %v1374_v14 }
 0xb7b   : > { %1275 = vmatpush1.bf16.msra.mxu0 %v1251_v37  ;;  %v1369_v37 = vpack.c.bf16 %v1344_v34, %v1343_v33 }
 0xb7c   : > { %1276 = vmatprep.subr.bf16.mxu0 %v1254_v41  ;;  %v1370_v41 = vpack.c.bf16 %v1346_v40, %v1345_v39 }
 0xb7f   : > { %1277 = vmatpush1.bf16.msra.mxu0 %v1253_v46  ;;  %v1260_v46 = vrot.slane %v1255_v43, %v498_v45 }
 0xc01   : > { %v1203_v17 = vpop.xlane.xlu0 %1202 }
 0xc02   : > { %v1204_v18 = vmul.f32 0.015625, %v1203_v17  ;;  %v1337_v17 = vld [vmem:[%s2157_s11 + $0x30] sm:$0xff] }
 0xc04   : > { %v1205_v19 = vsub.f32 %v1969_v16, %v1204_v18  ;;  %v1338_v18 = vld [vmem:[%s2157_s11 + $0x38] sm:$0xff] }
 0xc06   : > { %v1206_v20 = vmul.f32 %v1205_v19, %v1205_v19 }
 0xc08   : > { %v1207_v21 = vsel %vm438_vm0, %v1206_v20, 0.0  ;;  %v1355_v20 = vld [vmem:[%s2157_s11 + $0xc0] sm:$0xff] }
 0xc09   : > { %1208 = vadd.xlane.f32.xlu0 %v1207_v21  ;;  %v1356_v21 = vld [vmem:[%s2157_s11 + $0xc8] sm:$0xff] }
 0xc0a   : > { %v1375_v0 = vpack.c.bf16 %v1356_v21, %v1355_v20 }
 0xc96   : > { %v1209_v48 = vpop.xlane.xlu0 %1208 }
 0xc97   : > { %v1210_v49 = vmul.f32 0.015625, %v1209_v48  ;;  %v1264_v48 = vrot.slane %v1255_v43, %v502_v47 }
 0xc99   : > { %v1211_v50 = vadd.f32 1e-05, %v1210_v49 }
 0xc9b   : > { %1665 = vrsqrt.f32 %v1211_v50 }
 0xca5   : > { %v1666_v51 = vpop.eup %1665 }
 0xca6   : > { %v1213_v52 = vmul.f32 %v1666_v51, %v1205_v19  ;;  %v1366_v19 = vpack.c.bf16 %v1338_v18, %v1337_v17 }
 0xca8   : > { %v1221_v60 = vmul.f32 %v1504_v42, %v1213_v52  ;;  %1541 = vmatpush3.bf16.msra.mxu1 %v1366_v19 }
 0xca9   : > { %1542 = vmatprep.subr.bf16.mxu1 %v1375_v0 }
 0xcaa   : > { %v1229_v54 = vadd.f32 %v1505_v53, %v1221_v60 }
 0xcac   : > { %v1230_v55 = vpack.c.bf16 %v1229_v54, %v1229_v54  ;;  %1543 = vmatpush3.bf16.msra.mxu1 %v1367_v26 }
 0xcad   : > { %1544 = vmatprep.subr.bf16.mxu1 %v1376_v27 }
 0xcae   : > { %1506 = vmatmul.mubr.msk.bf16.vlgmr.msra.gmra.mrb[28].mxu0 %vm506_vm1, %v1230_v55 }
 0xcb0   : > { %1545 = vmatpush3.bf16.msra.mxu1 %v1368_v31 }
 0xcb1   : > { %1546 = vmatprep.subr.bf16.mxu1 %v1377_v32 }
 0xcb4   : > { %1547 = vmatpush3.bf16.msra.mxu1 %v1369_v37 }
 0xcb5   : > { %1548 = vmatprep.subr.bf16.mxu1 %v1378_v38 }
 0xcb8   : > { %1549 = vmatpush3.bf16.msra.mxu1 %v1370_v41 }
 0xd81   : > { %v1304_v49 = vpop.f32.mrb[28].mxu0 }
 0xd82   : > { %v1305_v50 = vadd.f32 %v1304_v49, %v1260_v46  ;;  %v1306_v51 = vpop.f32.mrb[29].mxu0 }
 0xd83   : > { %v1307_v42 = vadd.f32 %v1306_v51, %v1264_v48  ;;  %v1308_v52 = vpop.f32.mrb[30].mxu0 }
 0xd84   : > { %v1311_v53 = vmul.f32 %v1305_v50, %v1305_v50  ;;  %v1309_v60 = vpop.f32.mrb[31].mxu0 }
 0xd85   : > { %v1312_v54 = vmul.f32 %v1307_v42, %v1307_v42 }
 0xd86   : > { %v1313_v55 = vmul.f32 %v1311_v53, %v1305_v50 }
 0xd87   : > { %v1314_v56 = vmul.f32 %v1312_v54, %v1307_v42 }
 0xd88   : > { %v1315_v58 = vmul.f32 0.044715, %v1313_v55 }
 0xd89   : > { %v1316_v59 = vmul.f32 0.044715, %v1314_v56 }
 0xd8a   : > { %v1317_v61 = vadd.f32 %v1315_v58, %v1305_v50 }
 0xd8b   : > { %v1318_v62 = vadd.f32 %v1316_v59, %v1307_v42 }
 0xd8c   : > { %v1319_v63 = vmul.f32 0.7978846, %v1317_v61 }
 0xd8d   : > { %v1320_v1 = vmul.f32 0.7978846, %v1318_v62 }
 0xd8e   : > { %1667 = vtanh.f32 %v1319_v63 }
 0xd8f   : > { %1669 = vtanh.f32 %v1320_v1 }
 0xd98   : > { %v1668_v44 = vpop.eup %1667 }
 0xd99   : > { %v1670_v45 = vpop.eup %1669  ;;  %v1323_v47 = vadd.f32 1.0, %v1668_v44 }
 0xd9a   : > { %v1324_v2 = vadd.f32 1.0, %v1670_v45 }
 0xd9b   : > { %v1325_v3 = vmul.f32 0.5, %v1323_v47 }
 0xd9c   : > { %v1326_v4 = vmul.f32 0.5, %v1324_v2 }
 0xd9d   : > { %v1327_v6 = vmul.f32 %v1325_v3, %v1305_v50 }
 0xd9e   : > { %v1328_v7 = vmul.f32 %v1326_v4, %v1307_v42 }
 0xd9f   : > { %v1329_v5 = vpack.c.bf16 %v1327_v6, %v1327_v6 }
 0xda0   : > { %v1330_v8 = vpack.c.bf16 %v1328_v7, %v1328_v7 }
 0xda2   : > { %1418 = vmatprep.mubr.bf16.mxu1 %v1330_v8 }
 0xda3   : > { %1419 = vmatmul.mubr.bf16.vlgmr.msra.gmra.mrb[24].mxu1 %v1329_v5 }
 0xe76   : > { %v1550_v9 = vpop.f32.mrb[24].mxu1 }
 0xe77   : > { %v1551_v11 = vpop.f32.mrb[25].mxu1 }
 0xe78   : > { %v1552_v12 = vadd.f32 %v1551_v11, %v1550_v9  ;;  %v1553_v13 = vpop.f32.mrb[26].mxu1 }
 0xe79   : > { %v1554_v15 = vpop.f32.mrb[27].mxu1 }
 0xe7a   : > { %v1421_v14 = vadd.f32 %v1552_v12, %v1507_v10 }
 0xe7c   : > { %v1426_v17 = vadd.f32 %v1421_v14, %v1969_v16 }
 0xe7e   : > { %1427 = vst.msk [vmem:[%s435_s15] sm:$0x1f] %vm438_vm0, %v1426_v17 }
 0xe7f PF: > { %s23_s25 = sadd.s32 1, %s1677_s25  }
 0xe80   : > { %p20_p4 = scmp.ge.s32.totalorder %s23_s25, 4  }
 0xe82   :  { %22 = sbr.rel (!%p20_p4) target bundleno = 1 (0x1), region = 102 }

// kernel: mae_vit_forward.13
= control target key start
LH: loop header
LB: loop body
LE: loop exit
PB: predicated region body
PF: predicated region fallthrough
CT: control target
= control target key end

     0   :  { %vm34_vm0 = vcmask 261120   ;;  %vm90_vm1 = vcmask 523264   ;;  %s173_s1 = inlined_call_operand.vmem [shape: f32[32,64], index: 1, kind: input, shape index: {}]   ;;  %s174_s0 = inlined_call_operand.vmem [shape: f32[32,32], index: 0, kind: input, shape index: {}]   ;;  %s175_s2 = inlined_call_operand.vmem [shape: f32[1,64], index: 2, kind: input, shape index: {}]   ;;  %s176_s3 = inlined_call_operand.vmem [shape: f32[32,64], index: 3, kind: output, shape index: {}]  }
   0x1   :  { %v21_v0 = vld [vmem:[%s173_s1] sm:$0xff]  ;;  %v22_v1 = vld [vmem:[%s173_s1 + $0x8] sm:$0xff]  ;;  %v23_v2 = vld [vmem:[%s173_s1 + $0x10] sm:$0xff] }
   0x2   :  { %v25_v3 = vpack.c.bf16 %v22_v1, %v21_v0  ;;  %v24_v4 = vld [vmem:[%s173_s1 + $0x18] sm:$0xff]  ;;  %v15_v5 = vld [vmem:[%s174_s0] sm:$0xff]  ;;  %v16_v6 = vld [vmem:[%s174_s0 + $0x8] sm:$0xff] }
   0x3   :  { %v26_v7 = vpack.c.bf16 %v24_v4, %v23_v2  ;;  %v19_v8 = vpack.c.bf16 %v16_v6, %v15_v5  ;;  %v17_v9 = vld [vmem:[%s174_s0 + $0x10] sm:$0xff]  ;;  %v18_v10 = vld [vmem:[%s174_s0 + $0x18] sm:$0xff]  ;;  %v99_v12 = vld [vmem:[%s175_s2] ss:$0 sm:$0xff] }
   0x4   :  { %106 = vmatprep.subr.bf16.mxu0 %v25_v3  ;;  %v20_v11 = vpack.c.bf16 %v18_v10, %v17_v9 }
   0x5   :  { %107 = vmatpush3.bf16.msra.mxu0 %v25_v3  ;;  %110 = vmatprep.mubr.msk.bf16.mxu0 %vm34_vm0, %v19_v8 }
   0x6   :  { %108 = vmatprep.subr.bf16.mxu0 %v26_v7 }
   0x9   :  { %109 = vmatpush3.bf16.msra.mxu0 %v26_v7 }
   0xc   :  { %111 = vmatmul.mubr.msk.bf16.vlgmr.msra.gmra.mrb[0].mxu0 %vm34_vm0, %v20_v11 }
  0xdf   :  { %v112_v13 = vpop.f32.mrb[0].mxu0 }
  0xe0   :  { %v84_v14 = vadd.f32 %v112_v13, %v99_v12  ;;  %v75_v15 = vpop.f32.mrb[1].mxu0 }
  0xe1   :  { %v76_v16 = vadd.f32 %v99_v12, %v75_v15  ;;  %v113_v17 = vpop.f32.mrb[2].mxu0 }
  0xe2   :  { %93 = vst.msk [vmem:[%s176_s3 + $0x10] sm:$0xff] %vm90_vm1, %v84_v14  ;;  %v87_v18 = vadd.f32 %v113_v17, %v99_v12  ;;  %v78_v19 = vpop.f32.mrb[3].mxu0 }
  0xe3   :  { %91 = vst.msk [vmem:[%s176_s3] sm:$0xff] %vm90_vm1, %v76_v16  ;;  %v79_v20 = vadd.f32 %v99_v12, %v78_v19 }
  0xe4   :  { %94 = vst.msk [vmem:[%s176_s3 + $0x18] sm:$0xff] %vm90_vm1, %v87_v18 }
  0xe5   :  { %92 = vst.msk [vmem:[%s176_s3 + $0x8] sm:$0xff] %vm90_vm1, %v79_v20 }

// kernel: mae_vit_forward.12
= control target key start
LH: loop header
LB: loop body
LE: loop exit
PB: predicated region body
PF: predicated region fallthrough
CT: control target
= control target key end

     0   :  { %s1644_s25 = smov 0   ;;  %s1881_s0 = inlined_call_operand.vmem [shape: f32[2,17,32], index: 0, kind: input, shape index: {}]   ;;  %s1882_s1 = inlined_call_operand.vmem [shape: f32[1,32], index: 1, kind: input, shape index: {}]   ;;  %s1883_s2 = inlined_call_operand.vmem [shape: f32[1,32], index: 2, kind: input, shape index: {}]   ;;  %s1884_s3 = inlined_call_operand.vmem [shape: f32[32,96], index: 3, kind: input, shape index: {}]   ;;  %s1885_s4 = inlined_call_operand.vmem [shape: f32[1,96], index: 4, kind: input, shape index: {}]   ;;  %s1886_s5 = inlined_call_operand.vmem [shape: f32[32,32], index: 5, kind: input, shape index: {}]   ;;  %s1887_s6 = inlined_call_operand.vmem [shape: f32[1,32], index: 6, kind: input, shape index: {}]   ;;  %s1888_s7 = inlined_call_operand.vmem [shape: f32[1,32], index: 7, kind: input, shape index: {}]   ;;  %s1889_s8 = inlined_call_operand.vmem [shape: f32[1,32], index: 8, kind: input, shape index: {}]   ;;  %s1890_s9 = inlined_call_operand.vmem [shape: f32[32,128], index: 9, kind: input, shape index: {}]   ;;  %s1891_s10 = inlined_call_operand.vmem [shape: f32[1,128], index: 10, kind: input, shape index: {}]   ;;  %s1892_s11 = inlined_call_operand.vmem [shape: f32[128,32], index: 11, kind: input, shape index: {}]   ;;  %s1893_s12 = inlined_call_operand.vmem [shape: f32[1,32], index: 12, kind: input, shape index: {}]   ;;  %s1894_s13 = inlined_call_operand.vmem [shape: f32[2,17,32], index: 13, kind: output, shape index: {}]  }
   0x1 LB: > { %s1346_s26 = sadd.s32 4294967295, %s1566_s25   ;;  %p1350_p0 = scmp.ge.s32.totalorder %s1566_s25, 1  ;;  %s1566_s25 = sphi %s1644_s25, %s23_s25  }
   0x2   : > { %p387_p1 = scmp.lt.s32.totalorder %s1566_s25, 3 }
   0x4   : > { %p388_p2 = pnand %p1350_p0, %p387_p1 }
   0x5   : > { %p431_p3 = scmp.lt.s32.totalorder (!%p388_p2), %s1346_s26, 1  ;;  %vm445_vm0 = vcmask (!%p388_p2), 261120   ;;  %vm452_vm1 = vcmask (!%p388_p2), 253952   ;;  %v509_v21 = vld [vmem:[%s1884_s3] sm:$0xff] (!%p388_p2)  ;;  %v510_v22 = vld [vmem:[%s1884_s3 + $0x8] sm:$0xff] (!%p388_p2)  ;;  %v511_v23 = vld [vmem:[%s1884_s3 + $0x10] sm:$0xff] (!%p388_p2) }
   0x6   : > { %391 = sbr.rel (%p388_p2) target bundleno = 2517 (0x9d5), region = 72  ;;  %v513_v24 = vpack.c.bf16 (!%p388_p2), %v510_v22, %v509_v21  ;;  %v512_v25 = vld [vmem:[%s1884_s3 + $0x18] sm:$0xff] (!%p388_p2)  ;;  %v1353_v38 = vld [vmem:[%s1882_s1] ss:$0 sm:$0xff] (!%p388_p2)  ;;  %s1568_s14 = smov (!%p388_p2), 96   ;;  %vm590_vm2 = vcmask (!%p388_p2), 130048  }
   0x7   : > { %v514_v26 = vpack.c.bf16 (!%p388_p2), %v512_v25, %v511_v23  ;;  %v1354_v44 = vld [vmem:[%s1883_s2] ss:$0 sm:$0xff] (!%p388_p2)  ;;  %s1569_s15 = smov (!%p388_p2), 80   ;;  %s1570_s16 = smov (!%p388_p2), 112   ;;  %vm654_vm3 = vcmask (!%p388_p2), 138240   ;;  %vm661_vm4 = vcmask (!%p388_p2), 131072  }
   0x8   : > { %1419 = vmatprep.subr.bf16.mxu0 (!%p388_p2), %v513_v24  ;;  %v1355_v52 = vld [vmem:[%s1885_s4] ss:$0 sm:$0xff] (!%p388_p2)  ;;  %s1571_s17 = smov (!%p388_p2), 48   ;;  %s1572_s18 = smov (!%p388_p2), 64   ;;  %vm702_vm5 = vcmask (!%p388_p2), 1040384  }
   0x9   : > { %1420 = vmatpush3.bf16.msra.mxu0 (!%p388_p2), %v513_v24 }
   0xa   : > { %1421 = vmatprep.subr.bf16.mxu0 (!%p388_p2), %v514_v26 }
   0xd   : > { %s1896_s26 = smov (!%p431_p3, %s1346_s26), 1  ;;  %1422 = vmatpush3.bf16.msra.mxu0 %v514_v26 }
   0xe   : > { %s1503_s27 = smul.u32 24, %s1896_s26 }
  0x10   : > { %s435_s30 = scalar_lea.vmem %s1881_s0, %s1503_s27  ;;  %s440_s23 = scalar_lea.vmem %s1894_s13, %s1503_s27 }
  0x11   : > { %v1660_v0 = vld [vmem:[%s435_s30] sm:$0xff]  ;;  %v1662_v1 = vld [vmem:[%s435_s30 + $0x10] sm:$0x1]  ;;  %v1664_v2 = vld [vmem:[%s435_s30 + $0x8] sm:$0xff] }
  0x12   : > { %v446_v3 = vsel %vm445_vm0, %v1660_v0, 0.0  ;;  %v453_v4 = vsel %vm452_vm1, %v1662_v1, 0.0  ;;  %v449_v5 = vsel %vm445_vm0, %v1664_v2, 0.0 }
  0x13   : > { %447 = vadd.xlane.f32.xlu0 %v446_v3  ;;  %454 = vadd.xlane.f32.xlu1 %v453_v4 }
  0x17   : > { %450 = vadd.xlane.f32.xlu0 %v449_v5 }
  0xa0   : > { %v448_v6 = vpop.xlane.xlu0 %447  ;;  %v455_v7 = vpop.xlane.xlu1 %454 }
  0xa1   : > { %v457_v8 = vmul.f32 0.03125, %v448_v6  ;;  %v459_v9 = vmul.f32 0.03125, %v455_v7 }
  0xa3   : > { %v460_v10 = vsub.f32 %v1660_v0, %v457_v8  ;;  %v462_v11 = vsub.f32 %v1662_v1, %v459_v9 }
  0xa4   : > { %v451_v12 = vpop.xlane.xlu0 %450 }
  0xa5   : > { %v458_v13 = vmul.f32 0.03125, %v451_v12  ;;  %v463_v14 = vmul.f32 %v460_v10, %v460_v10  ;;  %v465_v15 = vmul.f32 %v462_v11, %v462_v11 }
  0xa7   : > { %v461_v16 = vsub.f32 %v1664_v2, %v458_v13  ;;  %v466_v17 = vsel %vm445_vm0, %v463_v14, 0.0  ;;  %v472_v18 = vsel %vm452_vm1, %v465_v15, 0.0 }
  0xa8   : > { %467 = vadd.xlane.f32.xlu1 %v466_v17 }
  0xa9   : > { %v464_v19 = vmul.f32 %v461_v16, %v461_v16 }
  0xab   : > { %v469_v20 = vsel %vm445_vm0, %v464_v19, 0.0 }
  0xac   : > { %473 = vadd.xlane.f32.xlu1 %v472_v18  ;;  %470 = vadd.xlane.f32.xlu0 %v469_v20 }
 0x135   : > { %v468_v27 = vpop.xlane.xlu1 %467 }
 0x136   : > { %v475_v28 = vmul.f32 0.03125, %v468_v27 }
 0x138   : > { %v478_v29 = vadd.f32 1e-05, %v475_v28 }
 0x139   : > { %v474_v30 = vpop.xlane.xlu1 %473  ;;  %v471_v31 = vpop.xlane.xlu0 %470 }
 0x13a   : > { %1518 = vrsqrt.f32 %v478_v29  ;;  %v477_v32 = vmul.f32 0.03125, %v474_v30  ;;  %v476_v33 = vmul.f32 0.03125, %v471_v31 }
 0x13c   : > { %v480_v34 = vadd.f32 1e-05, %v477_v32  ;;  %v479_v35 = vadd.f32 1e-05, %v476_v33 }
 0x13e   : > { %1520 = vrsqrt.f32 %v480_v34 }
 0x13f   : > { %1522 = vrsqrt.f32 %v479_v35 }
 0x144   : > { %v1519_v36 = vpop.eup %1518 }
 0x145   : > { %v484_v37 = vmul.f32 %v1519_v36, %v460_v10 }
 0x147   : > { %v494_v43 = vmul.f32 %v1353_v38, %v484_v37 }
 0x148   : > { %v1521_v39 = vpop.eup %1520 }
 0x149   : > { %v1523_v40 = vpop.eup %1522  ;;  %v486_v41 = vmul.f32 %v1521_v39, %v462_v11  ;;  %v504_v48 = vadd.f32 %v1354_v44, %v494_v43 }
 0x14a   : > { %v485_v42 = vmul.f32 %v1523_v40, %v461_v16 }
 0x14b   : > { %v496_v45 = vmul.f32 %v1353_v38, %v486_v41 }
 0x14c   : > { %v495_v46 = vmul.f32 %v1353_v38, %v485_v42 }
 0x14d   : > { %v506_v47 = vadd.f32 %v1354_v44, %v496_v45 }
 0x14e   : > { %v505_v49 = vadd.f32 %v1354_v44, %v495_v46 }
 0x14f   : > { %v508_v50 = vpack.c.bf16 %v506_v47, %v506_v47 }
 0x150   : > { %v507_v51 = vpack.c.bf16 %v505_v49, %v504_v48 }
 0x152   : > { %1423 = vmatprep.mubr.msk.bf16.mxu0 %vm445_vm0, %v507_v51 }
 0x153   : > { %1424 = vmatmul.mubr.msk.bf16.vlgmr.msra.gmra.mrb[0].mxu0 %vm445_vm0, %v508_v50 }
 0x226   : > { %v1425_v53 = vpop.f32.mrb[0].mxu0 }
 0x227   : > { %v571_v54 = vadd.f32 %v1425_v53, %v1355_v52  ;;  %v562_v55 = vpop.f32.mrb[1].mxu0 }
 0x228   : > { %v1426_v56 = vpop.f32.mrb[2].mxu0  ;;  %v563_v59 = vadd.f32 %v1355_v52, %v562_v55 }
 0x229   : > { %v1701_v57 = vpack.c.bf16 %v571_v54, %v571_v54  ;;  %v565_v58 = vpop.f32.mrb[3].mxu0 }
 0x22a   : > { %v566_v60 = vadd.f32 %v1355_v52, %v565_v58 }
 0x22b   : > { %588 = vrot.lane.b32.xlu1 %v1701_v57, %s1568_s14 }
 0x22c   : > { %v1704_v61 = vpack.c.bf16 %v566_v60, %v563_v59 }
 0x22e   : > { %586 = vrot.lane.b32.xlu0 %v1704_v61, %s1568_s14  ;;  %1431 = vmatprep.mubr.msk.bf16.mxu1 %vm590_vm2, %v1704_v61 }
 0x22f   : > { %762 = vrot.lane.b32.xlu1 %v1704_v61, %s1569_s15 }
 0x232   : > { %758 = vrot.lane.b32.xlu0 %v1704_v61, %s1570_s16 }
 0x233   : > { %764 = vrot.lane.b32.xlu1 %v1701_v57, %s1569_s15 }
 0x237   : > { %760 = vrot.lane.b32.xlu1 %v1701_v57, %s1570_s16 }
 0x29d   : > { %v589_v3 = vpop.permute.xlu1 %588 }
 0x29e   : > { %v601_v4 = vsel %vm590_vm2, %v589_v3, 0 }
 0x2a0   : > { %v587_v62 = vpop.permute.xlu0 %586 }
 0x2a1   : > { %1499 = vmatprep.subr.msk.bf16.mxu1 %vm590_vm2, %v587_v62  ;;  %v598_v63 = vsel %vm590_vm2, %v587_v62, 0  ;;  %v763_v5 = vpop.permute.xlu1 %762 }
 0x2a2   : > { %1428 = vmatpush3.bf16.xpose.msra.mxu1 %v598_v63  ;;  %v773_v6 = vsel %vm590_vm2, %v763_v5, 0 }
 0x2a3   : > { %1500 = vmatprep.subr.msk.bf16.mxu1 %vm590_vm2, %v589_v3 }
 0x2a4   : > { %v759_v7 = vpop.permute.xlu0 %758 }
 0x2a5   : > { %v765_v8 = vpop.permute.xlu1 %764 }
 0x2a6   : > { %v776_v9 = vsel %vm590_vm2, %v765_v8, 0 }
 0x2a9   : > { %v761_v10 = vpop.permute.xlu1 %760 }
 0x2aa   : > { %1430 = vmatpush3.bf16.xpose.msra.mxu1 %v601_v4 }
 0x2ab   : > { %1501 = vmatprep.subr.msk.bf16.mxu1 %vm590_vm2, %v763_v5 }
 0x2b1   : > { %1432 = vmatmul.mubr.msk.bf16.vlgmr.msra.gmra.mrb[0].mxu1 %vm590_vm2, %v1701_v57 }
 0x2b2   : > { %1444 = vmatpush3.bf16.xpose.msra.mxu1 %v773_v6  ;;  %1447 = vmatprep.mubr.msk.bf16.mxu1 %vm590_vm2, %v759_v7 }
 0x2b3   : > { %1502 = vmatprep.subr.msk.bf16.mxu1 %vm590_vm2, %v765_v8 }
 0x2ba   : > { %1446 = vmatpush3.bf16.xpose.msra.mxu1 %v776_v9 }
 0x2c1   : > { %1448 = vmatmul.mubr.msk.bf16.vlgmr.msra.gmra.mrb[4].mxu1 %vm590_vm2, %v761_v10 }
 0x384   : > { %v1433_v11 = vpop.f32.mrb[0].mxu1 }
 0x385   : > { %v637_v12 = vpop.f32.mrb[1].mxu1  ;;  %v653_v28 = vmul.f32 0.25, %v1433_v11 }
 0x386   : > { %v651_v13 = vmul.f32 0.25, %v637_v12  ;;  %v1434_v14 = vpop.f32.mrb[2].mxu1 }
 0x387   : > { %v640_v15 = vpop.f32.mrb[3].mxu1  ;;  %v662_v30 = vsel %vm661_vm4, %v653_v28, -inf }
 0x388   : > { %v652_v16 = vmul.f32 0.25, %v640_v15  ;;  %v655_v17 = vsel %vm654_vm3, %v651_v13, -inf }
 0x389   : > { %656 = vmax.xlane.f32.xlu0 %v655_v17 }
 0x38a   : > { %v658_v18 = vsel %vm654_vm3, %v652_v16, -inf }
 0x38b   : > { %659 = vmax.xlane.f32.xlu1 %v658_v18 }
 0x394   : > { %v1449_v19 = vpop.f32.mrb[4].mxu1 }
 0x395   : > { %v828_v20 = vmul.f32 0.25, %v1449_v19  ;;  %v812_v21 = vpop.f32.mrb[5].mxu1 }
 0x396   : > { %v826_v22 = vmul.f32 0.25, %v812_v21  ;;  %v1450_v23 = vpop.f32.mrb[6].mxu1 }
 0x397   : > { %v815_v24 = vpop.f32.mrb[7].mxu1  ;;  %v835_v25 = vsel %vm661_vm4, %v828_v20, -inf }
 0x398   : > { %v827_v26 = vmul.f32 0.25, %v815_v24  ;;  %836 = vmax.xlane.f32.xlu1 %v835_v25  ;;  %v829_v27 = vsel %vm654_vm3, %v826_v22, -inf }
 0x399   : > { %830 = vmax.xlane.f32.xlu0 %v829_v27 }
 0x39a   : > { %v832_v29 = vsel %vm654_vm3, %v827_v26, -inf }
 0x39d   : > { %833 = vmax.xlane.f32.xlu0 %v832_v29 }
 0x3a1   : > { %663 = vmax.xlane.f32.xlu0 %v662_v30  ;;  %v576_v30 = vld [vmem:[%s1886_s5] sm:$0xff] }
 0x416   : > { %v657_v34 = vpop.xlane.xlu0 %656 }
 0x417   : > { %v665_v42 = vsub.f32 %v651_v13, %v657_v34  ;;  %v579_v34 = vld [vmem:[%s1886_s5 + $0x18] sm:$0xff] }
 0x418   : > { %v660_v31 = vpop.xlane.xlu1 %659 }
 0x419   : > { %v666_v32 = vsub.f32 %v652_v16, %v660_v31  ;;  %v668_v45 = vmul.f32 1.442695, %v665_v42  ;;  %v577_v31 = vld [vmem:[%s1886_s5 + $0x8] sm:$0xff] }
 0x41b   : > { %v670_v33 = vmul.f32 1.442695, %v666_v32  ;;  %v580_v32 = vpack.c.bf16 %v577_v31, %v576_v30 }
 0x41d   : > { %1524 = vpow2.f32 %v670_v33  ;;  %v578_v33 = vld [vmem:[%s1886_s5 + $0x10] sm:$0xff] }
 0x425   : > { %v837_v35 = vpop.xlane.xlu1 %836 }
 0x426   : > { %v840_v36 = vsub.f32 %v828_v20, %v837_v35  ;;  %v831_v37 = vpop.xlane.xlu0 %830  ;;  %v581_v35 = vpack.c.bf16 %v579_v34, %v578_v33 }
 0x427   : > { %v1731_v38 = vpop.eup %1524  ;;  %v838_v46 = vsub.f32 %v826_v22, %v831_v37 }
 0x428   : > { %v845_v39 = vmul.f32 1.442695, %v840_v36  ;;  %v677_v40 = vsel %vm654_vm3, %v1731_v38, 0.0 }
 0x429   : > { %678 = vadd.xlane.f32.xlu1 %v677_v40  ;;  %v841_v49 = vmul.f32 1.442695, %v838_v46 }
 0x42a   : > { %1526 = vpow2.f32 %v845_v39  ;;  %v834_v41 = vpop.xlane.xlu0 %833 }
 0x42b   : > { %v839_v58 = vsub.f32 %v827_v26, %v834_v41 }
 0x42d   : > { %v843_v59 = vmul.f32 1.442695, %v839_v58  ;;  %v1370_v58 = vld [vmem:[%s1887_s6] ss:$0 sm:$0xff] }
 0x42e   : > { %v664_v43 = vpop.xlane.xlu0 %663 }
 0x42f   : > { %v667_v44 = vsub.f32 %v653_v28, %v664_v43 }
 0x431   : > { %v672_v47 = vmul.f32 1.442695, %v667_v44 }
 0x433   : > { %1528 = vpow2.f32 %v672_v47 }
 0x434   : > { %v1735_v48 = vpop.eup %1526  ;;  %1530 = vpow2.f32 %v668_v45 }
 0x435   : > { %v853_v50 = vsel %vm661_vm4, %v1735_v48, 0.0  ;;  %1532 = vpow2.f32 %v841_v49 }
 0x436   : > { %854 = vadd.xlane.f32.xlu1 %v853_v50  ;;  %1534 = vpow2.f32 %v843_v59 }
 0x43d   : > { %v1529_v51 = vpop.eup %1528 }
 0x43e   : > { %v680_v52 = vsel %vm661_vm4, %v1529_v51, 0.0  ;;  %v1531_v53 = vpop.eup %1530 }
 0x43f   : > { %681 = vadd.xlane.f32.xlu0 %v680_v52  ;;  %v674_v54 = vsel %vm654_vm3, %v1531_v53, 0.0  ;;  %v1533_v55 = vpop.eup %1532 }
 0x440   : > { %v847_v56 = vsel %vm654_vm3, %v1533_v55, 0.0  ;;  %v1535_v60 = vpop.eup %1534 }
 0x441   : > { %v850_v62 = vsel %vm654_vm3, %v1535_v60, 0.0 }
 0x443   : > { %675 = vadd.xlane.f32.xlu0 %v674_v54 }
 0x447   : > { %848 = vadd.xlane.f32.xlu0 %v847_v56  ;;  %864 = vrot.lane.b32.xlu1 %v1704_v61, %s1571_s17 }
 0x44b   : > { %693 = vrot.lane.b32.xlu1 %v1701_v57, %s1572_s18 }
 0x45d   : > { %691 = vrot.lane.b32.xlu0 %v1704_v61, %s1572_s18  ;;  %v1573_v61 = vmov 0  }
 0x45e   : > { %v704_v8 = vsel %vm702_vm5, 65535, %v1573_v61 }
 0x46f   : > { %851 = vadd.xlane.f32.xlu1 %v850_v62 }
 0x480   : > { %866 = vrot.lane.b32.xlu1 %v1701_v57, %s1571_s17 }
 0x4b6   : > { %v679_v63 = vpop.xlane.xlu1 %678 }
 0x4c3   : > { %v855_v3 = vpop.xlane.xlu1 %854 }
 0x4c7   : > { %v865_v4 = vpop.permute.xlu1 %864 }
 0x4c8   : > { %1451 = vmatprep.subr.bf16.mxu1 %v865_v4 }
 0x4c9   : > { %1452 = vmatpush3.bf16.msra.mxu1 %v865_v4 }
 0x4cb   : > { %v694_v9 = vpop.permute.xlu1 %693 }
 0x4cc   : > { %v682_v5 = vpop.xlane.xlu0 %681  ;;  %v706_v13 = vand.u32 %v704_v8, %v694_v9 }
 0x4cd   : > { %1536 = vrcp.f32 %v682_v5 }
 0x4ce   : > { %1538 = vrcp.f32 %v679_v63 }
 0x4d0   : > { %v676_v6 = vpop.xlane.xlu0 %675 }
 0x4d1   : > { %1540 = vrcp.f32 %v676_v6 }
 0x4d2   : > { %1542 = vrcp.f32 %v855_v3 }
 0x4d4   : > { %v849_v7 = vpop.xlane.xlu0 %848 }
 0x4d5   : > { %1544 = vrcp.f32 %v849_v7 }
 0x4d7   : > { %v1537_v10 = vpop.eup %1536 }
 0x4d8   : > { %v692_v11 = vpop.permute.xlu0 %691  ;;  %v1539_v12 = vpop.eup %1538  ;;  %v688_v14 = vmul.f32 %v1537_v10, %v1529_v51 }
 0x4d9   : > { %1435 = vmatprep.subr.bf16.mxu0 %v692_v11  ;;  %v687_v16 = vmul.f32 %v1539_v12, %v1731_v38 }
 0x4da   : > { %1436 = vmatpush3.bf16.msra.mxu0 %v692_v11  ;;  %v690_v18 = vpack.c.bf16 %v688_v14, %v688_v14 }
 0x4db   : > { %v1541_v57 = vpop.eup %1540  ;;  %1437 = vmatprep.subr.bf16.mxu0 %v706_v13 }
 0x4dc   : > { %v686_v15 = vmul.f32 %v1541_v57, %v1531_v53  ;;  %v1543_v22 = vpop.eup %1542 }
 0x4dd   : > { %v861_v25 = vmul.f32 %v1543_v22, %v1735_v48 }
 0x4de   : > { %1438 = vmatpush3.bf16.msra.mxu0 %v706_v13  ;;  %v689_v17 = vpack.c.bf16 %v687_v16, %v686_v15 }
 0x4df   : > { %v1545_v23 = vpop.eup %1544  ;;  %v863_v29 = vpack.c.bf16 %v861_v25, %v861_v25  ;;  %1465 = vmatprep.subr.bf16.mxu0 %v580_v32 }
 0x4e0   : > { %1439 = vmatprep.mubr.msk.bf16.mxu0 %vm654_vm3, %v689_v17  ;;  %v859_v26 = vmul.f32 %v1545_v23, %v1533_v55  ;;  %v1112_v23 = vld [vmem:[%s1890_s9 + $0x10] sm:$0xff] }
 0x4e1   : > { %1440 = vmatmul.mubr.msk.bf16.vlgmr.msra.gmra.mrb[4].mxu0 %vm654_vm3, %v690_v18 }
 0x4e2   : > { %1466 = vmatpush3.bf16.msra.mxu0 %v580_v32 }
 0x4fc   : > { %v852_v19 = vpop.xlane.xlu1 %851 }
 0x4fd   : > { %1546 = vrcp.f32 %v852_v19 }
 0x500   : > { %v867_v20 = vpop.permute.xlu1 %866 }
 0x501   : > { %v876_v21 = vand.u32 %v867_v20, %v704_v8  ;;  %v1110_v20 = vld [vmem:[%s1890_s9] sm:$0xff] }
 0x503   : > { %1453 = vmatprep.subr.bf16.mxu1 %v876_v21 }
 0x504   : > { %1454 = vmatpush3.bf16.msra.mxu1 %v876_v21  ;;  %v1111_v21 = vld [vmem:[%s1890_s9 + $0x8] sm:$0xff] }
 0x505   : > { %1459 = vmatprep.subr.bf16.mxu1 %v581_v35  ;;  %v1114_v22 = vpack.c.bf16 %v1111_v21, %v1110_v20 }
 0x507   : > { %v1547_v24 = vpop.eup %1546 }
 0x508   : > { %v860_v27 = vmul.f32 %v1547_v24, %v1535_v60  ;;  %v1113_v24 = vld [vmem:[%s1890_s9 + $0x18] sm:$0xff] }
 0x509   : > { %v1115_v25 = vpack.c.bf16 %v1113_v24, %v1112_v23 }
 0x50a   : > { %v862_v28 = vpack.c.bf16 %v860_v27, %v859_v26 }
 0x50c   : > { %1455 = vmatprep.mubr.msk.bf16.mxu1 %vm654_vm3, %v862_v28 }
 0x50d   : > { %1456 = vmatmul.mubr.msk.bf16.vlgmr.msra.gmra.mrb[8].mxu1 %vm654_vm3, %v863_v29 }
 0x50e   : > { %1460 = vmatpush3.bf16.msra.mxu1 %v581_v35 }
 0x50f   : > { %1471 = vmatprep.subr.bf16.mxu1 %v1114_v22 }
 0x5b4   : > { %v1441_v36 = vpop.f32.mrb[4].mxu0 }
 0x5b5   : > { %v742_v37 = vpop.f32.mrb[5].mxu0  ;;  %v757_v41 = vpack.c.bf16 %v1441_v36, %v1441_v36 }
 0x5b6   : > { %v1442_v38 = vpop.f32.mrb[6].mxu0 }
 0x5b7   : > { %v745_v39 = vpop.f32.mrb[7].mxu0 }
 0x5b8   : > { %v756_v40 = vpack.c.bf16 %v745_v39, %v742_v37  ;;  %v1371_v37 = vld [vmem:[%s1888_s7] ss:$0 sm:$0xff] }
 0x5ba   : > { %1467 = vmatprep.mubr.msk.bf16.mxu0 %vm590_vm2, %v756_v40 }
 0x5bb   : > { %1468 = vmatmul.mubr.msk.bf16.vlgmr.msra.gmra.mrb[8].mxu0 %vm590_vm2, %v757_v41 }
 0x5e0   : > { %v1457_v42 = vpop.f32.mrb[8].mxu1 }
 0x5e1   : > { %v912_v43 = vpop.f32.mrb[9].mxu1  ;;  %v927_v47 = vpack.c.bf16 %v1457_v42, %v1457_v42 }
 0x5e2   : > { %v1458_v44 = vpop.f32.mrb[10].mxu1 }
 0x5e3   : > { %v915_v45 = vpop.f32.mrb[11].mxu1 }
 0x5e4   : > { %v926_v46 = vpack.c.bf16 %v915_v45, %v912_v43  ;;  %v1372_v43 = vld [vmem:[%s1889_s8] ss:$0 sm:$0xff] }
 0x5e6   : > { %1461 = vmatprep.mubr.msk.bf16.mxu1 %vm590_vm2, %v926_v46 }
 0x5e7   : > { %1462 = vmatmul.mubr.msk.bf16.vlgmr.msra.gmra.mrb[12].mxu1 %vm590_vm2, %v927_v47 }
 0x5e8   : > { %1472 = vmatpush3.bf16.msra.mxu1 %v1114_v22 }
 0x5e9   : > { %1473 = vmatprep.subr.bf16.mxu1 %v1115_v25 }
 0x5ec   : > { %1474 = vmatpush3.bf16.msra.mxu1 %v1115_v25 }
 0x68e   : > { %v1469_v48 = vpop.f32.mrb[8].mxu0 }
 0x68f   : > { %v1022_v49 = vpop.f32.mrb[9].mxu0 }
 0x690   : > { %v1470_v50 = vpop.f32.mrb[10].mxu0 }
 0x691   : > { %v1025_v51 = vpop.f32.mrb[11].mxu0 }
 0x6ba   : > { %v1463_v52 = vpop.f32.mrb[12].mxu1 }
 0x6bb   : > { %v1031_v53 = vadd.f32 %v1469_v48, %v1463_v52  ;;  %v968_v54 = vpop.f32.mrb[13].mxu1  ;;  %v1207_v52 = vld [vmem:[%s1892_s11 + $0x8] sm:$0xff] }
 0x6bc   : > { %v1023_v55 = vadd.f32 %v1022_v49, %v968_v54  ;;  %v1464_v56 = vpop.f32.mrb[14].mxu1  ;;  %v1208_v54 = vld [vmem:[%s1892_s11 + $0x10] sm:$0xff] }
 0x6bd   : > { %v971_v59 = vpop.f32.mrb[15].mxu1  ;;  %v1038_v60 = vadd.f32 %v1031_v53, %v1662_v1 }
 0x6be   : > { %v1036_v62 = vadd.f32 %v1023_v55, %v1660_v0  ;;  %v1026_v63 = vadd.f32 %v1025_v51, %v971_v59  ;;  %v1206_v51 = vld [vmem:[%s1892_s11] sm:$0xff]  ;;  %v1209_v55 = vld [vmem:[%s1892_s11 + $0x18] sm:$0xff]  ;;  %v1211_v59 = vld [vmem:[%s1892_s11 + $0x28] sm:$0xff] }
 0x6bf   : > { %v1777_v5 = vadd.f32 %v1370_v58, %v1038_v60  ;;  %v1222_v53 = vpack.c.bf16 %v1207_v52, %v1206_v51  ;;  %v1223_v56 = vpack.c.bf16 %v1209_v55, %v1208_v54  ;;  %v1376_v51 = vld [vmem:[%s1893_s12] ss:$0 sm:$0xff] }
 0x6c0   : > { %v1774_v3 = vadd.f32 %v1370_v58, %v1036_v62  ;;  %v1037_v4 = vadd.f32 %v1026_v63, %v1664_v2  ;;  %v1212_v62 = vld [vmem:[%s1892_s11 + $0x30] sm:$0xff]  ;;  %v1213_v63 = vld [vmem:[%s1892_s11 + $0x38] sm:$0xff] }
 0x6c1   : > { %v1055_v0 = vsel %vm452_vm1, %v1777_v5, 0.0  ;;  %1479 = vmatprep.subr.bf16.mxu0 %v1222_v53 }
 0x6c2   : > { %v1779_v6 = vadd.f32 %v1370_v58, %v1037_v4  ;;  %v1049_v7 = vsel %vm445_vm0, %v1774_v3, 0.0  ;;  %1480 = vmatpush3.bf16.msra.mxu0 %v1222_v53  ;;  %v1210_v58 = vld [vmem:[%s1892_s11 + $0x20] sm:$0xff]  ;;  %v1225_v4 = vpack.c.bf16 %v1213_v63, %v1212_v62 }
 0x6c3   : > { %1050 = vadd.xlane.f32.xlu0 %v1049_v7  ;;  %1481 = vmatprep.subr.bf16.mxu0 %v1223_v56  ;;  %v1224_v60 = vpack.c.bf16 %v1211_v59, %v1210_v58  ;;  %v1214_v7 = vld [vmem:[%s1892_s11 + $0x40] sm:$0xff] }
 0x6c4   : > { %v1052_v61 = vsel %vm445_vm0, %v1779_v6, 0.0 }
 0x6c5   : > { %1053 = vadd.xlane.f32.xlu1 %v1052_v61  ;;  %v1215_v61 = vld [vmem:[%s1892_s11 + $0x48] sm:$0xff] }
 0x6c6   : > { %1482 = vmatpush3.bf16.msra.mxu0 %v1223_v56 }
 0x6c7   : > { %1056 = vadd.xlane.f32.xlu0 %v1055_v0  ;;  %1483 = vmatprep.subr.bf16.mxu0 %v1224_v60  ;;  %v1216_v0 = vld [vmem:[%s1892_s11 + $0x50] sm:$0xff] }
 0x6ca   : > { %1484 = vmatpush3.bf16.msra.mxu0 %v1224_v60 }
 0x6cb   : > { %1485 = vmatprep.subr.bf16.mxu0 %v1225_v4 }
 0x6ce   : > { %1486 = vmatpush3.bf16.msra.mxu0 %v1225_v4 }
 0x750   : > { %v1051_v1 = vpop.xlane.xlu0 %1050 }
 0x751   : > { %v1058_v8 = vmul.f32 0.03125, %v1051_v1  ;;  %v1226_v1 = vpack.c.bf16 %v1215_v61, %v1214_v7 }
 0x752   : > { %v1054_v9 = vpop.xlane.xlu1 %1053 }
 0x753   : > { %v1061_v2 = vsub.f32 %v1774_v3, %v1058_v8  ;;  %v1059_v10 = vmul.f32 0.03125, %v1054_v9  ;;  %v1217_v8 = vld [vmem:[%s1892_s11 + $0x58] sm:$0xff]  ;;  %1487 = vmatprep.subr.bf16.mxu0 %v1226_v1 }
 0x754   : > { %v1057_v11 = vpop.xlane.xlu0 %1056  ;;  %v1227_v9 = vpack.c.bf16 %v1217_v8, %v1216_v0  ;;  %1488 = vmatpush3.bf16.msra.mxu0 %v1226_v1 }
 0x755   : > { %v1062_v12 = vsub.f32 %v1779_v6, %v1059_v10  ;;  %v1060_v13 = vmul.f32 0.03125, %v1057_v11  ;;  %v1064_v57 = vmul.f32 %v1061_v2, %v1061_v2  ;;  %v1219_v10 = vld [vmem:[%s1892_s11 + $0x68] sm:$0xff] }
 0x756   : > { %1489 = vmatprep.subr.bf16.mxu0 %v1227_v9 }
 0x757   : > { %v1063_v14 = vsub.f32 %v1777_v5, %v1060_v13  ;;  %v1067_v15 = vsel %vm445_vm0, %v1064_v57, 0.0  ;;  %v1065_v16 = vmul.f32 %v1062_v12, %v1062_v12  ;;  %v1221_v13 = vld [vmem:[%s1892_s11 + $0x78] sm:$0xff] }
 0x758   : > { %1068 = vadd.xlane.f32.xlu0 %v1067_v15  ;;  %1490 = vmatpush3.bf16.msra.mxu0 %v1227_v9 }
 0x759   : > { %v1066_v17 = vmul.f32 %v1063_v14, %v1063_v14  ;;  %v1070_v19 = vsel %vm445_vm0, %v1065_v16, 0.0 }
 0x75b   : > { %v1073_v18 = vsel %vm452_vm1, %v1066_v17, 0.0 }
 0x75c   : > { %1074 = vadd.xlane.f32.xlu1 %v1073_v18  ;;  %1071 = vadd.xlane.f32.xlu0 %v1070_v19 }
 0x7e5   : > { %v1069_v26 = vpop.xlane.xlu0 %1068 }
 0x7e6   : > { %v1076_v27 = vmul.f32 0.03125, %v1069_v26 }
 0x7e8   : > { %v1079_v28 = vadd.f32 1e-05, %v1076_v27 }
 0x7e9   : > { %v1072_v29 = vpop.xlane.xlu0 %1071  ;;  %v1075_v30 = vpop.xlane.xlu1 %1074 }
 0x7ea   : > { %1548 = vrsqrt.f32 %v1079_v28  ;;  %v1077_v31 = vmul.f32 0.03125, %v1072_v29  ;;  %v1078_v32 = vmul.f32 0.03125, %v1075_v30 }
 0x7ec   : > { %v1080_v33 = vadd.f32 1e-05, %v1077_v31  ;;  %v1081_v34 = vadd.f32 1e-05, %v1078_v32 }
 0x7ee   : > { %1550 = vrsqrt.f32 %v1080_v33 }
 0x7ef   : > { %1552 = vrsqrt.f32 %v1081_v34 }
 0x7f4   : > { %v1549_v35 = vpop.eup %1548 }
 0x7f5   : > { %v1085_v36 = vmul.f32 %v1549_v35, %v1061_v2  ;;  %v1218_v2 = vld [vmem:[%s1892_s11 + $0x60] sm:$0xff] }
 0x7f6   : > { %v1228_v11 = vpack.c.bf16 %v1219_v10, %v1218_v2 }
 0x7f7   : > { %v1095_v41 = vmul.f32 %v1371_v37, %v1085_v36 }
 0x7f8   : > { %v1551_v38 = vpop.eup %1550  ;;  %1491 = vmatprep.subr.bf16.mxu0 %v1228_v11 }
 0x7f9   : > { %v1553_v39 = vpop.eup %1552  ;;  %v1086_v40 = vmul.f32 %v1551_v38, %v1062_v12  ;;  %v1105_v46 = vadd.f32 %v1372_v43, %v1095_v41  ;;  %v1220_v12 = vld [vmem:[%s1892_s11 + $0x70] sm:$0xff]  ;;  %1492 = vmatpush3.bf16.msra.mxu0 %v1228_v11 }
 0x7fa   : > { %v1087_v42 = vmul.f32 %v1553_v39, %v1063_v14  ;;  %v1229_v57 = vpack.c.bf16 %v1221_v13, %v1220_v12  ;;  %v1373_v14 = vld [vmem:[%s1891_s10] ss:$0 sm:$0xff] }
 0x7fb   : > { %v1096_v44 = vmul.f32 %v1371_v37, %v1086_v40 }
 0x7fc   : > { %v1097_v45 = vmul.f32 %v1371_v37, %v1087_v42  ;;  %1493 = vmatprep.subr.bf16.mxu0 %v1229_v57 }
 0x7fd   : > { %v1106_v47 = vadd.f32 %v1372_v43, %v1096_v44  ;;  %1494 = vmatpush3.bf16.msra.mxu0 %v1229_v57 }
 0x7fe   : > { %v1107_v48 = vadd.f32 %v1372_v43, %v1097_v45 }
 0x7ff   : > { %v1108_v49 = vpack.c.bf16 %v1106_v47, %v1105_v46 }
 0x800   : > { %v1109_v50 = vpack.c.bf16 %v1107_v48, %v1107_v48 }
 0x801   : > { %1475 = vmatprep.mubr.msk.bf16.mxu1 %vm445_vm0, %v1108_v49 }
 0x802   : > { %1476 = vmatmul.mubr.msk.bf16.vlgmr.msra.gmra.mrb[16].mxu1 %vm445_vm0, %v1109_v50 }
 0x8d5   : > { %v1477_v15 = vpop.f32.mrb[16].mxu1 }
 0x8d6   : > { %v1172_v16 = vadd.f32 %v1477_v15, %v1373_v14  ;;  %v1163_v17 = vpop.f32.mrb[17].mxu1 }
 0x8d7   : > { %v1164_v18 = vadd.f32 %v1373_v14, %v1163_v17  ;;  %v1478_v19 = vpop.f32.mrb[18].mxu1 }
 0x8d8   : > { %v1179_v20 = vmul.f32 %v1172_v16, %v1172_v16  ;;  %v1166_v21 = vpop.f32.mrb[19].mxu1 }
 0x8d9   : > { %v1177_v22 = vmul.f32 %v1164_v18, %v1164_v18  ;;  %v1167_v23 = vadd.f32 %v1373_v14, %v1166_v21 }
 0x8da   : > { %v1182_v24 = vmul.f32 %v1179_v20, %v1172_v16 }
 0x8db   : > { %v1180_v25 = vmul.f32 %v1177_v22, %v1164_v18  ;;  %v1178_v26 = vmul.f32 %v1167_v23, %v1167_v23 }
 0x8dc   : > { %v1185_v27 = vmul.f32 0.044715, %v1182_v24 }
 0x8dd   : > { %v1183_v28 = vmul.f32 0.044715, %v1180_v25  ;;  %v1181_v29 = vmul.f32 %v1178_v26, %v1167_v23 }
 0x8de   : > { %v1188_v30 = vadd.f32 %v1185_v27, %v1172_v16 }
 0x8df   : > { %v1186_v31 = vadd.f32 %v1183_v28, %v1164_v18  ;;  %v1184_v32 = vmul.f32 0.044715, %v1181_v29 }
 0x8e0   : > { %v1191_v33 = vmul.f32 0.7978846, %v1188_v30 }
 0x8e1   : > { %v1189_v34 = vmul.f32 0.7978846, %v1186_v31  ;;  %v1187_v35 = vadd.f32 %v1184_v32, %v1167_v23 }
 0x8e2   : > { %1554 = vtanh.f32 %v1191_v33 }
 0x8e3   : > { %1556 = vtanh.f32 %v1189_v34  ;;  %v1190_v36 = vmul.f32 0.7978846, %v1187_v35 }
 0x8e5   : > { %1558 = vtanh.f32 %v1190_v36 }
 0x8ec   : > { %v1555_v37 = vpop.eup %1554 }
 0x8ed   : > { %v1557_v38 = vpop.eup %1556  ;;  %v1197_v39 = vadd.f32 1.0, %v1555_v37 }
 0x8ee   : > { %v1195_v40 = vadd.f32 1.0, %v1557_v38 }
 0x8ef   : > { %v1559_v41 = vpop.eup %1558  ;;  %v1200_v42 = vmul.f32 0.5, %v1197_v39 }
 0x8f0   : > { %v1196_v43 = vadd.f32 1.0, %v1559_v41  ;;  %v1198_v44 = vmul.f32 0.5, %v1195_v40 }
 0x8f1   : > { %v1203_v46 = vmul.f32 %v1200_v42, %v1172_v16 }
 0x8f2   : > { %v1199_v45 = vmul.f32 0.5, %v1196_v43  ;;  %v1201_v47 = vmul.f32 %v1198_v44, %v1164_v18 }
 0x8f3   : > { %v1205_v50 = vpack.c.bf16 %v1203_v46, %v1203_v46 }
 0x8f4   : > { %v1202_v48 = vmul.f32 %v1199_v45, %v1167_v23 }
 0x8f6   : > { %v1204_v49 = vpack.c.bf16 %v1202_v48, %v1201_v47 }
 0x8f8   : > { %1495 = vmatprep.mubr.bf16.mxu0 %v1204_v49 }
 0x8f9   : > { %1496 = vmatmul.mubr.bf16.vlgmr.msra.gmra.mrb[12].mxu0 %v1205_v50 }
 0x9cc   : > { %v1497_v52 = vpop.f32.mrb[12].mxu0 }
 0x9cd   : > { %v1280_v53 = vadd.f32 %v1497_v52, %v1376_v51  ;;  %v1271_v54 = vpop.f32.mrb[13].mxu0 }
 0x9ce   : > { %v1272_v55 = vadd.f32 %v1376_v51, %v1271_v54  ;;  %v1498_v56 = vpop.f32.mrb[14].mxu0 }
 0x9cf   : > { %v1287_v58 = vadd.f32 %v1280_v53, %v1777_v5  ;;  %v1274_v59 = vpop.f32.mrb[15].mxu0 }
 0x9d0   : > { %v1285_v60 = vadd.f32 %v1272_v55, %v1774_v3  ;;  %v1275_v62 = vadd.f32 %v1376_v51, %v1274_v59 }
 0x9d1   : > { %1290 = vst.msk [vmem:[%s440_s23 + $0x10] sm:$0x1] %vm452_vm1, %v1287_v58 }
 0x9d2   : > { %1288 = vst.msk [vmem:[%s440_s23] sm:$0xff] %vm445_vm0, %v1285_v60  ;;  %v1286_v63 = vadd.f32 %v1275_v62, %v1779_v6 }
 0x9d4   : > { %1289 = vst.msk [vmem:[%s440_s23 + $0x8] sm:$0xff] %vm445_vm0, %v1286_v63 }
 0x9d5 PF: > { %s23_s25 = sadd.s32 1, %s1566_s25  }
 0x9d6   : > { %p20_p4 = scmp.ge.s32.totalorder %s23_s25, 4  }
 0x9d8   :  { %22 = sbr.rel (!%p20_p4) target bundleno = 1 (0x1), region = 102 }

</bundles_post_ra>
